<compile_context>
chip_gen: v7x
topology: tpu7x:2x2x1
jax: 0.10.0
libtpu: 0.0.40
codegen_flags: <defaults>
</compile_context>

<pallas_src>
import functools

import jax
import jax.numpy as jnp
from jax.experimental import pallas as pl
from jax.experimental.pallas import tpu as pltpu


def _round_up(x, m):
    return (x + m - 1) // m * m


# ---------------------------------------------------------------------------
# Fused kernel: one batch image, conv3x3+ReLU -> conv3x3+ReLU, all in VMEM.
# ---------------------------------------------------------------------------
def _middle_block_kernel(x_ref, w1_ref, b1_ref, w2_ref, b2_ref, o_ref,
                         xp1_ref, xp2_ref, *, W, PRE, channels_last_out):
    # x_ref  : (1, H*W, Cin)  bf16, NHWC-flat image
    # w1_ref : (9*Cin, Cmid)  bf16 im2col weights, rows ordered (dy, dx, ci)
    # b1_ref : (1, Cmid)      f32
    # w2_ref : (9*Cmid, Cout) bf16
    # b2_ref : (1, Cout)      f32
    # o_ref  : (1, H*W, Cout) if channels_last_out else (1, Cout, H*W)
    # xp1_ref: VMEM (SP, Cin)  bf16: [0:PRE) zero halo | [PRE:PRE+HW) image | zero halo
    # xp2_ref: VMEM (SP, Cmid) bf16: same layout for the conv1 activation
    HW = x_ref.shape[1]
    SP, Cin = xp1_ref.shape
    Cmid = xp2_ref.shape[1]
    POST = SP - PRE - HW

    # Lateral masks: in the unpadded flat layout the dx=0 / dx=2 taps wrap into the
    # neighbouring image row at x==0 / x==W-1; their contribution there must be 0.
    col = jax.lax.broadcasted_iota(jnp.int32, (HW, 1), 0) % W
    left_ok = col != 0
    right_ok = col != (W - 1)

    def conv3x3_relu(xp_ref, w_ref, b_ref, C):
        def tap(dy, dx):
            s = PRE + (dy - 1) * W + (dx - 1)
            return xp_ref[s:s + HW, :]                       # (HW, C) bf16, contiguous slice

        if C >= 128:
            # 9 accumulating K=C matmuls: no (HW, 9C) patch slab in VMEM; the f32
            # accumulation is free in the MRB on v7x.  Masks applied per dx-group
            # on the (HW, Cout) output: 2 selects total.
            def group(dx):
                out = None
                for dy in range(3):
                    wt = w_ref[(dy * 3 + dx) * C:(dy * 3 + dx + 1) * C, :]
                    p = jnp.dot(tap(dy, dx), wt, preferred_element_type=jnp.float32)
                    out = p if out is None else out + p
                return out
            acc = group(1)
            acc = acc + jnp.where(left_ok, group(0), 0.0)
            acc = acc + jnp.where(right_ok, group(2), 0.0)
        else:
            # Tiny C (test config / v5e): one MXU matmul with K = 9*C; mask the
            # wrapping taps on the (small) input slices before the lane concat.
            taps = []
            for dy in range(3):
                for dx in range(3):
                    t = tap(dy, dx)
                    if dx == 0:
                        t = jnp.where(left_ok, t, 0)
                    elif dx == 2:
                        t = jnp.where(right_ok, t, 0)
                    taps.append(t)
            p = jnp.concatenate(taps, axis=-1)               # (HW, 9C) bf16
            acc = jnp.dot(p, w_ref[...], preferred_element_type=jnp.float32)
        return jnp.maximum(acc + b_ref[...], 0.0)            # (HW, C_out) f32

    # ---- stage 0: zero only the halo slabs, then one aligned interior fill ----
    xp1_ref[0:PRE, :] = jnp.zeros((PRE, Cin), jnp.bfloat16)
    xp1_ref[PRE + HW:SP, :] = jnp.zeros((POST, Cin), jnp.bfloat16)
    xp1_ref[PRE:PRE + HW, :] = x_ref[0]

    # ---- conv1 + ReLU (activation stays in VMEM) ----
    a1 = conv3x3_relu(xp1_ref, w1_ref, b1_ref, Cin)          # (HW, Cmid) f32
    xp2_ref[0:PRE, :] = jnp.zeros((PRE, Cmid), jnp.bfloat16)
    xp2_ref[PRE + HW:SP, :] = jnp.zeros((POST, Cmid), jnp.bfloat16)
    xp2_ref[PRE:PRE + HW, :] = a1.astype(jnp.bfloat16)

    # ---- conv2 + ReLU ----
    a2 = conv3x3_relu(xp2_ref, w2_ref, b2_ref, Cmid)         # (HW, Cout) f32

    if channels_last_out:
        o_ref[0] = a2.astype(o_ref.dtype)                    # (HW, Cout): lane-dense NHWC
    else:
        o_ref[0] = a2.T.astype(o_ref.dtype)                  # (Cout, HW): lane-dense NCHW


# ---------------------------------------------------------------------------
# Wrapper
# ---------------------------------------------------------------------------
@jax.jit
def middle_block_pallas(x_nchw, w1_mat, b1, w2_mat, b2):
    N, Cin, H, W = x_nchw.shape
    Cmid = w1_mat.shape[1]
    Cout = w2_mat.shape[1]
    HW = H * W
    PRE = _round_up(W + 1, 16)                    # top halo rows (>= W+1, bf16-tile aligned)
    SP = _round_up(PRE + HW + W + 1, 16)          # + bottom halo for the farthest tap
    channels_last_out = Cout >= 128

    # One-time NCHW -> NHWC-flat + bf16 cast in XLA (out of the kernel's critical path;
    # also halves the input HBM traffic).
    x_flat = jnp.transpose(x_nchw, (0, 2, 3, 1)).reshape(N, HW, Cin).astype(jnp.bfloat16)

    out_block = (1, HW, Cout) if channels_last_out else (1, Cout, HW)

    # VMEM budget from actual buffer sizes (2x for double-buffered pipeline blocks),
    # clamped so it stays safe on v7x's 64 MiB while allowing big tiles on v5e/v6e.
    scratch_bytes = SP * (Cin + Cmid) * 2
    block_bytes = 2 * (HW * Cin * 2 + HW * Cout * 4 +
                       9 * Cin * Cmid * 2 + 9 * Cmid * Cout * 2 + (Cmid + Cout) * 4)
    vmem_limit = int(min(max(32 * 1024 * 1024, 2 * (scratch_bytes + block_bytes)),
                         96 * 1024 * 1024))

    kernel = functools.partial(_middle_block_kernel, W=W, PRE=PRE,
                               channels_last_out=channels_last_out)

    out = pl.pallas_call(
        kernel,
        out_shape=jax.ShapeDtypeStruct((N,) + out_block[1:], x_nchw.dtype),
        grid_spec=pltpu.PrefetchScalarGridSpec(
            num_scalar_prefetch=0,
            grid=(N,),
            in_specs=[
                pl.BlockSpec((1, HW, Cin), lambda n: (n, 0, 0)),
                pl.BlockSpec((9 * Cin, Cmid), lambda n: (0, 0)),
                pl.BlockSpec((1, Cmid), lambda n: (0, 0)),
                pl.BlockSpec((9 * Cmid, Cout), lambda n: (0, 0)),
                pl.BlockSpec((1, Cout), lambda n: (0, 0)),
            ],
            out_specs=pl.BlockSpec(out_block, lambda n: (n, 0, 0)),
            scratch_shapes=[
                pltpu.VMEM((SP, Cin), jnp.bfloat16),
                pltpu.VMEM((SP, Cmid), jnp.bfloat16),
            ],
        ),
        compiler_params=pltpu.CompilerParams(
            dimension_semantics=("parallel",),
            vmem_limit_bytes=vmem_limit,
        ),
    )(x_flat, w1_mat, b1.reshape(1, Cmid), w2_mat, b2.reshape(1, Cout))

    if channels_last_out:
        return jnp.transpose(out.reshape(N, H, W, Cout), (0, 3, 1, 2))
    return out.reshape(N, Cout, H, W)


# ---------------------------------------------------------------------------
# Parameters (PyTorch nn.Conv2d default init) + module wrapper
# ---------------------------------------------------------------------------
def _init_conv_params(key, in_ch, out_ch):
    kw, kb = jax.random.split(key)
    bound = 1.0 / jnp.sqrt(in_ch * 3.0 * 3.0)
    w_oihw = jax.random.uniform(kw, (out_ch, in_ch, 3, 3), jnp.float32, -bound, bound)
    b = jax.random.uniform(kb, (out_ch,), jnp.float32, -bound, bound)
    return w_oihw, b


def _im2col_weights(w_oihw):
    # OIHW (co, ci, dy, dx) -> (dy, dx, ci, co) -> (9*ci, co), bf16 for the MXU.
    o, i, kh, kw = w_oihw.shape
    return jnp.transpose(w_oihw, (2, 3, 1, 0)).reshape(kh * kw * i, o).astype(jnp.bfloat16)


class MiddleBlockPallas:
    def __init__(self, in_channels, middle_channels, out_channels, key):
        k1, k2 = jax.random.split(key)
        self.w1_oihw, self.b1 = _init_conv_params(k1, in_channels, middle_channels)
        self.w2_oihw, self.b2 = _init_conv_params(k2, middle_channels, out_channels)
        self.w1_mat = _im2col_weights(self.w1_oihw)
        self.w2_mat = _im2col_weights(self.w2_oihw)

    def __call__(self, x_nchw):
        return middle_block_pallas(x_nchw, self.w1_mat, self.b1, self.w2_mat, self.b2)


# ---------------------------------------------------------------------------
# Pure-JAX references for the correctness check
# ---------------------------------------------------------------------------
def _conv_relu_ref(x_nchw, w_oihw, b):
    y = jax.lax.conv_general_dilated(
        x_nchw, w_oihw, window_strides=(1, 1), padding="SAME",
        dimension_numbers=("NCHW", "OIHW", "NCHW"),
        precision=jax.lax.Precision.HIGHEST)
    return jnp.maximum(y + b[None, :, None, None], 0.0)


def _middle_block_ref_f32(x, blk):
    y = _conv_relu_ref(x, blk.w1_oihw, blk.b1)
    return _conv_relu_ref(y, blk.w2_oihw, blk.b2)


def _middle_block_ref_bf16(x, blk):
    # Mirrors the kernel numerics: bf16 MXU operands, f32 accumulation,
    # bf16 rounding of the input and of the intermediate activation.
    rt = lambda a: a.astype(jnp.bfloat16).astype(jnp.float32)
    y = _conv_relu_ref(rt(x), rt(blk.w1_oihw), blk.b1)
    return _conv_relu_ref(rt(y), rt(blk.w2_oihw), blk.b2)


if __name__ == "__main__":
    key = jax.random.PRNGKey(0)
    k_x, k_params = jax.random.split(key)

    N, Cin, H, W = 2, 4, 16, 16
    Cmid, Cout = 8, 4

    x = jax.random.normal(k_x, (N, Cin, H, W), jnp.float32)
    block = MiddleBlockPallas(Cin, Cmid, Cout, k_params)

    out = jax.block_until_ready(block(x))
    assert out.shape == (N, Cout, H, W)

    ref_bf16 = _middle_block_ref_bf16(x, block)   # same numerics as the kernel
    ref_f32 = _middle_block_ref_f32(x, block)     # full-f32 PyTorch semantics
    err_b = float(jnp.max(jnp.abs(out - ref_bf16)))
    err_f = float(jnp.max(jnp.abs(out - ref_f32)))
    assert jnp.allclose(out, ref_bf16, rtol=5e-3, atol=5e-3), f"bf16-ref max err {err_b}"
    assert jnp.allclose(out, ref_f32, rtol=5e-2, atol=5e-2), f"f32-ref max err {err_f}"

    print("KERNEL_OK")
</pallas_src>

<mosaic_0001>
module attributes {stable_mosaic.version = 11 : i64} {
  func.func @_middle_block_kernel(%arg0: i32, %arg1: memref<1x256x4xbf16, #tpu.memory_space<vmem>>, %arg2: memref<36x8xbf16, #tpu.memory_space<vmem>>, %arg3: memref<1x8xf32, #tpu.memory_space<vmem>>, %arg4: memref<72x4xbf16, #tpu.memory_space<vmem>>, %arg5: memref<1x4xf32, #tpu.memory_space<vmem>>, %arg6: memref<1x4x256xf32, #tpu.memory_space<vmem>>, %arg7: memref<320x4xbf16, #tpu.memory_space<vmem>>, %arg8: memref<320x8xbf16, #tpu.memory_space<vmem>>) attributes {dimension_semantics = [#tpu.dimension_semantics<parallel>], iteration_bounds = array<i64: 2>, scalar_prefetch = 0 : i64, scratch_operands = 2 : i64, tpu.core_type = #tpu.core_type<tc>, window_params = [{transform_indices = @transform_0, window_bounds = array<i64: 1, 256, 4>}, {pipeline_mode = #tpu.pipeline_mode<synchronous>, transform_indices = @transform_1, window_bounds = array<i64: 36, 8>}, {pipeline_mode = #tpu.pipeline_mode<synchronous>, transform_indices = @transform_2, window_bounds = array<i64: 1, 8>}, {pipeline_mode = #tpu.pipeline_mode<synchronous>, transform_indices = @transform_3, window_bounds = array<i64: 72, 4>}, {pipeline_mode = #tpu.pipeline_mode<synchronous>, transform_indices = @transform_4, window_bounds = array<i64: 1, 4>}, {transform_indices = @transform_5, window_bounds = array<i64: 1, 4, 256>}]} {
    %0 = tpu.iota {dimensions = array<i32: 0>} : vector<256x1xi32>
    %c16_i32 = arith.constant 16 : i32
    %c0_i32 = arith.constant 0 : i32
    %1 = arith.cmpi eq, %c16_i32, %c0_i32 : i32
    %c1_i32 = arith.constant 1 : i32
    %2 = arith.select %1, %c1_i32, %c16_i32 : i32
    %3 = vector.broadcast %2 : i32 to vector<256x1xi32>
    %4 = arith.remsi %0, %3 : vector<256x1xi32>
    %c0_i32_0 = arith.constant 0 : i32
    %5 = vector.broadcast %c0_i32_0 : i32 to vector<256x1xi32>
    %6 = arith.cmpi ne, %4, %5 : vector<256x1xi32>
    %c0_i32_1 = arith.constant 0 : i32
    %7 = vector.broadcast %c0_i32_1 : i32 to vector<256x1xi32>
    %8 = arith.cmpi slt, %4, %7 : vector<256x1xi32>
    %c0_i32_2 = arith.constant 0 : i32
    %9 = arith.cmpi slt, %2, %c0_i32_2 : i32
    %10 = vector.broadcast %9 : i1 to vector<256x1xi1>
    %11 = vector.broadcast %10 : vector<256x1xi1> to vector<256x1xi1>
    %12 = arith.xori %8, %11 : vector<256x1xi1>
    %13 = arith.andi %12, %6 : vector<256x1xi1>
    %14 = vector.broadcast %2 : i32 to vector<256x1xi32>
    %15 = arith.addi %4, %14 : vector<256x1xi32>
    %16 = arith.select %13, %15, %4 : vector<256x1xi1>, vector<256x1xi32>
    %c0_i32_3 = arith.constant 0 : i32
    %17 = vector.broadcast %c0_i32_3 : i32 to vector<256x1xi32>
    %18 = arith.cmpi ne, %16, %17 : vector<256x1xi32>
    %c15_i32 = arith.constant 15 : i32
    %19 = vector.broadcast %c15_i32 : i32 to vector<256x1xi32>
    %20 = arith.cmpi ne, %16, %19 : vector<256x1xi32>
    %cst = arith.constant 0.000000e+00 : bf16
    %21 = vector.broadcast %cst : bf16 to vector<32x4xbf16>
    %c0 = arith.constant 0 : index
    %c0_4 = arith.constant 0 : index
    %22 = vector.load %arg7[%c0, %c0_4] : memref<320x4xbf16, #tpu.memory_space<vmem>>, vector<32x4xbf16>
    tpu.vector_store %arg7[%c0, %c0_4], %21 {strides = array<i32>} : memref<320x4xbf16, #tpu.memory_space<vmem>>, vector<32x4xbf16>,
    %cst_5 = arith.constant 0.000000e+00 : bf16
    %23 = vector.broadcast %cst_5 : bf16 to vector<32x4xbf16>
    %c288 = arith.constant 288 : index
    %c0_6 = arith.constant 0 : index
    %24 = vector.load %arg7[%c288, %c0_6] : memref<320x4xbf16, #tpu.memory_space<vmem>>, vector<32x4xbf16>
    tpu.vector_store %arg7[%c288, %c0_6], %23 {strides = array<i32>} : memref<320x4xbf16, #tpu.memory_space<vmem>>, vector<32x4xbf16>,
    %c0_7 = arith.constant 0 : index
    %c0_8 = arith.constant 0 : index
    %c0_9 = arith.constant 0 : index
    %25 = vector.load %arg1[%c0_7, %c0_8, %c0_9] : memref<1x256x4xbf16, #tpu.memory_space<vmem>>, vector<1x256x4xbf16>
    %26 = vector.shape_cast %25 : vector<1x256x4xbf16> to vector<256x4xbf16>
    %c32 = arith.constant 32 : index
    %c0_10 = arith.constant 0 : index
    %27 = vector.load %arg7[%c32, %c0_10] : memref<320x4xbf16, #tpu.memory_space<vmem>>, vector<256x4xbf16>
    tpu.vector_store %arg7[%c32, %c0_10], %26 {strides = array<i32>} : memref<320x4xbf16, #tpu.memory_space<vmem>>, vector<256x4xbf16>,
    %c15 = arith.constant 15 : index
    %c0_11 = arith.constant 0 : index
    %28 = vector.load %arg7[%c15, %c0_11] : memref<320x4xbf16, #tpu.memory_space<vmem>>, vector<256x4xbf16>
    %c0_i32_12 = arith.constant 0 : i32
    %29 = arith.sitofp %c0_i32_12 : i32 to bf16
    %30 = vector.shape_cast %18 : vector<256x1xi1> to vector<256x1xi1>
    %31 = vector.broadcast %30 : vector<256x1xi1> to vector<256x4xi1>
    %32 = vector.broadcast %29 : bf16 to vector<256x4xbf16>
    %33 = arith.select %31, %28, %32 : vector<256x4xi1>, vector<256x4xbf16>
    %c16 = arith.constant 16 : index
    %c0_13 = arith.constant 0 : index
    %34 = vector.load %arg7[%c16, %c0_13] : memref<320x4xbf16, #tpu.memory_space<vmem>>, vector<256x4xbf16>
    %c17 = arith.constant 17 : index
    %c0_14 = arith.constant 0 : index
    %35 = vector.load %arg7[%c17, %c0_14] : memref<320x4xbf16, #tpu.memory_space<vmem>>, vector<256x4xbf16>
    %c0_i32_15 = arith.constant 0 : i32
    %36 = arith.sitofp %c0_i32_15 : i32 to bf16
    %37 = vector.shape_cast %20 : vector<256x1xi1> to vector<256x1xi1>
    %38 = vector.broadcast %37 : vector<256x1xi1> to vector<256x4xi1>
    %39 = vector.broadcast %36 : bf16 to vector<256x4xbf16>
    %40 = arith.select %38, %35, %39 : vector<256x4xi1>, vector<256x4xbf16>
    %c31 = arith.constant 31 : index
    %c0_16 = arith.constant 0 : index
    %41 = vector.load %arg7[%c31, %c0_16] : memref<320x4xbf16, #tpu.memory_space<vmem>>, vector<256x4xbf16>
    %c0_i32_17 = arith.constant 0 : i32
    %42 = arith.sitofp %c0_i32_17 : i32 to bf16
    %43 = vector.shape_cast %18 : vector<256x1xi1> to vector<256x1xi1>
    %44 = vector.broadcast %43 : vector<256x1xi1> to vector<256x4xi1>
    %45 = vector.broadcast %42 : bf16 to vector<256x4xbf16>
    %46 = arith.select %44, %41, %45 : vector<256x4xi1>, vector<256x4xbf16>
    %c32_18 = arith.constant 32 : index
    %c0_19 = arith.constant 0 : index
    %47 = vector.load %arg7[%c32_18, %c0_19] : memref<320x4xbf16, #tpu.memory_space<vmem>>, vector<256x4xbf16>
    %c33 = arith.constant 33 : index
    %c0_20 = arith.constant 0 : index
    %48 = vector.load %arg7[%c33, %c0_20] : memref<320x4xbf16, #tpu.memory_space<vmem>>, vector<256x4xbf16>
    %c0_i32_21 = arith.constant 0 : i32
    %49 = arith.sitofp %c0_i32_21 : i32 to bf16
    %50 = vector.shape_cast %20 : vector<256x1xi1> to vector<256x1xi1>
    %51 = vector.broadcast %50 : vector<256x1xi1> to vector<256x4xi1>
    %52 = vector.broadcast %49 : bf16 to vector<256x4xbf16>
    %53 = arith.select %51, %48, %52 : vector<256x4xi1>, vector<256x4xbf16>
    %c47 = arith.constant 47 : index
    %c0_22 = arith.constant 0 : index
    %54 = vector.load %arg7[%c47, %c0_22] : memref<320x4xbf16, #tpu.memory_space<vmem>>, vector<256x4xbf16>
    %c0_i32_23 = arith.constant 0 : i32
    %55 = arith.sitofp %c0_i32_23 : i32 to bf16
    %56 = vector.shape_cast %18 : vector<256x1xi1> to vector<256x1xi1>
    %57 = vector.broadcast %56 : vector<256x1xi1> to vector<256x4xi1>
    %58 = vector.broadcast %55 : bf16 to vector<256x4xbf16>
    %59 = arith.select %57, %54, %58 : vector<256x4xi1>, vector<256x4xbf16>
    %c48 = arith.constant 48 : index
    %c0_24 = arith.constant 0 : index
    %60 = vector.load %arg7[%c48, %c0_24] : memref<320x4xbf16, #tpu.memory_space<vmem>>, vector<256x4xbf16>
    %c49 = arith.constant 49 : index
    %c0_25 = arith.constant 0 : index
    %61 = vector.load %arg7[%c49, %c0_25] : memref<320x4xbf16, #tpu.memory_space<vmem>>, vector<256x4xbf16>
    %c0_i32_26 = arith.constant 0 : i32
    %62 = arith.sitofp %c0_i32_26 : i32 to bf16
    %63 = vector.shape_cast %20 : vector<256x1xi1> to vector<256x1xi1>
    %64 = vector.broadcast %63 : vector<256x1xi1> to vector<256x4xi1>
    %65 = vector.broadcast %62 : bf16 to vector<256x4xbf16>
    %66 = arith.select %64, %61, %65 : vector<256x4xi1>, vector<256x4xbf16>
    %67 = tpu.concatenate %33, %34, %40, %46, %47, %53, %59, %60, %66 in 1 : vector<256x4xbf16>, vector<256x4xbf16>, vector<256x4xbf16>, vector<256x4xbf16>, vector<256x4xbf16>, vector<256x4xbf16>, vector<256x4xbf16>, vector<256x4xbf16>, vector<256x4xbf16> -> vector<256x36xbf16>
    %c0_27 = arith.constant 0 : index
    %c0_28 = arith.constant 0 : index
    %68 = vector.load %arg2[%c0_27, %c0_28] : memref<36x8xbf16, #tpu.memory_space<vmem>>, vector<36x8xbf16>
    %cst_29 = arith.constant dense<0.000000e+00> : vector<256x8xf32>
    %69 = tpu.matmul %67, %68, %cst_29 {dimension_numbers = #tpu.dot_dimension_numbers<[1], [0], [0], [1], [0, 0, 1, 1], [], []>} : vector<256x36xbf16>, vector<36x8xbf16>, vector<256x8xf32> -> vector<256x8xf32>
    %c0_30 = arith.constant 0 : index
    %c0_31 = arith.constant 0 : index
    %70 = vector.load %arg3[%c0_30, %c0_31] : memref<1x8xf32, #tpu.memory_space<vmem>>, vector<1x8xf32>
    %71 = vector.broadcast %70 : vector<1x8xf32> to vector<256x8xf32>
    %72 = arith.addf %69, %71 : vector<256x8xf32>
    %cst_32 = arith.constant 0.000000e+00 : f32
    %73 = vector.broadcast %cst_32 : f32 to vector<256x8xf32>
    %74 = arith.maximumf %72, %73 : vector<256x8xf32>
    %cst_33 = arith.constant 0.000000e+00 : bf16
    %75 = vector.broadcast %cst_33 : bf16 to vector<32x8xbf16>
    %c0_34 = arith.constant 0 : index
    %c0_35 = arith.constant 0 : index
    %76 = vector.load %arg8[%c0_34, %c0_35] : memref<320x8xbf16, #tpu.memory_space<vmem>>, vector<32x8xbf16>
    tpu.vector_store %arg8[%c0_34, %c0_35], %75 {strides = array<i32>} : memref<320x8xbf16, #tpu.memory_space<vmem>>, vector<32x8xbf16>,
    %cst_36 = arith.constant 0.000000e+00 : bf16
    %77 = vector.broadcast %cst_36 : bf16 to vector<32x8xbf16>
    %c288_37 = arith.constant 288 : index
    %c0_38 = arith.constant 0 : index
    %78 = vector.load %arg8[%c288_37, %c0_38] : memref<320x8xbf16, #tpu.memory_space<vmem>>, vector<32x8xbf16>
    tpu.vector_store %arg8[%c288_37, %c0_38], %77 {strides = array<i32>} : memref<320x8xbf16, #tpu.memory_space<vmem>>, vector<32x8xbf16>,
    %79 = arith.truncf %74 : vector<256x8xf32> to vector<256x8xbf16>
    %c32_39 = arith.constant 32 : index
    %c0_40 = arith.constant 0 : index
    %80 = vector.load %arg8[%c32_39, %c0_40] : memref<320x8xbf16, #tpu.memory_space<vmem>>, vector<256x8xbf16>
    tpu.vector_store %arg8[%c32_39, %c0_40], %79 {strides = array<i32>} : memref<320x8xbf16, #tpu.memory_space<vmem>>, vector<256x8xbf16>,
    %c15_41 = arith.constant 15 : index
    %c0_42 = arith.constant 0 : index
    %81 = vector.load %arg8[%c15_41, %c0_42] : memref<320x8xbf16, #tpu.memory_space<vmem>>, vector<256x8xbf16>
    %c0_i32_43 = arith.constant 0 : i32
    %82 = arith.sitofp %c0_i32_43 : i32 to bf16
    %83 = vector.shape_cast %18 : vector<256x1xi1> to vector<256x1xi1>
    %84 = vector.broadcast %83 : vector<256x1xi1> to vector<256x8xi1>
    %85 = vector.broadcast %82 : bf16 to vector<256x8xbf16>
    %86 = arith.select %84, %81, %85 : vector<256x8xi1>, vector<256x8xbf16>
    %c16_44 = arith.constant 16 : index
    %c0_45 = arith.constant 0 : index
    %87 = vector.load %arg8[%c16_44, %c0_45] : memref<320x8xbf16, #tpu.memory_space<vmem>>, vector<256x8xbf16>
    %c17_46 = arith.constant 17 : index
    %c0_47 = arith.constant 0 : index
    %88 = vector.load %arg8[%c17_46, %c0_47] : memref<320x8xbf16, #tpu.memory_space<vmem>>, vector<256x8xbf16>
    %c0_i32_48 = arith.constant 0 : i32
    %89 = arith.sitofp %c0_i32_48 : i32 to bf16
    %90 = vector.shape_cast %20 : vector<256x1xi1> to vector<256x1xi1>
    %91 = vector.broadcast %90 : vector<256x1xi1> to vector<256x8xi1>
    %92 = vector.broadcast %89 : bf16 to vector<256x8xbf16>
    %93 = arith.select %91, %88, %92 : vector<256x8xi1>, vector<256x8xbf16>
    %c31_49 = arith.constant 31 : index
    %c0_50 = arith.constant 0 : index
    %94 = vector.load %arg8[%c31_49, %c0_50] : memref<320x8xbf16, #tpu.memory_space<vmem>>, vector<256x8xbf16>
    %c0_i32_51 = arith.constant 0 : i32
    %95 = arith.sitofp %c0_i32_51 : i32 to bf16
    %96 = vector.shape_cast %18 : vector<256x1xi1> to vector<256x1xi1>
    %97 = vector.broadcast %96 : vector<256x1xi1> to vector<256x8xi1>
    %98 = vector.broadcast %95 : bf16 to vector<256x8xbf16>
    %99 = arith.select %97, %94, %98 : vector<256x8xi1>, vector<256x8xbf16>
    %c32_52 = arith.constant 32 : index
    %c0_53 = arith.constant 0 : index
    %100 = vector.load %arg8[%c32_52, %c0_53] : memref<320x8xbf16, #tpu.memory_space<vmem>>, vector<256x8xbf16>
    %c33_54 = arith.constant 33 : index
    %c0_55 = arith.constant 0 : index
    %101 = vector.load %arg8[%c33_54, %c0_55] : memref<320x8xbf16, #tpu.memory_space<vmem>>, vector<256x8xbf16>
    %c0_i32_56 = arith.constant 0 : i32
    %102 = arith.sitofp %c0_i32_56 : i32 to bf16
    %103 = vector.shape_cast %20 : vector<256x1xi1> to vector<256x1xi1>
    %104 = vector.broadcast %103 : vector<256x1xi1> to vector<256x8xi1>
    %105 = vector.broadcast %102 : bf16 to vector<256x8xbf16>
    %106 = arith.select %104, %101, %105 : vector<256x8xi1>, vector<256x8xbf16>
    %c47_57 = arith.constant 47 : index
    %c0_58 = arith.constant 0 : index
    %107 = vector.load %arg8[%c47_57, %c0_58] : memref<320x8xbf16, #tpu.memory_space<vmem>>, vector<256x8xbf16>
    %c0_i32_59 = arith.constant 0 : i32
    %108 = arith.sitofp %c0_i32_59 : i32 to bf16
    %109 = vector.shape_cast %18 : vector<256x1xi1> to vector<256x1xi1>
    %110 = vector.broadcast %109 : vector<256x1xi1> to vector<256x8xi1>
    %111 = vector.broadcast %108 : bf16 to vector<256x8xbf16>
    %112 = arith.select %110, %107, %111 : vector<256x8xi1>, vector<256x8xbf16>
    %c48_60 = arith.constant 48 : index
    %c0_61 = arith.constant 0 : index
    %113 = vector.load %arg8[%c48_60, %c0_61] : memref<320x8xbf16, #tpu.memory_space<vmem>>, vector<256x8xbf16>
    %c49_62 = arith.constant 49 : index
    %c0_63 = arith.constant 0 : index
    %114 = vector.load %arg8[%c49_62, %c0_63] : memref<320x8xbf16, #tpu.memory_space<vmem>>, vector<256x8xbf16>
    %c0_i32_64 = arith.constant 0 : i32
    %115 = arith.sitofp %c0_i32_64 : i32 to bf16
    %116 = vector.shape_cast %20 : vector<256x1xi1> to vector<256x1xi1>
    %117 = vector.broadcast %116 : vector<256x1xi1> to vector<256x8xi1>
    %118 = vector.broadcast %115 : bf16 to vector<256x8xbf16>
    %119 = arith.select %117, %114, %118 : vector<256x8xi1>, vector<256x8xbf16>
    %120 = tpu.concatenate %86, %87, %93, %99, %100, %106, %112, %113, %119 in 1 : vector<256x8xbf16>, vector<256x8xbf16>, vector<256x8xbf16>, vector<256x8xbf16>, vector<256x8xbf16>, vector<256x8xbf16>, vector<256x8xbf16>, vector<256x8xbf16>, vector<256x8xbf16> -> vector<256x72xbf16>
    %c0_65 = arith.constant 0 : index
    %c0_66 = arith.constant 0 : index
    %121 = vector.load %arg4[%c0_65, %c0_66] : memref<72x4xbf16, #tpu.memory_space<vmem>>, vector<72x4xbf16>
    %cst_67 = arith.constant dense<0.000000e+00> : vector<256x4xf32>
    %122 = tpu.matmul %120, %121, %cst_67 {dimension_numbers = #tpu.dot_dimension_numbers<[1], [0], [0], [1], [0, 0, 1, 1], [], []>} : vector<256x72xbf16>, vector<72x4xbf16>, vector<256x4xf32> -> vector<256x4xf32>
    %c0_68 = arith.constant 0 : index
    %c0_69 = arith.constant 0 : index
    %123 = vector.load %arg5[%c0_68, %c0_69] : memref<1x4xf32, #tpu.memory_space<vmem>>, vector<1x4xf32>
    %124 = vector.broadcast %123 : vector<1x4xf32> to vector<256x4xf32>
    %125 = arith.addf %122, %124 : vector<256x4xf32>
    %cst_70 = arith.constant 0.000000e+00 : f32
    %126 = vector.broadcast %cst_70 : f32 to vector<256x4xf32>
    %127 = arith.maximumf %125, %126 : vector<256x4xf32>
    %128 = tpu.transpose %127, [1, 0] : vector<256x4xf32> -> vector<4x256xf32>
    %c0_71 = arith.constant 0 : index
    %c0_72 = arith.constant 0 : index
    %c0_73 = arith.constant 0 : index
    %129 = vector.load %arg6[%c0_71, %c0_72, %c0_73] : memref<1x4x256xf32, #tpu.memory_space<vmem>>, vector<1x4x256xf32>
    %130 = vector.shape_cast %129 : vector<1x4x256xf32> to vector<4x256xf32>
    %131 = vector.shape_cast %128 : vector<4x256xf32> to vector<1x4x256xf32>
    tpu.vector_store %arg6[%c0_71, %c0_72, %c0_73], %131 {strides = array<i32>} : memref<1x4x256xf32, #tpu.memory_space<vmem>>, vector<1x4x256xf32>,
    return
  }
  func.func @transform_0(%arg0: i32) -> (i32, i32, i32) {
    %c0_i32 = arith.constant 0 : i32
    %c0_i32_0 = arith.constant 0 : i32
    %c0_i32_1 = arith.constant 0 : i32
    return %arg0, %c0_i32, %c0_i32_0 : i32, i32, i32
  }
  func.func @transform_1(%arg0: i32) -> (i32, i32) {
    %c0_i32 = arith.constant 0 : i32
    %c0_i32_0 = arith.constant 0 : i32
    %c0_i32_1 = arith.constant 0 : i32
    return %c0_i32, %c0_i32_0 : i32, i32
  }
  func.func @transform_2(%arg0: i32) -> (i32, i32) {
    %c0_i32 = arith.constant 0 : i32
    %c0_i32_0 = arith.constant 0 : i32
    %c0_i32_1 = arith.constant 0 : i32
    return %c0_i32, %c0_i32_0 : i32, i32
  }
  func.func @transform_3(%arg0: i32) -> (i32, i32) {
    %c0_i32 = arith.constant 0 : i32
    %c0_i32_0 = arith.constant 0 : i32
    %c0_i32_1 = arith.constant 0 : i32
    return %c0_i32, %c0_i32_0 : i32, i32
  }
  func.func @transform_4(%arg0: i32) -> (i32, i32) {
    %c0_i32 = arith.constant 0 : i32
    %c0_i32_0 = arith.constant 0 : i32
    %c0_i32_1 = arith.constant 0 : i32
    return %c0_i32, %c0_i32_0 : i32, i32
  }
  func.func @transform_5(%arg0: i32) -> (i32, i32, i32) {
    %c0_i32 = arith.constant 0 : i32
    %c0_i32_0 = arith.constant 0 : i32
    %c0_i32_1 = arith.constant 0 : i32
    return %arg0, %c0_i32, %c0_i32_0 : i32, i32, i32
  }
}

</mosaic_0001>

<bundles_post_ra>
// kernel: middle_block_pallas.1
= control target key start
LH: loop header
LB: loop body
LE: loop exit
PB: predicated region body
PF: predicated region fallthrough
CT: control target
= control target key end

     0   :  { %s4834_s18 = smov 0   ;;  %s7734_s0 = inlined_call_operand.vmem [shape: bf16[2,256,4], index: 0, kind: input, shape index: {}]   ;;  %s7735_s1 = inlined_call_operand.vmem [shape: bf16[36,8], index: 1, kind: input, shape index: {}]   ;;  %s7736_s2 = inlined_call_operand.vmem [shape: f32[1,8], index: 2, kind: input, shape index: {}]   ;;  %s7737_s3 = inlined_call_operand.vmem [shape: bf16[72,4], index: 3, kind: input, shape index: {}]   ;;  %s7738_s4 = inlined_call_operand.vmem [shape: f32[1,4], index: 4, kind: input, shape index: {}]   ;;  %s7739_s5 = inlined_call_operand.vmem [shape: f32[2,4,256], index: 5, kind: output, shape index: {}]  }
   0x1 LB: > { %s4492_s19 = sadd.s32 4294967295, %s4788_s18   ;;  %p4496_p0 = scmp.ge.s32.totalorder %s4788_s18, 1  ;;  %s4788_s18 = sphi %s4834_s18, %s15_s18  }
   0x2   : > { %p187_p1 = scmp.lt.s32.totalorder %s4788_s18, 3 }
   0x4   : > { %p188_p2 = pnand %p4496_p0, %p187_p1 }
   0x6   : > { %191 = sbr.rel (%p188_p2) target bundleno = 1135 (0x46f), region = 40 }
   0xd   : > { %vm709_vm0 = vcmask 31744   ;;  %v228_v0 = vlaneseq  ;;  %v7755_v1 = vmov 0   ;;  %p215_p3 = scmp.lt.s32.totalorder %s4492_s19, 1  ;;  %vm4791_vm1 = vmmov 1   ;;  %s4792_s24 = smov 4  }
   0xe   : > { %711 = vst.msk [vmem:[#allocation2 + $0x8] sm:$0xff] %vm709_vm0, %v7755_v1  ;;  %710 = vst.msk [vmem:[#allocation2] sm:$0xff] %vm709_vm0, %v7755_v1  ;;  %vm1051_vm6 = vsmask.f32 7424  ;;  %vm1390_vm15 = vsmask.f32 256 }
   0xf   : > { %712 = vst.msk [vmem:[#allocation2 + $0x90] sm:$0xff] %vm709_vm0, %v7755_v1  ;;  %713 = vst.msk [vmem:[#allocation2 + $0x98] sm:$0xff] %vm709_vm0, %v7755_v1  ;;  %v4850_v2 = vshrl.u32 %v228_v0, 7  ;;  %s8088_s19 = smov (!%p215_p3, %s4492_s19), 1  ;;  %s4793_s25 = smov 12  }
  0x10   : > { %vm940_vm2 = vmpackc.low %vm4791_vm1, %vm4791_vm1  ;;  %s4593_s20 = sshll.u32 %s8088_s19, 7  ;;  %s4794_s26 = smov 16  }
  0x11   : > { %v265_v3 = vand.u32 15, %v4850_v2  ;;  %v231_v4 = vadd.s32 16, %v4850_v2  ;;  %v233_v5 = vadd.s32 32, %v4850_v2  ;;  %v230_v6 = vadd.s32 8, %v4850_v2  ;;  %s4867_s23 = scalar_lea.vmem %s7734_s0, %s4593_s20  ;;  %s4795_s27 = smov 8  }
  0x12   : > { %v4859_v7 = vsel %vm940_vm2, 65537, %v7755_v1  ;;  %v232_v8 = vadd.s32 24, %v4850_v2  ;;  %v234_v9 = vadd.s32 40, %v4850_v2  ;;  %v4739_v17 = vld [vmem:[%s4867_s23] sm:$0xff]   ;;  %v4740_v21 = vld [vmem:[%s4867_s23 + $0x8] sm:$0xff]   ;;  %v4741_v30 = vld [vmem:[%s4867_s23 + $0x10] sm:$0xff]  }
  0x13   : > { %vm645_vm3 = vcmp.ne.s32.totalorder %v265_v3, 0  ;;  %v279_v10 = vand.u32 15, %v231_v4  ;;  %v293_v11 = vand.u32 15, %v233_v5  ;;  %v272_v12 = vand.u32 15, %v230_v6  ;;  %842 = vst.msk [vmem:[#allocation2 + $0x10] sm:$0xff] %vm709_vm0, %v4739_v17  ;;  %843 = vst.msk [vmem:[#allocation2 + $0x18] sm:$0xff] %vm709_vm0, %v4740_v21 }
  0x14   : > { %vm939_vm4 = vmpackc.low %vm645_vm3, %vm645_vm3  ;;  %v286_v13 = vand.u32 15, %v232_v8  ;;  %v300_v14 = vand.u32 15, %v234_v9  ;;  %844 = vst.msk [vmem:[#allocation2 + $0x20] sm:$0xff] %vm709_vm0, %v4741_v30  ;;  %v4742_v37 = vld [vmem:[%s4867_s23 + $0x18] sm:$0xff]   ;;  %v4743_v42 = vld [vmem:[%s4867_s23 + $0x20] sm:$0xff]   ;;  %s4796_s28 = smov 20  }
  0x15   : > { %v4869_v15 = vld [vmem:[#allocation2 + $0x8] sm:$0xff]  ;;  %v971_v16 = vsel %vm939_vm4, 65537, %v7755_v1  ;;  %vm647_vm5 = vcmp.ne.s32.totalorder %v279_v10, 0  ;;  %vm4875_vm8 = vcmp.ne.s32.totalorder %v293_v11, 0  ;;  %vm678_vm10 = vcmp.ne.s32.totalorder %v272_v12, 15  ;;  %845 = vst.msk [vmem:[#allocation2 + $0x28] sm:$0xff] %vm709_vm0, %v4742_v37 }
  0x16   : > { %v1627_v18 = vshll.u32 %v4869_v15, 16  ;;  %v4517_v19 = vcombine.low %v971_v16, %v4859_v7  ;;  %vm941_vm7 = vmpackc.low %vm647_vm5, %vm647_vm5  ;;  %vm4885_vm11 = vcmp.ne.s32.totalorder %v286_v13, 15  ;;  %vm4889_vm12 = vcmp.ne.s32.totalorder %v300_v14, 15  ;;  %v1552_v28 = vld [vmem:[#allocation2 + $0x8] sm:$0x80]  ;;  %846 = vst.msk [vmem:[#allocation2 + $0x30] sm:$0xff] %vm709_vm0, %v4743_v42 }
  0x17   : > { %v973_v22 = vsel %vm941_vm7, 65537, %v7755_v1  ;;  %vm943_vm9 = vmpackc.low %vm4875_vm8, %vm4875_vm8  ;;  %v1630_v33 = vshrl.u32 %v4869_v15, 16  ;;  %v4744_v46 = vld [vmem:[%s4867_s23 + $0x28] sm:$0xff]   ;;  %v4745_v51 = vld [vmem:[%s4867_s23 + $0x30] sm:$0xff]   ;;  %vm1804_vm8 = vcmask 1046528   ;;  %s4797_s29 = smov 28  }
  0x18   : > { %v1629_v25 = vrot.slane %v1627_v18, 1  ;;  %v1053_v26 = vshll.u32 %v4517_v19, 16  ;;  %v1056_v27 = vshrl.u32 %v4517_v19, 16  ;;  %v4518_v29 = vcombine.low %v973_v22, %v4859_v7  ;;  %vm1279_vm13 = vmpackc.low %vm678_vm10, %vm678_vm10  ;;  %847 = vst.msk [vmem:[#allocation2 + $0x38] sm:$0xff] %vm709_vm0, %v4744_v46  ;;  %v4746_v60 = vld [vmem:[%s4867_s23 + $0x38] sm:$0xff]   ;;  %v4747_v4 = vld [vmem:[%s4867_s23 + $0x40] sm:$0xff]  }
  0x19   : > { %v975_v31 = vsel %vm943_vm9, 65537, %v7755_v1  ;;  %v1311_v32 = vsel %vm1279_vm13, 65537, %v7755_v1  ;;  %vm1281_vm14 = vmpackc.low %vm4885_vm11, %vm4885_vm11  ;;  %848 = vst.msk [vmem:[#allocation2 + $0x40] sm:$0xff] %vm709_vm0, %v4745_v51  ;;  %v4748_v19 = vld [vmem:[%s4867_s23 + $0x48] sm:$0xff]   ;;  %s4798_s30 = smov 24   ;;  %s4799_s8 = smov 32  }
  0x1a   : > { %1753 = vrot.lane.b32.xlu1 %v1629_v25, %s4792_s24  ;;  %v4903_v34 = vrot.slane %v1053_v26, 1  ;;  %v1060_v35 = vshll.u32 %v4518_v29, 16  ;;  %v4906_v36 = vcombine.low %v975_v31, %v4859_v7  ;;  %vm1283_vm1 = vmpackc.low %vm4889_vm12, %vm4889_vm12  ;;  %v1064_v38 = vshrl.u32 %v4518_v29, 16  ;;  %v860_v52 = vld [vmem:[#allocation2 + $0x10] sm:$0xff]  ;;  %v4940_v63 = vld [vmem:[#allocation2 + $0x18] sm:$0xff]  ;;  %849 = vst.msk [vmem:[#allocation2 + $0x48] sm:$0xff] %vm709_vm0, %v4746_v60 }
  0x1b   : > { %v4533_v39 = vcombine.low %v4859_v7, %v1311_v32  ;;  %v1313_v40 = vsel %vm1281_vm14, 65537, %v7755_v1  ;;  %v1315_v41 = vsel %vm1283_vm1, 65537, %v7755_v1  ;;  %v1634_v57 = vshll.u32 %v860_v52, 16  ;;  %850 = vst.msk [vmem:[#allocation2 + $0x50] sm:$0xff] %vm709_vm0, %v4747_v4  ;;  %851 = vst.msk [vmem:[#allocation2 + $0x58] sm:$0xff] %vm709_vm0, %v4748_v19  ;;  %s4800_s15 = smov 48  }
  0x1c   : > { %vm7784_vm2 = vcmp.ne.s16.totalorder %v4903_v34, 0  ;;  %v1058_v43 = vor.u32 %v1056_v27, %v4903_v34  ;;  %v1062_v44 = vrot.slane %v1060_v35, 1  ;;  %v1068_v45 = vshll.u32 %v4906_v36, 16  ;;  %v4987_v27 = vld [vmem:[#allocation2 + $0x20] sm:$0xff]  ;;  %s4801_s16 = smov 64   ;;  %s4802_s17 = smov 40  }
  0x1d   : > { %v1554_v47 = vsel %vm7784_vm2, %v1552_v28, 0  ;;  %v1392_v48 = vshrl.u32 %v4533_v39, 16  ;;  %v1395_v49 = vshll.u32 %v4533_v39, 16  ;;  %v4534_v50 = vcombine.low %v4859_v7, %v1313_v40  ;;  %s4803_s20 = smov 56  }
  0x1e   : > { %1889 = vrot.lane.b32.xlu1 %v1554_v47, %s4793_s25  ;;  %v4929_v53 = vsel %vm1051_vm6, %v1058_v43, %v1062_v44  ;;  %v1066_v54 = vor.u32 %v1064_v38, %v1062_v44  ;;  %v4931_v55 = vrot.slane %v1068_v45, 1  ;;  %v4535_v56 = vcombine.low %v4859_v7, %v1315_v41 }
  0x1f   : > { %7832 = vst [vmem:[#allocation4_spill] sm:$0xff] %v4929_v53  ;;  %vm7782_vm3 = vcmp.ne.s16.totalorder %v4929_v53, 0  ;;  %v1394_v58 = vrot.slane %v1392_v48, 7  ;;  %v1399_v59 = vshrl.u32 %v4534_v50, 16  ;;  %v1632_v61 = vor.u32 %v1630_v33, %v1629_v25  ;;  %v4749_v33 = vld [vmem:[%s4867_s23 + $0x50] sm:$0xff]  }
  0x20   : > { %v1555_v62 = vsel %vm7782_vm3, %v860_v52, 0  ;;  %v4944_v0 = vsel %vm1051_vm6, %v1066_v54, %v4931_v55  ;;  %v1402_v3 = vshll.u32 %v4534_v50, 16  ;;  %v1636_v5 = vrot.slane %v1634_v57, 1  ;;  %852 = vst.msk [vmem:[#allocation2 + $0x60] sm:$0xff] %vm709_vm0, %v4749_v33 }
  0x21   : > { %7833 = vst [vmem:[#allocation5_spill] sm:$0xff] %v4944_v0  ;;  %vm7781_vm4 = vcmp.ne.s16.totalorder %v4944_v0, 0  ;;  %v4948_v6 = vor.u32 %v1395_v49, %v1394_v58  ;;  %v1401_v8 = vrot.slane %v1399_v59, 7  ;;  %v1638_v9 = vshrl.u32 %v860_v52, 16 }
  0x22   : > { %1891 = vrot.lane.b32.xlu1 %v1555_v62, %s4793_s25  ;;  %v1407_v10 = vshrl.u32 %v4535_v56, 16  ;;  %v1410_v11 = vshll.u32 %v4535_v56, 16  ;;  %1931 = vrot.lane.b32.xlu0 %v1636_v5, %s4794_s26  ;;  %v1556_v12 = vsel %vm7781_vm4, %v4940_v63, 0  ;;  %v1642_v14 = vshll.u32 %v4940_v63, 16 }
  0x23   : > { %7834 = vst [vmem:[#allocation6_spill] sm:$0xff] %v4948_v6  ;;  %vm7743_vm5 = vcmp.ne.s16.totalorder %v4948_v6, 0  ;;  %v1404_v13 = vor.u32 %v1402_v3, %v1401_v8  ;;  %v1637_v16 = vsel %vm1051_vm6, %v1632_v61, %v1636_v5  ;;  %v1640_v24 = vor.u32 %v1638_v9, %v1636_v5 }
  0x24   : > { %v1535_v17 = vsel %vm7743_vm5, %v4869_v15, 0  ;;  %v4963_v18 = vrot.slane %v1407_v10, 7  ;;  %v4971_v21 = vsel %vm7743_vm5, %v860_v52, 0  ;;  %v4982_v25 = vrot.slane %v1642_v14, 1 }
  0x25   : > { %v4967_v20 = vsel %vm1390_vm15, %v1394_v58, %v1404_v13  ;;  %v1805_v22 = vrot.slane %v1535_v17, 1  ;;  %v1982_v29 = vrot.slane %v4971_v21, 1  ;;  %v236_v32 = vadd.s32 56, %v4850_v2 }
  0x26   : > { %7835 = vst [vmem:[#allocation7_spill] sm:$0xff] %v4967_v20  ;;  %1893 = vrot.lane.b32.xlu1 %v1556_v12, %s4793_s25  ;;  %vm7741_vm7 = vcmp.ne.s16.totalorder %v4967_v20, 0  ;;  %v1412_v23 = vor.u32 %v1410_v11, %v4963_v18  ;;  %1755 = vrot.lane.b32.xlu0 %v1637_v16, %s4792_s24  ;;  %v238_v38 = vadd.s32 72, %v4850_v2  ;;  %v1646_v39 = vshrl.u32 %v4940_v63, 16  ;;  %v4750_v11 = vld [vmem:[%s4867_s23 + $0x58] sm:$0xff]  }
  0x27   : > { %v4980_v15 = vsel %vm7741_vm7, %v860_v52, 0  ;;  %v1573_v26 = vsel %vm7741_vm7, %v4940_v63, 0  ;;  %v1645_v40 = vsel %vm1051_vm6, %v1640_v24, %v4982_v25  ;;  %v1650_v43 = vshll.u32 %v4987_v27, 16  ;;  %v5026_v52 = vld [vmem:[#allocation2 + $0x28] sm:$0xff]  ;;  %853 = vst.msk [vmem:[#allocation2 + $0x68] sm:$0xff] %vm709_vm0, %v4750_v11 }
  0x28   : > { %v1806_v28 = vrot.slane %v4980_v15, 1  ;;  %v1983_v30 = vrot.slane %v1573_v26, 1  ;;  %v4992_v31 = vsel %vm1390_vm15, %v1401_v8, %v1412_v23  ;;  %v314_v44 = vand.u32 15, %v236_v32 }
  0x29   : > { %7836 = vst [vmem:[#allocation8_spill] sm:$0xff] %v4992_v31  ;;  %vm7740_vm9 = vcmp.ne.s16.totalorder %v4992_v31, 0  ;;  %v328_v45 = vand.u32 15, %v238_v38  ;;  %v1648_v46 = vor.u32 %v1646_v39, %v4982_v25  ;;  %v235_v47 = vadd.s32 48, %v4850_v2 }
  0x2a   : > { %v1807_v35 = vsel %vm1804_vm8, %v1805_v22, %v1806_v28  ;;  %v5001_v37 = vsel %vm7740_vm9, %v4987_v27, 0  ;;  %1838 = vrot.lane.b32.xlu0 %v1805_v22, %s4795_s27  ;;  %v1984_v41 = vsel %vm1804_vm8, %v1982_v29, %v1983_v30  ;;  %v237_v48 = vadd.s32 64, %v4850_v2 }
  0x2b   : > { %1840 = vrot.lane.b32.xlu1 %v1807_v35, %s4795_s27  ;;  %v1985_v42 = vrot.slane %v5001_v37, 1  ;;  %v1652_v50 = vrot.slane %v1650_v43, 1  ;;  %vm684_vm10 = vcmp.ne.s32.totalorder %v314_v44, 15  ;;  %vm686_vm11 = vcmp.ne.s32.totalorder %v328_v45, 15  ;;  %v1589_v43 = vld [vmem:[#allocation2 + $0x10] sm:$0x80] }
  0x2c   : > { %v5024_v51 = vsel %vm7740_vm9, %v4940_v63, 0  ;;  %vm1285_vm12 = vmpackc.low %vm684_vm10, %vm684_vm10  ;;  %v307_v54 = vand.u32 15, %v235_v47  ;;  %v321_v56 = vand.u32 15, %v237_v48  ;;  %v1654_v58 = vshrl.u32 %v4987_v27, 16 }
  0x2d   : > { %v1986_v49 = vsel %vm1804_vm8, %v1983_v30, %v1985_v42  ;;  %v1317_v57 = vsel %vm1285_vm12, 65537, %v7755_v1  ;;  %vm1287_vm13 = vmpackc.low %vm686_vm11, %vm686_vm11  ;;  %v1653_v62 = vsel %vm1051_vm6, %v1648_v46, %v1652_v50  ;;  %v1808_v3 = vrot.slane %v5024_v51, 1 }
  0x2e   : > { %1757 = vrot.lane.b32.xlu0 %v1645_v40, %s4792_s24  ;;  %v4536_v59 = vcombine.low %v4859_v7, %v1317_v57  ;;  %v1319_v60 = vsel %vm1287_vm13, 65537, %v7755_v1  ;;  %vm5034_vm14 = vcmp.ne.s32.totalorder %v307_v54, 0  ;;  %v1658_v4 = vshll.u32 %v5026_v52, 16 }
  0x2f   : > { %2017 = vrot.lane.b32.xlu1 %v1984_v41, %s4796_s28  ;;  %v4537_v5 = vcombine.low %v4859_v7, %v1319_v60  ;;  %vm945_vm1 = vmpackc.low %vm5034_vm14, %vm5034_vm14  ;;  %vm5045_vm10 = vcmp.ne.s32.totalorder %v321_v56, 0  ;;  %v1809_v17 = vsel %vm1804_vm8, %v1806_v28, %v1808_v3  ;;  %v1656_v19 = vor.u32 %v1654_v58, %v1652_v50 }
  0x30   : > { %v1415_v8 = vshrl.u32 %v4536_v59, 16  ;;  %v1418_v9 = vshll.u32 %v4536_v59, 16  ;;  %v977_v16 = vsel %vm945_vm1, 65537, %v7755_v1  ;;  %v5057_v21 = vrot.slane %v1658_v4, 1  ;;  %vm947_vm11 = vmpackc.low %vm5045_vm10, %vm5045_vm10 }
  0x31   : > { %v1423_v12 = vshrl.u32 %v4537_v5, 16  ;;  %v1426_v14 = vshll.u32 %v4537_v5, 16  ;;  %v4520_v15 = vcombine.low %v977_v16, %v4859_v7  ;;  %v979_v28 = vsel %vm947_vm11, 65537, %v7755_v1  ;;  %v4754_v16 = vld [vmem:[%s4867_s23 + $0x60] sm:$0xff]  }
  0x32   : > { %1933 = vrot.lane.b32.xlu0 %v1645_v40, %s4794_s26  ;;  %v1417_v13 = vrot.slane %v1415_v8, 7  ;;  %v5078_v30 = vsel %vm1051_vm6, %v1656_v19, %v5057_v21  ;;  %v240_v32 = vadd.s32 88, %v4850_v2  ;;  %v1610_v33 = vsel %vm7741_vm7, %v4987_v27, 0  ;;  %854 = vst.msk [vmem:[#allocation2 + $0x70] sm:$0xff] %vm709_vm0, %v4754_v16 }
  0x33   : > { %2019 = vrot.lane.b32.xlu1 %v1986_v49, %s4796_s28  ;;  %v5059_v22 = vrot.slane %v1423_v12, 7  ;;  %v242_v35 = vadd.s32 104, %v4850_v2  ;;  %v5092_v38 = vcombine.low %v979_v28, %v4859_v7  ;;  %v1076_v39 = vshll.u32 %v4520_v15, 16 }
  0x34   : > { %v1420_v23 = vor.u32 %v1418_v9, %v1417_v13  ;;  %v1593_v41 = vsel %vm7781_vm4, %v4987_v27, 0  ;;  %v2160_v44 = vrot.slane %v1610_v33, 1  ;;  %v342_v46 = vand.u32 15, %v240_v32  ;;  %v4752_v9 = vld [vmem:[%s7735_s1 + $0x8] sm:$0xff]  }
  0x35   : > { %v1428_v26 = vor.u32 %v1426_v14, %v5059_v22  ;;  %v5107_v47 = vsel %vm7743_vm5, %v4940_v63, 0  ;;  %v356_v49 = vand.u32 15, %v242_v35  ;;  %v1078_v50 = vrot.slane %v1076_v39, 1 }
  0x36   : > { %1935 = vrot.lane.b32.xlu0 %v1653_v62, %s4794_s26  ;;  %v5069_v24 = vsel %vm1390_vm15, %v4963_v18, %v1420_v23  ;;  %v5087_v18 = vsel %vm7740_vm9, %v5026_v52, 0  ;;  %v1080_v54 = vshrl.u32 %v4520_v15, 16  ;;  %v1084_v56 = vshll.u32 %v5092_v38, 16 }
  0x37   : > { %2015 = vrot.lane.b32.xlu1 %v1982_v29, %s4796_s28  ;;  %7841 = vst [vmem:[#allocation9_spill] sm:$0xff] %v5069_v24  ;;  %v1592_v29 = vsel %vm7782_vm3, %v4940_v63, 0  ;;  %vm7742_vm12 = vcmp.ne.s16.totalorder %v5069_v24, 0  ;;  %v5098_v40 = vsel %vm1390_vm15, %v1417_v13, %v1428_v26  ;;  %v2162_v45 = vrot.slane %v5087_v18, 1  ;;  %v4751_v63 = vld [vmem:[%s7735_s1] sm:$0xff]   ;;  %v5158_v13 = vld [vmem:[#allocation2 + $0x30] sm:$0xff] }
  0x38   : > { %7842 = vst [vmem:[#allocation10_spill] sm:$0xff] %v5098_v40  ;;  %v1538_v48 = vsel %vm7742_vm12, %v4987_v27, 0  ;;  %vm7745_vm13 = vcmp.ne.s16.totalorder %v5098_v40, 0  ;;  %v1591_v57 = vsel %vm7784_vm2, %v1589_v43, 0  ;;  %v2159_v59 = vrot.slane %v5107_v47, 1  ;;  %4635 = vmatprep.subr.bf16.mxu0 %v4751_v63 }
  0x39   : > { %v2163_v58 = vsel %vm1804_vm8, %v2160_v44, %v2162_v45  ;;  %v1810_v60 = vrot.slane %v1538_v48, 1  ;;  %vm5125_vm14 = vcmp.ne.s32.totalorder %v342_v46, 15  ;;  %vm5134_vm1 = vcmp.ne.s32.totalorder %v356_v49, 15  ;;  %4636 = vmatpush3.bf16.msra.mxu0 %v4751_v63  ;;  %v4755_v63 = vld [vmem:[%s4867_s23 + $0x68] sm:$0xff]  }
  0x3a   : > { %1842 = vrot.lane.b32.xlu0 %v1809_v17, %s4795_s27  ;;  %v1082_v5 = vor.u32 %v1080_v54, %v1078_v50  ;;  %v5138_v8 = vrot.slane %v1084_v56, 1  ;;  %vm1289_vm10 = vmpackc.low %vm5125_vm14, %vm5125_vm14  ;;  %v2161_v10 = vsel %vm1804_vm8, %v2159_v59, %v2160_v44  ;;  %v239_v14 = vadd.s32 80, %v4850_v2  ;;  %4637 = vmatprep.subr.bf16.mxu0 %v4752_v9  ;;  %855 = vst.msk [vmem:[#allocation2 + $0x78] sm:$0xff] %vm709_vm0, %v4755_v63 }
  0x3b   : > { %2110 = vrot.lane.b32.xlu1 %v1653_v62, %s4797_s29  ;;  %v1811_v11 = vsel %vm1804_vm8, %v1808_v3, %v1810_v60  ;;  %vm1291_vm11 = vmpackc.low %vm5134_vm1, %vm5134_vm1  ;;  %v1072_v51 = vshrl.u32 %v4906_v36, 16  ;;  %v1321_v3 = vsel %vm1289_vm10, 65537, %v7755_v1  ;;  %v1662_v15 = vshrl.u32 %v5026_v52, 16 }
  0x3c   : > { %v5164_v17 = vsel %vm1051_vm6, %v1082_v5, %v5138_v8  ;;  %v1323_v19 = vsel %vm1291_vm11, 65537, %v7755_v1  ;;  %v1666_v26 = vshll.u32 %v5158_v13, 16  ;;  %v241_v36 = vadd.s32 96, %v4850_v2 }
  0x3d   : > { %4638 = vmatpush3.bf16.msra.mxu0 %v4752_v9  ;;  %vm7744_vm14 = vcmp.ne.s16.totalorder %v5164_v17, 0  ;;  %v335_v28 = vand.u32 15, %v239_v14  ;;  %v4538_v32 = vcombine.low %v4859_v7, %v1321_v3  ;;  %v4539_v33 = vcombine.low %v4859_v7, %v1323_v19 }
  0x3e   : > { %2068 = vrot.lane.b32.xlu0 %v1592_v29, %s4798_s30  ;;  %v1074_v29 = vor.u32 %v1072_v51, %v4931_v55  ;;  %v1558_v35 = vsel %vm7744_vm14, %v5026_v52, 0  ;;  %v1664_v39 = vor.u32 %v1662_v15, %v5057_v21  ;;  %v349_v43 = vand.u32 15, %v241_v36 }
  0x3f   : > { %2112 = vrot.lane.b32.xlu1 %v5078_v30, %s4797_s29  ;;  %v1575_v55 = vsel %vm7742_vm12, %v5026_v52, 0  ;;  %v5195_v44 = vsel %vm7745_vm13, %v5158_v13, 0  ;;  %vm5197_vm1 = vcmp.ne.s32.totalorder %v335_v28, 0  ;;  %v1431_v21 = vshrl.u32 %v4538_v32, 16 }
  0x40   : > { %v5202_v46 = vsel %vm1051_vm6, %v1074_v29, %v1078_v50  ;;  %v1439_v48 = vshrl.u32 %v4539_v33, 16  ;;  %v1987_v54 = vrot.slane %v1575_v55, 1  ;;  %v1989_v56 = vrot.slane %v5195_v44, 1  ;;  %vm949_vm11 = vmpackc.low %vm5197_vm1, %vm5197_vm1  ;;  %v5219_v50 = vld [vmem:[#allocation2 + $0x38] sm:$0xff] }
  0x41   : > { %vm5211_vm10 = vcmp.ne.s32.totalorder %v349_v43, 0  ;;  %vm7783_vm9 = vcmp.ne.s16.totalorder %v5202_v46, 0  ;;  %v1442_v4 = vshll.u32 %v4539_v33, 16  ;;  %v981_v5 = vsel %vm949_vm11, 65537, %v7755_v1 }
  0x42   : > { %2070 = vrot.lane.b32.xlu0 %v1593_v41, %s4798_s30  ;;  %v1668_v41 = vrot.slane %v1666_v26, 1  ;;  %v5222_v61 = vrot.slane %v1439_v48, 7  ;;  %vm951_vm1 = vmpackc.low %vm5211_vm10, %vm5211_vm10  ;;  %v1557_v9 = vsel %vm7783_vm9, %v4987_v27, 0  ;;  %v1990_v47 = vsel %vm1804_vm8, %v1987_v54, %v1989_v56 }
  0x43   : > { %1759 = vrot.lane.b32.xlu1 %v1653_v62, %s4792_s24  ;;  %v5132_v62 = vsel %vm7745_vm13, %v5026_v52, 0  ;;  %vm2277_vm7 = vcmask 64512   ;;  %v983_v16 = vsel %vm951_vm1, 65537, %v7755_v1  ;;  %v4522_v51 = vcombine.low %v981_v5, %v4859_v7  ;;  %v4756_v5 = vld [vmem:[%s4867_s23 + $0x70] sm:$0xff]  }
  0x44   : > { %v1812_v12 = vrot.slane %v5132_v62, 1  ;;  %v5208_v49 = vsel %vm1051_vm6, %v1664_v39, %v1668_v41  ;;  %v1444_v14 = vor.u32 %v1442_v4, %v5222_v61  ;;  %2910 = vst.msk [vmem:[#allocation3] sm:$0xff] %vm2277_vm7, %v7755_v1  ;;  %2911 = vst.msk [vmem:[#allocation3 + $0x8] sm:$0xff] %vm2277_vm7, %v7755_v1  ;;  %v1595_v27 = vsel %vm7744_vm14, %v5158_v13, 0 }
  0x45   : > { %2912 = vst.msk [vmem:[#allocation3 + $0x90] sm:$0xff] %vm2277_vm7, %v7755_v1  ;;  %2913 = vst.msk [vmem:[#allocation3 + $0x98] sm:$0xff] %vm2277_vm7, %v7755_v1  ;;  %v244_v15 = vadd.s32 120, %v4850_v2  ;;  %v1092_v28 = vshll.u32 %v4522_v51, 16  ;;  %v246_v29 = vadd.s32 136, %v4850_v2  ;;  %v1096_v39 = vshrl.u32 %v4522_v51, 16 }
  0x46   : > { %2066 = vrot.lane.b32.xlu0 %v1591_v57, %s4798_s30  ;;  %v1813_v23 = vsel %vm1804_vm8, %v1810_v60, %v1812_v12  ;;  %v1434_v60 = vshll.u32 %v4538_v32, 16  ;;  %v1988_v32 = vsel %vm1804_vm8, %v1985_v42, %v1987_v54  ;;  %v1612_v37 = vsel %vm7742_vm12, %v5158_v13, 0  ;;  %856 = vst.msk [vmem:[#allocation2 + $0x80] sm:$0xff] %vm709_vm0, %v4756_v5 }
  0x47   : > { %2196 = vrot.lane.b32.xlu1 %v2163_v58, %s4799_s8  ;;  %v1433_v58 = vrot.slane %v1431_v21, 7  ;;  %v384_v43 = vand.u32 15, %v246_v29  ;;  %v1594_v42 = vsel %vm7783_vm9, %v5026_v52, 0  ;;  %v2164_v21 = vrot.slane %v1612_v37, 1  ;;  %v4757_v52 = vld [vmem:[%s4867_s23 + $0x78] sm:$0xff]  }
  0x48   : > { %v243_v4 = vadd.s32 112, %v4850_v2  ;;  %857 = vst.msk [vmem:[#allocation2 + $0x88] sm:$0xff] %vm709_vm0, %v4757_v52  ;;  %vm2347_vm9 = vcmask 130048  }
  0x49   : > { %v5267_v36 = vsel %vm1390_vm15, %v1433_v58, %v1444_v14  ;;  %vm5305_vm12 = vcmp.ne.s32.totalorder %v384_v43, 15 }
  0x4a   : > { %2194 = vrot.lane.b32.xlu0 %v2161_v10, %s4799_s8  ;;  %v1674_v10 = vshll.u32 %v5219_v50, 16  ;;  %7852 = vst [vmem:[#allocation12_spill] sm:$0xff] %v5267_v36  ;;  %vm7749_vm11 = vcmp.ne.s16.totalorder %v5267_v36, 0  ;;  %vm1295_vm14 = vmpackc.low %vm5305_vm12, %vm5305_vm12 }
  0x4b   : > { %1844 = vrot.lane.b32.xlu1 %v1811_v11, %s4795_s27  ;;  %v1436_v11 = vor.u32 %v1434_v60, %v1433_v58  ;;  %v5297_v55 = vsel %vm7749_vm11, %v5219_v50, 0  ;;  %v5316_v58 = vsel %vm7745_vm13, %v5219_v50, 0  ;;  %v5318_v60 = vld [vmem:[#allocation2 + $0x40] sm:$0xff]  ;;  %v1327_v14 = vsel %vm1295_vm14, 65537, %v7755_v1 }
  0x4c   : > { %v1676_v19 = vrot.slane %v1674_v10, 1  ;;  %v1816_v63 = vrot.slane %v5297_v55, 1  ;;  %v2166_v18 = vrot.slane %v5316_v58, 1  ;;  %v249_v58 = vadd.s32 160, %v4850_v2 }
  0x4d   : > { %v5264_v26 = vsel %vm1390_vm15, %v5059_v22, %v1436_v11  ;;  %v370_v22 = vand.u32 15, %v244_v15  ;;  %v1682_v11 = vshll.u32 %v5318_v60, 16 }
  0x4e   : > { %2108 = vrot.lane.b32.xlu0 %v4982_v25, %s4797_s29  ;;  %7851 = vst [vmem:[#allocation11_spill] sm:$0xff] %v5264_v26  ;;  %vm7747_vm10 = vcmp.ne.s16.totalorder %v5264_v26, 0  ;;  %v2167_v29 = vsel %vm1804_vm8, %v2164_v21, %v2166_v18 }
  0x4f   : > { %1846 = vrot.lane.b32.xlu1 %v1813_v23, %s4795_s27  ;;  %v5259_v23 = vcombine.low %v983_v16, %v4859_v7  ;;  %vm5299_vm1 = vcmp.ne.s32.totalorder %v370_v22, 15  ;;  %v363_v16 = vand.u32 15, %v243_v4 }
  0x50   : > { %vm1293_vm5 = vmpackc.low %vm5299_vm1, %vm5299_vm1 }
  0x52   : > { %1761 = vrot.lane.b32.xlu0 %v5078_v30, %s4792_s24 }
  0x53   : > { %1897 = vrot.lane.b32.xlu1 %v1558_v35, %s4793_s25  ;;  %v1094_v35 = vrot.slane %v1092_v28, 1  ;;  %v4541_v28 = vcombine.low %v4859_v7, %v1327_v14 }
  0x55   : > { %v1098_v48 = vor.u32 %v1096_v39, %v1094_v35  ;;  %v5372_v39 = vsel %vm7749_vm11, %v5318_v60, 0  ;;  %v1458_v5 = vshll.u32 %v4541_v28, 16 }
  0x56   : > { %2192 = vrot.lane.b32.xlu0 %v2159_v59, %s4799_s8  ;;  %v1670_v59 = vshrl.u32 %v5158_v13, 16 }
  0x57   : > { %1939 = vrot.lane.b32.xlu1 %v5208_v49, %s4794_s26 }
  0x58   : > { %v1672_v3 = vor.u32 %v1670_v59, %v1668_v41  ;;  %v1100_v41 = vshll.u32 %v5259_v23, 16  ;;  %v1088_v59 = vshrl.u32 %v5092_v38, 16  ;;  %v1325_v38 = vsel %vm1293_vm5, 65537, %v7755_v1 }
  0x59   : > { %v4540_v15 = vcombine.low %v4859_v7, %v1325_v38  ;;  %vm5362_vm5 = vcmp.ne.s32.totalorder %v363_v16, 0 }
  0x5a   : > { %1895 = vrot.lane.b32.xlu0 %v1557_v9, %s4793_s25  ;;  %v5277_v33 = vsel %vm1051_vm6, %v1672_v3, %v1676_v19  ;;  %v5303_v54 = vrot.slane %v1100_v41, 1  ;;  %v2165_v9 = vsel %vm1804_vm8, %v2162_v45, %v2164_v21  ;;  %v1678_v45 = vshrl.u32 %v5219_v50, 16  ;;  %vm953_vm14 = vmpackc.low %vm5362_vm5, %vm5362_vm5 }
  0x5b   : > { %2023 = vrot.lane.b32.xlu1 %v1990_v47, %s4796_s28  ;;  %v1090_v51 = vor.u32 %v1088_v59, %v5138_v8  ;;  %v1684_v3 = vrot.slane %v1682_v11, 1  ;;  %v1447_v37 = vshrl.u32 %v4540_v15, 16  ;;  %v985_v4 = vsel %vm953_vm14, 65537, %v7755_v1  ;;  %v4753_v11 = vld [vmem:[%s7735_s1 + $0x10] ss:$0 sps:$4 sm:$0x33]  }
  0x5c   : > { %v5333_v47 = vsel %vm1051_vm6, %v1098_v48, %v5303_v54  ;;  %v5394_v48 = vld [vmem:[#allocation2 + $0x48] sm:$0xff]  ;;  %v4524_v14 = vcombine.low %v985_v4, %v4859_v7  ;;  %vm2713_vm14 = vcmask 1041408  }
  0x5d   : > { %vm7748_vm12 = vcmp.ne.s16.totalorder %v5333_v47, 0  ;;  %v5375_v41 = vsel %vm1051_vm6, %v1090_v51, %v1094_v35  ;;  %v1993_v35 = vrot.slane %v5372_v39, 1  ;;  %v1449_v62 = vrot.slane %v1447_v37, 7  ;;  %4715 = vmatprep.subr.msk.bf16.mxu0 %vm2713_vm14, %v4753_v11 }
  0x5e   : > { %1937 = vrot.lane.b32.xlu0 %v5078_v30, %s4794_s26  ;;  %v1540_v30 = vsel %vm7747_vm10, %v5158_v13, 0  ;;  %vm7746_vm13 = vcmp.ne.s16.totalorder %v5375_v41, 0  ;;  %v1597_v16 = vsel %vm7748_vm12, %v5318_v60, 0 }
  0x5f   : > { %2074 = vrot.lane.b32.xlu1 %v1595_v27, %s4798_s30  ;;  %v1814_v57 = vrot.slane %v1540_v30, 1  ;;  %v1680_v27 = vor.u32 %v1678_v45, %v1676_v19  ;;  %v1577_v19 = vsel %vm7747_vm10, %v5219_v50, 0  ;;  %v1690_v45 = vshll.u32 %v5394_v48, 16 }
  0x60   : > { %v1991_v25 = vrot.slane %v1577_v19, 1  ;;  %v1596_v44 = vsel %vm7746_vm13, %v5219_v50, 0 }
  0x61   : > { %v1817_v10 = vsel %vm1804_vm8, %v1814_v57, %v1816_v63  ;;  %v5380_v43 = vsel %vm1051_vm6, %v1680_v27, %v1684_v3  ;;  %v1815_v30 = vsel %vm1804_vm8, %v1812_v12, %v1814_v57  ;;  %v1450_v12 = vshll.u32 %v4540_v15, 16 }
  0x62   : > { %2021 = vrot.lane.b32.xlu0 %v1988_v32, %s4796_s28  ;;  %v1560_v32 = vsel %vm7748_vm12, %v5219_v50, 0  ;;  %v1994_v59 = vsel %vm1804_vm8, %v1991_v25, %v1993_v35  ;;  %v1692_v27 = vrot.slane %v1690_v45, 1  ;;  %v1992_v19 = vsel %vm1804_vm8, %v1989_v56, %v1991_v25  ;;  %v5486_v45 = vld [vmem:[#allocation2 + $0x50] sm:$0xff] }
  0x63   : > { %2116 = vrot.lane.b32.xlu1 %v5277_v33, %s4797_s29  ;;  %v1614_v56 = vsel %vm7747_vm10, %v5318_v60, 0 }
  0x66   : > { %2072 = vrot.lane.b32.xlu0 %v1594_v42, %s4798_s30  ;;  %v1455_v42 = vshrl.u32 %v4541_v28, 16  ;;  %v248_v28 = vadd.s32 152, %v4850_v2 }
  0x67   : > { %1763 = vrot.lane.b32.xlu1 %v5208_v49, %s4792_s24 }
  0x68   : > { %v5401_v57 = vrot.slane %v1455_v42, 7  ;;  %v1112_v42 = vshrl.u32 %v4524_v14, 16 }
  0x6a   : > { %2114 = vrot.lane.b32.xlu0 %v5208_v49, %s4797_s29  ;;  %v245_v49 = vadd.s32 128, %v4850_v2 }
  0x6b   : > { %1765 = vrot.lane.b32.xlu1 %v5277_v33, %s4792_s24 }
  0x6c   : > { %v377_v22 = vand.u32 15, %v245_v49  ;;  %v1460_v49 = vor.u32 %v1458_v5, %v5401_v57  ;;  %v2168_v5 = vrot.slane %v1614_v56, 1 }
  0x6e   : > { %2198 = vrot.lane.b32.xlu0 %v2165_v9, %s4799_s8  ;;  %vm5389_vm1 = vcmp.ne.s32.totalorder %v377_v22, 0  ;;  %v1559_v9 = vsel %vm7746_vm13, %v5158_v13, 0  ;;  %v1452_v13 = vor.u32 %v1450_v12, %v1449_v62  ;;  %v250_v22 = vadd.s32 168, %v4850_v2 }
  0x6f   : > { %1850 = vrot.lane.b32.xlu1 %v1817_v10, %s4795_s27  ;;  %vm955_vm5 = vmpackc.low %vm5389_vm1, %vm5389_vm1  ;;  %v1686_v10 = vshrl.u32 %v5318_v60, 16  ;;  %v5439_v8 = vsel %vm1390_vm15, %v1449_v62, %v1460_v49 }
  0x70   : > { %v987_v38 = vsel %vm955_vm5, 65537, %v7755_v1  ;;  %7862 = vst [vmem:[#allocation14_spill] sm:$0xff] %v5439_v8  ;;  %vm7780_vm5 = vcmp.ne.s16.totalorder %v5439_v8, 0  ;;  %v412_v21 = vand.u32 15, %v250_v22  ;;  %v7878_v8 = vmov 0  }
  0x71   : > { %v1688_v51 = vor.u32 %v1686_v10, %v1684_v3  ;;  %v5427_v15 = vcombine.low %v987_v38, %v4859_v7  ;;  %v5436_v3 = vsel %vm1390_vm15, %v5222_v61, %v1452_v13  ;;  %v5465_v52 = vsel %vm7780_vm5, %v5394_v48, 0 }
  0x72   : > { %2200 = vrot.lane.b32.xlu0 %v2167_v29, %s4799_s8  ;;  %v2715_v29 = vsel %vm2713_vm14, %v4753_v11, 0  ;;  %7861 = vst [vmem:[#allocation13_spill] sm:$0xff] %v5436_v3  ;;  %vm7750_vm1 = vcmp.ne.s16.totalorder %v5436_v3, 0  ;;  %vm5473_vm13 = vcmp.ne.s32.totalorder %v412_v21, 15  ;;  %v5484_v10 = vsel %vm7749_vm11, %v5394_v48, 0 }
  0x73   : > { %1901 = vrot.lane.b32.xlu1 %v1560_v32, %s4793_s25  ;;  %v1108_v32 = vshll.u32 %v4524_v14, 16  ;;  %4640 = vmatpush3.bf16.msra.mxu0 %v2715_v29  ;;  %v5445_v37 = vsel %vm1051_vm6, %v1688_v51, %v1692_v27  ;;  %v1542_v25 = vsel %vm7750_vm1, %v5318_v60, 0  ;;  %vm1299_vm12 = vmpackc.low %vm5473_vm13, %vm5473_vm13  ;;  %v247_v11 = vadd.s32 144, %v4850_v2 }
  0x74   : > { %v1104_v14 = vshrl.u32 %v5259_v23, 16  ;;  %v2169_v13 = vsel %vm1804_vm8, %v2166_v18, %v2168_v5  ;;  %v2170_v49 = vrot.slane %v5484_v10, 1  ;;  %v1698_v51 = vshll.u32 %v5486_v45, 16 }
  0x75   : > { %v1110_v61 = vrot.slane %v1108_v32, 1  ;;  %v1331_v29 = vsel %vm1299_vm12, 65537, %v7755_v1  ;;  %v391_v18 = vand.u32 15, %v247_v11  ;;  %v5538_v56 = vsel %vm7780_vm5, %v5486_v45, 0 }
  0x76   : > { %1848 = vrot.lane.b32.xlu0 %v1815_v30, %s4795_s27  ;;  %v1116_v30 = vshll.u32 %v5427_v15, 16  ;;  %v1106_v32 = vor.u32 %v1104_v14, %v5303_v54  ;;  %v2171_v21 = vsel %vm1804_vm8, %v2168_v5, %v2170_v49 }
  0x77   : > { %1943 = vrot.lane.b32.xlu1 %v5380_v43, %s4794_s26  ;;  %v1114_v62 = vor.u32 %v1112_v42, %v1110_v61 }
  0x78   : > { %v5471_v12 = vrot.slane %v1116_v30, 1  ;;  %v4543_v30 = vcombine.low %v4859_v7, %v1331_v29  ;;  %v5545_v4 = vsel %vm1051_vm6, %v1106_v32, %v1110_v61 }
  0x79   : > { %7870 = vst [vmem:[#allocation16_spill] sm:$0xff] %v5545_v4  ;;  %vm7752_vm11 = vcmp.ne.s16.totalorder %v5545_v4, 0 }
  0x7a   : > { %1899 = vrot.lane.b32.xlu0 %v1559_v9, %s4793_s25  ;;  %v1818_v9 = vrot.slane %v1542_v25, 1  ;;  %v5497_v38 = vsel %vm1051_vm6, %v1114_v62, %v5471_v12  ;;  %v1471_v5 = vshrl.u32 %v4543_v30, 16 }
  0x7b   : > { %2027 = vrot.lane.b32.xlu1 %v1994_v59, %s4796_s28  ;;  %v7754_v59 = vrot.slane %v5465_v52, 1  ;;  %7867 = vst [vmem:[#allocation15_spill] sm:$0xff] %v5497_v38  ;;  %vm7753_vm13 = vcmp.ne.s16.totalorder %v5497_v38, 0 }
  0x7c   : > { %v1562_v54 = vsel %vm7753_vm13, %v5394_v48, 0  ;;  %v1819_v14 = vsel %vm1804_vm8, %v1816_v63, %v1818_v9 }
  0x7d   : > { %v1821_v23 = vsel %vm1804_vm8, %v1818_v9, %v7754_v59  ;;  %v5573_v9 = vrot.slane %v1471_v5, 7 }
  0x7e   : > { %1941 = vrot.lane.b32.xlu0 %v5277_v33, %s4794_s26  ;;  %v398_v33 = vand.u32 15, %v248_v28 }
  0x7f   : > { %2078 = vrot.lane.b32.xlu1 %v1597_v16, %s4798_s30  ;;  %v1694_v16 = vshrl.u32 %v5394_v48, 16 }
  0x80   : > { %vm5467_vm14 = vcmp.ne.s32.totalorder %v398_v33, 15 }
  0x81   : > { %vm1297_vm10 = vmpackc.low %vm5467_vm14, %vm5467_vm14  ;;  %v1696_v22 = vor.u32 %v1694_v16, %v1692_v27  ;;  %v1579_v27 = vsel %vm7750_vm1, %v5394_v48, 0  ;;  %v7751_v16 = vrot.slane %v5538_v56, 1 }
  0x82   : > { %2025 = vrot.lane.b32.xlu0 %v1992_v19, %s4796_s28  ;;  %v1700_v19 = vrot.slane %v1698_v51, 1 }
  0x83   : > { %2120 = vrot.lane.b32.xlu1 %v5445_v37, %s4797_s29 }
  0x84   : > { %v5550_v62 = vsel %vm1051_vm6, %v1696_v22, %v1700_v19  ;;  %v1702_v22 = vshrl.u32 %v5486_v45, 16 }
  0x86   : > { %2076 = vrot.lane.b32.xlu0 %v1596_v44, %s4798_s30  ;;  %v405_v44 = vand.u32 15, %v249_v58  ;;  %v1704_v25 = vor.u32 %v1702_v22, %v1700_v19 }
  0x87   : > { %1767 = vrot.lane.b32.xlu1 %v5380_v43, %s4792_s24 }
  0x88   : > { %vm5558_vm12 = vcmp.ne.s32.totalorder %v405_v44, 0 }
  0x8a   : > { %2118 = vrot.lane.b32.xlu0 %v5380_v43, %s4797_s29  ;;  %v1329_v43 = vsel %vm1297_vm10, 65537, %v7755_v1  ;;  %vm5540_vm10 = vcmp.ne.s32.totalorder %v391_v18, 0  ;;  %v1561_v18 = vsel %vm7752_vm11, %v5318_v60, 0 }
  0x8b   : > { %1769 = vrot.lane.b32.xlu1 %v5445_v37, %s4792_s24  ;;  %v4542_v42 = vcombine.low %v4859_v7, %v1329_v43  ;;  %vm957_vm14 = vmpackc.low %vm5540_vm10, %vm5540_vm10  ;;  %v1474_v43 = vshll.u32 %v4543_v30, 16 }
  0x8c   : > { %v5510_v28 = vpop.permute.xlu1 %1753  ;;  %vm959_vm10 = vmpackc.low %vm5558_vm12, %vm5558_vm12  ;;  %v989_v29 = vsel %vm957_vm14, 65537, %v7755_v1 }
  0x8d   : > { %v1463_v50 = vshrl.u32 %v4542_v42, 16  ;;  %v1466_v55 = vshll.u32 %v4542_v42, 16  ;;  %v1476_v60 = vor.u32 %v1474_v43, %v5573_v9 }
  0x8e   : > { %2202 = vrot.lane.b32.xlu0 %v2169_v13, %s4799_s8  ;;  %v1995_v13 = vrot.slane %v1579_v27, 1  ;;  %v1599_v27 = vsel %vm7753_vm13, %v5486_v45, 0 }
  0x8f   : > { %1854 = vrot.lane.b32.xlu1 %v1821_v23, %s4795_s27  ;;  %v5568_v23 = vld [vmem:[#allocation2 + $0x58] sm:$0xff]  ;;  %v1465_v63 = vrot.slane %v1463_v50, 7 }
  0x90   : > { %v5524_v33 = vpop.permute.xlu1 %1889  ;;  %v1998_v32 = vsel %vm1804_vm8, %v1995_v13, %v7751_v16  ;;  %v1706_v42 = vshll.u32 %v5568_v23, 16 }
  0x91   : > { %v1468_v44 = vor.u32 %v1466_v55, %v1465_v63  ;;  %v254_v55 = vadd.s32 200, %v4850_v2  ;;  %v5618_v43 = vsel %vm1390_vm15, %v1465_v63, %v1476_v60 }
  0x92   : > { %2204 = vrot.lane.b32.xlu0 %v2171_v21, %s4799_s8  ;;  %v991_v21 = vsel %vm959_vm10, 65537, %v7755_v1  ;;  %v5599_v50 = vrot.slane %v1706_v42, 1  ;;  %7873 = vst [vmem:[#allocation17_spill] sm:$0xff] %v5618_v43  ;;  %vm7787_vm14 = vcmp.ne.s16.totalorder %v5618_v43, 0  ;;  %v1710_v1 = vshrl.u32 %v5568_v23, 16 }
  0x93   : > { %1905 = vrot.lane.b32.xlu1 %v1562_v54, %s4793_s25  ;;  %v4526_v54 = vcombine.low %v989_v29, %v4859_v7  ;;  %v5606_v61 = vcombine.low %v991_v21, %v4859_v7  ;;  %v252_v29 = vadd.s32 184, %v4850_v2  ;;  %v5615_v19 = vsel %vm1390_vm15, %v5401_v57, %v1468_v44 }
  0x94   : > { %v5552_v11 = vpop.permute.xlu1 %1891  ;;  %v5565_v51 = vpop.permute.xlu0 %1931  ;;  %v5625_v22 = vsel %vm1051_vm6, %v1704_v25, %v5599_v50  ;;  %vm7785_vm12 = vcmp.ne.s16.totalorder %v5615_v19, 0  ;;  %v440_v39 = vand.u32 15, %v254_v55  ;;  %v5657_v25 = vsel %vm7787_vm14, %v5568_v23, 0 }
  0x95   : > { %v1128_v21 = vshrl.u32 %v4526_v54, 16  ;;  %v426_v57 = vand.u32 15, %v252_v29  ;;  %v5652_v60 = vsel %vm7785_vm12, %v5486_v45, 0  ;;  %v1120_v29 = vshrl.u32 %v5427_v15, 16 }
  0x96   : > { %1852 = vrot.lane.b32.xlu0 %v1819_v14, %s4795_s27  ;;  %v1822_v16 = vrot.slane %v5652_v60, 1 }
  0x97   : > { %1947 = vrot.lane.b32.xlu1 %v5550_v62, %s4794_s26  ;;  %vm5659_vm10 = vcmp.ne.s32.totalorder %v426_v57, 15  ;;  %v7769_v57 = vrot.slane %v5657_v25, 1  ;;  %v1122_v24 = vor.u32 %v1120_v29, %v5471_v12  ;;  %v1712_v12 = vor.u32 %v1710_v1, %v5599_v50  ;;  %v4764_v1 = vld [vmem:[#allocation2 + $0x8] sm:$0xff] }
  0x98   : > { %v5579_v58 = vpop.permute.xlu1 %1893  ;;  %v5589_v30 = vpop.permute.xlu0 %1755  ;;  %v1197_v50 = vsel %vm7782_vm3, %v4764_v1, 0 }
  0x9a   : > { %1903 = vrot.lane.b32.xlu0 %v1561_v18, %s4793_s25  ;;  %v1124_v18 = vshll.u32 %v4526_v54, 16 }
  0x9b   : > { %2031 = vrot.lane.b32.xlu1 %v1998_v32, %s4796_s28  ;;  %v1996_v32 = vsel %vm1804_vm8, %v1993_v35, %v1995_v13  ;;  %v1616_v35 = vsel %vm7750_vm1, %v5486_v45, 0  ;;  %v1598_v13 = vsel %vm7752_vm11, %v5394_v48, 0  ;;  %vm5666_vm1 = vcmp.ne.s32.totalorder %v440_v39, 15  ;;  %vm1301_vm11 = vmpackc.low %vm5659_vm10, %vm5659_vm10 }
  0x9c   : > { %v5601_v5 = vpop.permute.xlu0 %1838  ;;  %v5634_v63 = vrot.slane %v1124_v18, 1  ;;  %v2172_v18 = vrot.slane %v1616_v35, 1  ;;  %v5678_v35 = vsel %vm7780_vm5, %v5568_v23, 0  ;;  %vm1303_vm13 = vmpackc.low %vm5666_vm1, %vm5666_vm1  ;;  %v1333_v15 = vsel %vm1301_vm11, 65537, %v7878_v8 }
  0x9d   : > { %v5603_v14 = vpop.permute.xlu1 %1840  ;;  %v1335_v3 = vsel %vm1303_vm13, 65537, %v7878_v8  ;;  %vm2312_vm5 = vcmask 97280  }
  0x9e   : > { %1945 = vrot.lane.b32.xlu0 %v5445_v37, %s4794_s26  ;;  %v1130_v48 = vor.u32 %v1128_v21, %v5634_v63  ;;  %v5680_v21 = vld [vmem:[#allocation2 + $0x60] sm:$0xff]  ;;  %v2173_v60 = vsel %vm1804_vm8, %v2170_v49, %v2172_v18  ;;  %v253_v49 = vadd.s32 192, %v4850_v2  ;;  %v5729_v20 = vcombine.low %v4859_v7, %v1335_v3 }
  0x9f   : > { %2082 = vrot.lane.b32.xlu1 %v1599_v27, %s4798_s30  ;;  %v1132_v27 = vshll.u32 %v5606_v61, 16  ;;  %v1714_v10 = vshll.u32 %v5680_v21, 16  ;;  %v5746_v3 = vsel %vm7785_vm12, %v5568_v23, 0 }
  0xa0   : > { %v5627_v42 = vpop.permute.xlu0 %1757  ;;  %v433_v6 = vand.u32 15, %v253_v49  ;;  %v5759_v49 = vsel %vm1051_vm6, %v1122_v24, %v5634_v63  ;;  %v1487_v53 = vshrl.u32 %v5729_v20, 16  ;;  %v7884_v24 = vrot.slane %v5465_v52, 1  ;;  %v858_v63 = vld [vmem:[#allocation2] sm:$0x80] }
  0xa1   : > { %v5629_v37 = vpop.permute.xlu1 %2017  ;;  %v5664_v55 = vrot.slane %v1132_v27, 1  ;;  %v251_v27 = vadd.s32 176, %v4850_v2  ;;  %v1718_v52 = vshrl.u32 %v5680_v21, 16 }
  0xa2   : > { %2029 = vrot.lane.b32.xlu0 %v1996_v32, %s4796_s28  ;;  %v4763_v32 = vld [vmem:[#allocation2 + $0x10] sm:$0xff]  ;;  %vm5768_vm13 = vcmp.ne.s32.totalorder %v433_v6, 0  ;;  %v2231_v6 = vsel %vm709_vm0, %v1197_v50, %v5589_v30  ;;  %v5807_v50 = vrot.slane %v1487_v53, 7 }
  0xa3   : > { %2124 = vrot.lane.b32.xlu1 %v5625_v22, %s4797_s29  ;;  %v5698_v59 = vsel %vm1051_vm6, %v1130_v48, %v5664_v55  ;;  %v1825_v48 = vsel %vm1804_vm8, %v1822_v16, %v7769_v57  ;;  %v1198_v40 = vsel %vm7781_vm4, %v4763_v32, 0  ;;  %v7879_v57 = vrot.slane %v5678_v35, 1  ;;  %vm963_vm3 = vmpackc.low %vm5768_vm13, %vm5768_vm13 }
  0xa4   : > { %v5645_v54 = vpop.permute.xlu0 %1933  ;;  %vm7788_vm1 = vcmp.ne.s16.totalorder %v5698_v59, 0  ;;  %vm7786_vm4 = vcmp.ne.s16.totalorder %v5759_v49, 0 }
  0xa5   : > { %v5647_v44 = vpop.permute.xlu1 %2019  ;;  %v2175_v31 = vsel %vm1804_vm8, %v2172_v18, %v7879_v57  ;;  %v1564_v32 = vsel %vm7788_vm1, %v5568_v23, 0  ;;  %v5751_v57 = vsel %vm7787_vm14, %v5680_v21, 0  ;;  %v1563_v29 = vsel %vm7786_vm4, %v5486_v45, 0 }
  0xa6   : > { %2080 = vrot.lane.b32.xlu0 %v1598_v13, %s4798_s30  ;;  %v995_v45 = vsel %vm963_vm3, 65537, %v7878_v8  ;;  %vm2487_vm3 = vcmask 261120  }
  0xa7   : > { %1771 = vrot.lane.b32.xlu1 %v5550_v62, %s4792_s24 }
  0xa8   : > { %v5686_v39 = vpop.permute.xlu0 %1935 }
  0xa9   : > { %v5688_v13 = vpop.permute.xlu1 %2015 }
  0xaa   : > { %2122 = vrot.lane.b32.xlu0 %v5550_v62, %s4797_s29  ;;  %v419_v62 = vand.u32 15, %v251_v27  ;;  %v5726_v27 = vcombine.low %v4859_v7, %v1333_v15 }
  0xab   : > { %1773 = vrot.lane.b32.xlu1 %v5625_v22, %s4792_s24 }
  0xac   : > { %v1843_v36 = vpop.permute.xlu0 %1842  ;;  %vm5735_vm11 = vcmp.ne.s32.totalorder %v419_v62, 0  ;;  %v5764_v62 = vld [vmem:[#allocation2 + $0x68] sm:$0xff]  ;;  %v1479_v0 = vshrl.u32 %v5726_v27, 16 }
  0xad   : > { %v5714_v26 = vpop.permute.xlu1 %2110  ;;  %vm961_vm10 = vmpackc.low %vm5735_vm11, %vm5735_vm11  ;;  %vm2382_vm11 = vcmask 162816  }
  0xae   : > { %2206 = vrot.lane.b32.xlu0 %v2173_v60, %s4799_s8  ;;  %v1716_v60 = vrot.slane %v1714_v10, 1  ;;  %v2234_v10 = vsel %vm709_vm0, %v1198_v40, %v5627_v42  ;;  %v7791_v42 = vrot.slane %v5751_v57, 1  ;;  %v993_v30 = vsel %vm961_vm10, 65537, %v7878_v8 }
  0xaf   : > { %1858 = vrot.lane.b32.xlu1 %v1825_v48, %s4795_s27  ;;  %v2283_v15 = vsel %vm2277_vm7, %v2234_v10, %v1843_v36  ;;  %v1999_v36 = vrot.slane %v5746_v3, 1  ;;  %v1722_v3 = vshll.u32 %v5764_v62, 16  ;;  %vm7789_vm10 = vcmask 195584  }
  0xb0   : > { %v5739_v48 = vpop.permute.xlu0 %2068  ;;  %v5779_v40 = vsel %vm1051_vm6, %v1712_v12, %v1716_v60  ;;  %v2318_v12 = vsel %vm2312_vm5, %v2283_v15, %v5579_v58  ;;  %v1482_v58 = vshll.u32 %v5726_v27, 16  ;;  %v1490_v15 = vshll.u32 %v5729_v20, 16 }
  0xb1   : > { %v5741_v18 = vpop.permute.xlu1 %2112  ;;  %v2353_v53 = vsel %vm2347_vm9, %v2318_v12, %v5686_v39 }
  0xb2   : > { %2208 = vrot.lane.b32.xlu0 %v2175_v31, %s4799_s8  ;;  %v1823_v31 = vsel %vm1804_vm8, %v7884_v24, %v1822_v16  ;;  %v2281_v16 = vsel %vm2277_vm7, %v2231_v6, %v5603_v14  ;;  %v1481_v14 = vrot.slane %v1479_v0, 7  ;;  %v1196_v24 = vsel %vm7784_vm2, %v858_v63, 0 }
  0xb3   : > { %1909 = vrot.lane.b32.xlu1 %v1564_v32, %s4793_s25  ;;  %v2316_v0 = vsel %vm2312_vm5, %v2281_v16, %v5552_v11  ;;  %v4528_v63 = vcombine.low %v993_v30, %v4859_v7  ;;  %v1720_v11 = vor.u32 %v1718_v52, %v1716_v60  ;;  %v5833_v16 = vrot.slane %v1722_v3, 1 }
  0xb4   : > { %v2071_v32 = vpop.permute.xlu0 %2070  ;;  %v2351_v6 = vsel %vm2347_vm9, %v2316_v0, %v5645_v54  ;;  %vm2452_vm2 = vcmask 228352   ;;  %v1484_v39 = vor.u32 %v1482_v58, %v1481_v14  ;;  %v1492_v1 = vor.u32 %v1490_v15, %v5807_v50 }
  0xb5   : > { %v5785_v10 = vpop.permute.xlu1 %1759  ;;  %v2388_v12 = vsel %vm2382_vm11, %v2353_v53, %v5647_v44  ;;  %v1601_v54 = vsel %vm7788_vm1, %v5680_v21, 0  ;;  %v5844_v60 = vcombine.low %v995_v45, %v4859_v7  ;;  %v2386_v52 = vsel %vm2382_vm11, %v2351_v6, %v5629_v37 }
  0xb6   : > { %1856 = vrot.lane.b32.xlu0 %v1823_v31, %s4795_s27  ;;  %v2002_v31 = vsel %vm1804_vm8, %v1999_v36, %v7791_v42  ;;  %v2423_v3 = vsel %vm7789_vm10, %v2388_v12, %v2071_v32  ;;  %v1140_v15 = vshll.u32 %v4528_v63, 16  ;;  %v2421_v44 = vsel %vm7789_vm10, %v2386_v52, %v5739_v48 }
  0xb7   : > { %1951 = vrot.lane.b32.xlu1 %v5779_v40, %s4794_s26  ;;  %v5859_v53 = vsel %vm1051_vm6, %v1720_v11, %v5833_v16  ;;  %v258_v37 = vadd.s32 232, %v4850_v2  ;;  %v2228_v32 = vsel %vm709_vm0, %v1196_v24, %v5510_v28  ;;  %v5874_v48 = vsel %vm1390_vm15, %v5573_v9, %v1484_v39 }
  0xb8   : > { %v5822_v27 = vpop.permute.xlu0 %2066  ;;  %v2279_v28 = vsel %vm2277_vm7, %v2228_v32, %v5601_v5  ;;  %v1144_v24 = vshrl.u32 %v4528_v63, 16  ;;  %v1148_v45 = vshll.u32 %v5844_v60, 16  ;;  %v2456_v11 = vsel %vm2452_vm2, %v2421_v44, %v5714_v26 }
  0xb9   : > { %v2197_v20 = vpop.permute.xlu1 %2196  ;;  %v5889_v39 = vrot.slane %v1140_v15, 1  ;;  %vm7798_vm13 = vcmp.ne.s16.totalorder %v5874_v48, 0  ;;  %v468_v5 = vand.u32 15, %v258_v37  ;;  %v1600_v63 = vsel %vm7786_vm4, %v5568_v23, 0 }
  0xba   : > { %1907 = vrot.lane.b32.xlu0 %v1563_v29, %s4793_s25  ;;  %v256_v29 = vadd.s32 216, %v4850_v2 }
  0xbb   : > { %2035 = vrot.lane.b32.xlu1 %v2002_v31, %s4796_s28  ;;  %v7885_v31 = vrot.slane %v5538_v56, 1  ;;  %v5870_v56 = vsel %vm7785_vm12, %v5680_v21, 0  ;;  %v1146_v44 = vor.u32 %v1144_v24, %v5889_v39  ;;  %v255_v24 = vadd.s32 208, %v4850_v2 }
  0xbc   : > { %v2195_v30 = vpop.permute.xlu0 %2194  ;;  %v2176_v26 = vrot.slane %v5870_v56, 1 }
  0xbd   : > { %v5849_v58 = vpop.permute.xlu1 %1844  ;;  %v2000_v0 = vsel %vm1804_vm8, %v7885_v31, %v1999_v36  ;;  %v5877_v36 = vsel %vm1390_vm15, %v1481_v14, %v1492_v1  ;;  %v454_v14 = vand.u32 15, %v256_v29  ;;  %v2491_v1 = vsel %vm2487_vm3, %v2456_v11, %v2195_v30 }
  0xbe   : > { %1949 = vrot.lane.b32.xlu0 %v5625_v22, %s4794_s26  ;;  %v2458_v22 = vsel %vm2452_vm2, %v2423_v3, %v5741_v18  ;;  %vm7793_vm12 = vcmp.ne.s16.totalorder %v5877_v36, 0  ;;  %v2314_v18 = vsel %vm2312_vm5, %v2279_v28, %v5524_v33  ;;  %v2537_v52 = vshrl.u32 %v2491_v1, 16 }
  0xbf   : > { %2086 = vrot.lane.b32.xlu1 %v1601_v54, %s4798_s30  ;;  %v2493_v6 = vsel %vm2487_vm3, %v2458_v22, %v2197_v20  ;;  %v5906_v54 = vsel %vm7787_vm14, %v5764_v62, 0  ;;  %v5915_v30 = vsel %vm7798_vm13, %v5680_v21, 0  ;;  %v5920_v15 = vsel %vm7793_vm12, %v5764_v62, 0 }
  0xc0   : > { %v2109_v12 = vpop.permute.xlu0 %2108  ;;  %v2544_v20 = vshrl.u32 %v2493_v6, 16  ;;  %vm5922_vm4 = vcmp.ne.s32.totalorder %v454_v14, 15  ;;  %v2349_v29 = vsel %vm2347_vm9, %v2314_v18, %v5565_v51  ;;  %v5929_v31 = vrot.slane %v1148_v45, 1 }
  0xc1   : > { %v5887_v9 = vpop.permute.xlu1 %1846  ;;  %vm5933_vm14 = vcmp.ne.s32.totalorder %v468_v5, 15  ;;  %v2384_v32 = vsel %vm2382_vm11, %v2349_v29, %v5688_v13  ;;  %v7890_v51 = vrot.slane %v5678_v35, 1  ;;  %v7794_v22 = vrot.slane %v5906_v54, 1  ;;  %vm1305_vm1 = vmpackc.low %vm5922_vm4, %vm5922_vm4 }
  0xc2   : > { %2033 = vrot.lane.b32.xlu0 %v2000_v0, %s4796_s28  ;;  %v5931_v0 = vld [vmem:[#allocation2 + $0x70] sm:$0xff]  ;;  %v2419_v45 = vsel %vm7789_vm10, %v2384_v32, %v5822_v27  ;;  %v5951_v11 = vrot.slane %v2544_v20, 7  ;;  %v1826_v13 = vrot.slane %v5915_v30, 1  ;;  %v7790_v14 = vrot.slane %v5920_v15, 1  ;;  %vm1307_vm10 = vmpackc.low %vm5933_vm14, %vm5933_vm14 }
  0xc3   : > { %2128 = vrot.lane.b32.xlu1 %v5859_v53, %s4797_s29  ;;  %v2177_v28 = vsel %vm1804_vm8, %v7890_v51, %v2176_v26  ;;  %v2539_v35 = vrot.slane %v2537_v52, 7  ;;  %v2454_v5 = vsel %vm2452_vm2, %v2419_v45, %v2109_v12  ;;  %v1726_v29 = vshrl.u32 %v5764_v62, 16 }
  0xc4   : > { %v5908_v3 = vpop.permute.xlu0 %1761  ;;  %v1730_v27 = vshll.u32 %v5931_v0, 16  ;;  %v2547_v20 = vshll.u32 %v2493_v6, 16  ;;  %v5969_v32 = vsel %vm1051_vm6, %v1146_v44, %v5929_v31  ;;  %v1136_v12 = vshrl.u32 %v5606_v61, 16 }
  0xc5   : > { %v5910_v33 = vpop.permute.xlu1 %1897  ;;  %v2540_v52 = vshll.u32 %v2491_v1, 16  ;;  %v1337_v6 = vsel %vm1305_vm1, 65537, %v7878_v8  ;;  %v447_v37 = vand.u32 15, %v255_v24  ;;  %v1829_v61 = vsel %vm1804_vm8, %v1826_v13, %v7790_v14 }
  0xc6   : > { %2084 = vrot.lane.b32.xlu0 %v1600_v63, %s4798_s30  ;;  %v2549_v44 = vor.u32 %v2547_v20, %v5951_v11  ;;  %v1339_v1 = vsel %vm1307_vm10, 65537, %v7878_v8  ;;  %vm7792_vm14 = vcmask 293888   ;;  %vm7800_vm4 = vcmp.ne.s16.totalorder %v5969_v32, 0 }
  0xc7   : > { %1775 = vrot.lane.b32.xlu1 %v5779_v40, %s4792_s24  ;;  %v2542_v45 = vor.u32 %v2540_v52, %v2539_v35  ;;  %v1728_v23 = vor.u32 %v1726_v29, %v5833_v16  ;;  %v1138_v24 = vor.u32 %v1136_v12, %v5664_v55  ;;  %v4546_v20 = vcombine.low %v4859_v7, %v1337_v6 }
  0xc8   : > { %v2193_v18 = vpop.permute.xlu0 %2192  ;;  %v4547_v14 = vcombine.low %v4859_v7, %v1339_v1  ;;  %vm6000_vm1 = vcmp.ne.s32.totalorder %v447_v37, 0  ;;  %v2550_v16 = vsel %vm1390_vm15, %v2539_v35, %v2549_v44  ;;  %v2179_v55 = vsel %vm1804_vm8, %v2176_v26, %v7794_v22 }
  0xc9   : > { %v5959_v63 = vpop.permute.xlu1 %1939  ;;  %v2489_v30 = vsel %vm2487_vm3, %v2454_v5, %v2193_v18  ;;  %v6020_v35 = vsel %vm7798_vm13, %v5764_v62, 0  ;;  %v6025_v56 = vsel %vm7793_vm12, %v5931_v0, 0  ;;  %v6029_v26 = vsel %vm1051_vm6, %v1138_v24, %v5889_v39  ;;  %vm965_vm10 = vmpackc.low %vm6000_vm1, %vm6000_vm1 }
  0xca   : > { %v2534_v51 = vshrl.u32 %v2489_v30, 16  ;;  %2126 = vrot.lane.b32.xlu0 %v5779_v40, %s4797_s29  ;;  %v257_v40 = vadd.s32 224, %v4850_v2  ;;  %v1495_v6 = vshrl.u32 %v4546_v20, 16  ;;  %v1503_v44 = vshrl.u32 %v4547_v14, 16 }
  0xcb   : > { %1777 = vrot.lane.b32.xlu1 %v5859_v53, %s4792_s24  ;;  %v2003_v39 = vrot.slane %v6020_v35, 1  ;;  %vm7799_vm1 = vcmp.ne.s16.totalorder %v6029_v26, 0  ;;  %vm7896_vm12 = vcmp.ne.s16.totalorder %v5202_v46, 0  ;;  %v1506_v35 = vshll.u32 %v4547_v14, 16 }
  0xcc   : > { %v2536_v5 = vrot.slane %v2534_v51, 7  ;;  %v5988_v18 = vpop.permute.xlu0 %1895  ;;  %v1732_v51 = vrot.slane %v1730_v27, 1  ;;  %v461_v29 = vand.u32 15, %v257_v40  ;;  %v7797_v40 = vrot.slane %v6025_v56, 1 }
  0xcd   : > { %v5990_v30 = vpop.permute.xlu1 %2023 }
  0xce   : > { %2210 = vrot.lane.b32.xlu0 %v2177_v28, %s4799_s8  ;;  %v2543_v52 = vsel %vm1390_vm15, %v2536_v5, %v2542_v45  ;;  %v1566_v28 = vsel %vm7800_vm4, %v5764_v62, 0  ;;  %v6037_v37 = vsel %vm1051_vm6, %v1728_v23, %v1732_v51  ;;  %v6044_v45 = vld [vmem:[#allocation2 + $0x78] sm:$0xff]  ;;  %v997_v23 = vsel %vm965_vm10, 65537, %v7878_v8 }
  0xcf   : > { %1862 = vrot.lane.b32.xlu1 %v1829_v61, %s4795_s27  ;;  %4641 = vmatprep.mubr.msk.bf16.mxu0 %vm7792_vm14, %v2543_v52  ;;  %v7893_v61 = vrot.slane %v5657_v25, 1  ;;  %v4765_v25 = vld [vmem:[#allocation2 + $0x18] sm:$0xff]  ;;  %v1497_v52 = vrot.slane %v1495_v6, 7  ;;  %v1565_v6 = vsel %vm7799_vm1, %v5680_v21, 0 }
  0xd0   : > { %v1938_v27 = vpop.permute.xlu0 %1937  ;;  %4642 = vmatmul.mubr.msk.bf16.vlgmr.msra.gmra.mrb[0].mxu0 %vm7792_vm14, %v2550_v16  ;;  %vm6046_vm14 = vcmp.ne.s32.totalorder %v461_v29, 0  ;;  %v1498_v16 = vshll.u32 %v4546_v20, 16  ;;  %v6061_v29 = vrot.slane %v1503_v44, 7  ;;  %v4530_v44 = vcombine.low %v997_v23, %v4859_v7 }
  0xd1   : > { %v6014_v12 = vpop.permute.xlu1 %2074  ;;  %v1827_v1 = vsel %vm1804_vm8, %v7893_v61, %v1826_v13  ;;  %v1199_v13 = vsel %vm7896_vm12, %v4765_v25, 0  ;;  %vm967_vm10 = vmpackc.low %vm6046_vm14, %vm6046_vm14  ;;  %v4766_v61 = vld [vmem:[#allocation2 + $0x20] sm:$0xff]  ;;  %vm7897_vm12 = vcmp.ne.s16.totalorder %v5164_v17, 0  ;;  %vm7898_vm14 = vcmask 195584  }
  0xd2   : > { %2212 = vrot.lane.b32.xlu0 %v2179_v55, %s4799_s8  ;;  %v1734_v55 = vshrl.u32 %v5931_v0, 16  ;;  %v1200_v20 = vsel %vm7897_vm12, %v4766_v61, 0  ;;  %v2237_v14 = vsel %vm709_vm0, %v1199_v13, %v5785_v10  ;;  %v1500_v22 = vor.u32 %v1498_v16, %v1497_v52 }
  0xd3   : > { %1913 = vrot.lane.b32.xlu1 %v1566_v28, %s4793_s25  ;;  %v1738_v28 = vshll.u32 %v6044_v45, 16  ;;  %v999_v43 = vsel %vm967_vm10, 65537, %v7878_v8  ;;  %v2240_v61 = vsel %vm709_vm0, %v1200_v20, %v5908_v3  ;;  %v1508_v23 = vor.u32 %v1506_v35, %v6061_v29 }
  0xd4   : > { %v2022_v5 = vpop.permute.xlu0 %2021  ;;  %v1736_v21 = vor.u32 %v1734_v55, %v1732_v51  ;;  %v2285_v10 = vsel %vm2277_vm7, %v2237_v14, %v5849_v58  ;;  %v1603_v13 = vsel %vm7800_vm4, %v5931_v0, 0  ;;  %v1156_v16 = vshll.u32 %v4530_v44, 16 }
  0xd5   : > { %v6050_v24 = vpop.permute.xlu1 %2116  ;;  %v2320_v3 = vsel %vm2312_vm5, %v2285_v10, %v5988_v18  ;;  %v6097_v51 = vcombine.low %v999_v43, %v4859_v7  ;;  %v2287_v55 = vsel %vm2277_vm7, %v2240_v61, %v5887_v9  ;;  %v6104_v58 = vsel %vm1390_vm15, %v5807_v50, %v1500_v22 }
  0xd6   : > { %1860 = vrot.lane.b32.xlu0 %v1827_v1, %s4795_s27  ;;  %v2006_v1 = vsel %vm1804_vm8, %v2003_v39, %v7797_v40  ;;  %v6084_v40 = vrot.slane %v1738_v28, 1  ;;  %v2355_v28 = vsel %vm2347_vm9, %v2320_v3, %v1938_v27  ;;  %v260_v35 = vadd.s32 248, %v4850_v2 }
  0xd7   : > { %1955 = vrot.lane.b32.xlu1 %v6037_v37, %s4794_s26  ;;  %v6116_v9 = vsel %vm1390_vm15, %v1497_v52, %v1508_v23  ;;  %v7899_v50 = vrot.slane %v5751_v57, 1  ;;  %v6122_v27 = vrot.slane %v1156_v16, 1  ;;  %vm7805_vm10 = vcmp.ne.s16.totalorder %v6104_v58, 0 }
  0xd8   : > { %v2073_v42 = vpop.permute.xlu0 %2072  ;;  %v6113_v43 = vsel %vm1051_vm6, %v1736_v21, %v6084_v40  ;;  %v1164_v52 = vshll.u32 %v6097_v51, 16  ;;  %vm7801_vm12 = vcmp.ne.s16.totalorder %v6116_v9, 0  ;;  %v1620_v10 = vsel %vm7798_vm13, %v5931_v0, 0 }
  0xd9   : > { %v6077_v25 = vpop.permute.xlu1 %1763  ;;  %v2004_v22 = vsel %vm1804_vm8, %v7899_v50, %v2003_v39  ;;  %v2180_v50 = vrot.slane %v1620_v10, 1  ;;  %vm7902_vm13 = vcmp.ne.s16.totalorder %v5877_v36, 0  ;;  %vm7903_vm4 = vcmask 293888  }
  0xda   : > { %1911 = vrot.lane.b32.xlu0 %v1565_v6, %s4793_s25 }
  0xdb   : > { %2039 = vrot.lane.b32.xlu1 %v2006_v1, %s4796_s28  ;;  %v2390_v1 = vsel %vm2382_vm11, %v2355_v28, %v2022_v5  ;;  %v1160_v5 = vshrl.u32 %v4530_v44, 16  ;;  %v482_v44 = vand.u32 15, %v260_v35  ;;  %v6164_v35 = vrot.slane %v1164_v52, 1 }
  0xdc   : > { %v2115_v20 = vpop.permute.xlu0 %2114  ;;  %v2425_v18 = vsel %vm7898_vm14, %v2390_v1, %v2073_v42 }
  0xdd   : > { %v6094_v6 = vpop.permute.xlu1 %1765  ;;  %v2460_v14 = vsel %vm2452_vm2, %v2425_v18, %v2115_v20  ;;  %v1162_v28 = vor.u32 %v1160_v5, %v6122_v27  ;;  %v6178_v5 = vsel %vm7902_vm13, %v6044_v45, 0 }
  0xde   : > { %1953 = vrot.lane.b32.xlu0 %v5859_v53, %s4794_s26  ;;  %v2322_v53 = vsel %vm2312_vm5, %v2287_v55, %v5910_v33  ;;  %v7804_v10 = vrot.slane %v6178_v5, 1 }
  0xdf   : > { %2090 = vrot.lane.b32.xlu1 %v1603_v13, %s4798_s30  ;;  %v2357_v57 = vsel %vm2347_vm9, %v2322_v53, %v5959_v63  ;;  %v1602_v63 = vsel %vm7799_vm1, %v5764_v62, 0  ;;  %v6160_v62 = vsel %vm7801_vm12, %v6044_v45, 0 }
  0xe0   : > { %v2199_v61 = vpop.permute.xlu0 %2198  ;;  %v2392_v33 = vsel %vm2382_vm11, %v2357_v57, %v5990_v30  ;;  %v6151_v30 = vsel %vm7805_vm10, %v5931_v0, 0  ;;  %v7803_v53 = vrot.slane %v6160_v62, 1 }
  0xe1   : > { %v6127_v21 = vpop.permute.xlu1 %1850  ;;  %v2495_v39 = vsel %vm2487_vm3, %v2460_v14, %v2199_v61  ;;  %v2427_v23 = vsel %vm7898_vm14, %v2392_v33, %v6014_v12  ;;  %vm6166_vm14 = vcmp.ne.s32.totalorder %v482_v44, 15  ;;  %v6188_v44 = vld [vmem:[#allocation2 + $0x80] sm:$0xff]  ;;  %v6196_v33 = vsel %vm1051_vm6, %v1162_v28, %v6164_v35 }
  0xe2   : > { %v2551_v42 = vshrl.u32 %v2495_v39, 16  ;;  %2037 = vrot.lane.b32.xlu0 %v2004_v22, %s4796_s28  ;;  %v2462_v13 = vsel %vm2452_vm2, %v2427_v23, %v6050_v24  ;;  %v2554_v3 = vshll.u32 %v2495_v39, 16  ;;  %v1830_v22 = vrot.slane %v6151_v30, 1  ;;  %vm1309_vm1 = vmpackc.low %vm6166_vm14, %vm6166_vm14 }
  0xe3   : > { %2132 = vrot.lane.b32.xlu1 %v6113_v43, %s4797_s29  ;;  %v259_v30 = vadd.s32 240, %v4850_v2  ;;  %vm1193_vm13 = vcmp.ne.s16.totalorder %v6196_v33, 0 }
  0xe4   : > { %v2553_v16 = vrot.slane %v2551_v42, 7  ;;  %v2201_v20 = vpop.permute.xlu0 %2200  ;;  %v1152_v42 = vshrl.u32 %v5844_v60, 16  ;;  %v1833_v60 = vsel %vm1804_vm8, %v1830_v22, %v7803_v53 }
  0xe5   : > { %v6155_v12 = vpop.permute.xlu1 %1901  ;;  %v2497_v55 = vsel %vm2487_vm3, %v2462_v13, %v2201_v20  ;;  %v1742_v13 = vshrl.u32 %v6044_v45, 16  ;;  %v475_v1 = vand.u32 15, %v259_v30  ;;  %v1750_v30 = vshrl.u32 %v6188_v44, 16 }
  0xe6   : > { %v2556_v24 = vor.u32 %v2554_v3, %v2553_v16  ;;  %v2558_v18 = vshrl.u32 %v2497_v55, 16  ;;  %2088 = vrot.lane.b32.xlu0 %v1602_v63, %s4798_s30  ;;  %v2561_v61 = vshll.u32 %v2497_v55, 16  ;;  %v1746_v3 = vshll.u32 %v6188_v44, 16 }
  0xe7   : > { %1779 = vrot.lane.b32.xlu1 %v6037_v37, %s4792_s24  ;;  %v1154_v2 = vor.u32 %v1152_v42, %v5929_v31  ;;  %v1585_v42 = vsel %vm7805_vm10, %v6044_v45, 0  ;;  %vm6249_vm14 = vcmp.ne.s32.totalorder %v475_v1, 0  ;;  %v4768_v1 = vld [vmem:[#allocation2 + $0x28] sm:$0xff] }
  0xe8   : > { %v6180_v14 = vrot.slane %v2558_v18, 7  ;;  %v6182_v52 = vpop.permute.xlu0 %1848  ;;  %v2557_v39 = vsel %vm1390_vm15, %v5951_v11, %v2556_v24  ;;  %v7904_v11 = vrot.slane %v5906_v54, 1  ;;  %v2183_v24 = vsel %vm1804_vm8, %v2180_v50, %v7804_v10 }
  0xe9   : > { %v6184_v57 = vpop.permute.xlu1 %1943  ;;  %4645 = vmatprep.mubr.msk.bf16.mxu0 %vm7903_vm4, %v2557_v39  ;;  %v1744_v18 = vor.u32 %v1742_v13, %v6084_v40 }
  0xea   : > { %v2563_v23 = vor.u32 %v2561_v61, %v6180_v14  ;;  %2130 = vrot.lane.b32.xlu0 %v6037_v37, %s4797_s29  ;;  %v2181_v63 = vsel %vm1804_vm8, %v7904_v11, %v2180_v50  ;;  %v1341_v37 = vsel %vm1309_vm1, 65537, %v7878_v8  ;;  %v1748_v61 = vrot.slane %v1746_v3, 1  ;;  %v4767_v11 = vld [vmem:[#allocation2 + $0x30] sm:$0xff] }
  0xeb   : > { %1781 = vrot.lane.b32.xlu1 %v6113_v43, %s4792_s24  ;;  %v4548_v28 = vcombine.low %v4859_v7, %v1341_v37  ;;  %v6243_v50 = vsel %vm1051_vm6, %v1154_v2, %v6122_v27  ;;  %vm7905_vm1 = vcmp.ne.s16.totalorder %v5333_v47, 0  ;;  %v2007_v3 = vrot.slane %v1585_v42, 1 }
  0xec   : > { %v1900_v20 = vpop.permute.xlu0 %1899  ;;  %v2564_v54 = vsel %vm1390_vm15, %v2553_v16, %v2563_v23  ;;  %v1568_v16 = vsel %vm1193_vm13, %v6044_v45, 0  ;;  %v6239_v23 = vsel %vm7801_vm12, %v6188_v44, 0  ;;  %v1202_v40 = vsel %vm7905_vm1, %v4767_v11, 0  ;;  %vm969_vm1 = vmpackc.low %vm6249_vm14, %vm6249_vm14 }
  0xed   : > { %v6215_v55 = vpop.permute.xlu1 %2027  ;;  %4646 = vmatmul.mubr.msk.bf16.gmra.mrb[4].mxu0 %vm7903_vm4, %v2564_v54  ;;  %v6257_v27 = vsel %vm1051_vm6, %v1744_v18, %v1748_v61  ;;  %v7802_v37 = vrot.slane %v6239_v23, 1  ;;  %vm7806_vm4 = vcmp.ne.s16.totalorder %v6243_v50, 0  ;;  %vm7909_vm12 = vcmp.ne.s16.totalorder %v5375_v41, 0 }
  0xee   : > { %2214 = vrot.lane.b32.xlu0 %v2181_v63, %s4799_s8  ;;  %v1511_v63 = vshrl.u32 %v4548_v28, 16  ;;  %v1514_v18 = vshll.u32 %v4548_v28, 16  ;;  %v1567_v42 = vsel %vm7806_vm4, %v5931_v0, 0 }
  0xef   : > { %1866 = vrot.lane.b32.xlu1 %v1833_v60, %s4795_s27  ;;  %v7908_v60 = vrot.slane %v5920_v15, 1  ;;  %v1201_v15 = vsel %vm7909_vm12, %v4768_v1, 0  ;;  %v2010_v11 = vsel %vm1804_vm8, %v2007_v3, %v7802_v37  ;;  %v1605_v1 = vsel %vm1193_vm13, %v6188_v44, 0 }
  0xf0   : > { %v1942_v39 = vpop.permute.xlu0 %1941  ;;  %vm7913_vm12 = vcmask 195584  }
  0xf1   : > { %v6231_v31 = vpop.permute.xlu1 %2078  ;;  %v1831_v13 = vsel %vm1804_vm8, %v7908_v60, %v1830_v22  ;;  %v2246_v22 = vsel %vm709_vm0, %v1202_v40, %v6094_v6 }
  0xf2   : > { %2216 = vrot.lane.b32.xlu0 %v2183_v24, %s4799_s8  ;;  %v6261_v24 = vld [vmem:[#allocation2 + $0x88] sm:$0xff]  ;;  %v2291_v28 = vsel %vm2277_vm7, %v2246_v22, %v6127_v21 }
  0xf3   : > { %1917 = vrot.lane.b32.xlu1 %v1568_v16, %s4793_s25  ;;  %v6273_v16 = vrot.slane %v1511_v63, 7  ;;  %v1924_v6 = vshll.u32 %v6261_v24, 16  ;;  %v2243_v63 = vsel %vm709_vm0, %v1201_v15, %v6077_v25  ;;  %v2326_v25 = vsel %vm2312_vm5, %v2291_v28, %v6155_v12 }
  0xf4   : > { %v2026_v54 = vpop.permute.xlu0 %2025  ;;  %v2289_v53 = vsel %vm2277_vm7, %v2243_v63, %v6182_v52  ;;  %v7911_v52 = vrot.slane %v6025_v56, 1 }
  0xf5   : > { %v2121_v2 = vpop.permute.xlu1 %2120  ;;  %7910 = vst [vmem:[#allocation18_spill] sm:$0xff] %v6273_v16  ;;  %v1516_v37 = vor.u32 %v1514_v18, %v6273_v16  ;;  %v6298_v10 = vrot.slane %v1924_v6, 1  ;;  %v2324_v15 = vsel %vm2312_vm5, %v2289_v53, %v1900_v20  ;;  %v2361_v53 = vsel %vm2347_vm9, %v2326_v25, %v6184_v57 }
  0xf6   : > { %1864 = vrot.lane.b32.xlu0 %v1831_v13, %s4795_s27  ;;  %v1001_v13 = vsel %vm969_vm1, 65537, %v7878_v8  ;;  %v1752_v8 = vor.u32 %v1750_v30, %v1748_v61  ;;  %vm7807_vm14 = vcmp.ne.s16.totalorder %v6273_v16, 0  ;;  %v2396_v57 = vsel %vm2382_vm11, %v2361_v53, %v6215_v55 }
  0xf7   : > { %1959 = vrot.lane.b32.xlu1 %v6257_v27, %s4794_s26  ;;  %v4532_v21 = vcombine.low %v1001_v13, %v4859_v7  ;;  %v2008_v7 = vsel %vm1804_vm8, %v7911_v52, %v2007_v3  ;;  %v6316_v12 = vsel %vm1390_vm15, %v6061_v29, %v1516_v37  ;;  %v1213_v3 = vld [vmem:[#allocation2 + $0x88] sm:$0x1]  ;;  %v1604_v30 = vsel %vm7806_vm4, %v6044_v45, 0 }
  0xf8   : > { %v2077_v40 = vpop.permute.xlu0 %2076  ;;  %7912 = vst [vmem:[#allocation19_spill] sm:$0xff] %v6316_v12  ;;  %v6323_v61 = vsel %vm1051_vm6, %v1752_v8, %v6298_v10  ;;  %vm7808_vm1 = vcmp.ne.s16.totalorder %v6316_v12, 0  ;;  %v1622_v6 = vsel %vm7805_vm10, %v6188_v44, 0  ;;  %v1551_v55 = vsel %vm7807_vm14, %v1213_v3, 0 }
  0xf9   : > { %v6283_v60 = vpop.permute.xlu1 %1767  ;;  %v1176_v28 = vshrl.u32 %v4532_v21, 16  ;;  %vm7916_vm10 = vcmask 293888  }
  0xfa   : > { %1915 = vrot.lane.b32.xlu0 %v1567_v42, %s4793_s25 }
  0xfb   : > { %2043 = vrot.lane.b32.xlu1 %v2010_v11, %s4796_s28  ;;  %v2359_v11 = vsel %vm2347_vm9, %v2324_v15, %v1942_v39 }
  0xfc   : > { %v2119_v22 = vpop.permute.xlu0 %2118  ;;  %v2394_v18 = vsel %vm2382_vm11, %v2359_v11, %v2026_v54  ;;  %v1550_v11 = vsel %vm7808_vm1, %v6188_v44, 0 }
  0xfd   : > { %v6304_v42 = vpop.permute.xlu1 %1769  ;;  %v2429_v20 = vsel %vm7913_vm12, %v2394_v18, %v2077_v40  ;;  %v2431_v40 = vsel %vm7913_vm12, %v2396_v57, %v6231_v31  ;;  %vm7914_vm12 = vcmp.ne.s16.totalorder %v6116_v9, 0  ;;  %v1168_v57 = vshrl.u32 %v6097_v51, 16 }
  0xfe   : > { %1957 = vrot.lane.b32.xlu0 %v6113_v43, %s4794_s26  ;;  %v1172_v43 = vshll.u32 %v4532_v21, 16  ;;  %v2464_v39 = vsel %vm2452_vm2, %v2429_v20, %v2119_v22  ;;  %v2466_v63 = vsel %vm2452_vm2, %v2431_v40, %v2121_v2  ;;  %v2184_v21 = vrot.slane %v1622_v6, 1 }
  0xff   : > { %2094 = vrot.lane.b32.xlu1 %v1605_v1, %s4798_s30  ;;  %v1834_v2 = vrot.slane %v1550_v11, 1  ;;  %v6359_v53 = vsel %vm7914_vm12, %v6261_v24, 0  ;;  %vm7918_vm12 = vcmask 293888  }
 0x100   : > { %v2203_v54 = vpop.permute.xlu0 %2202  ;;  %v1174_v13 = vrot.slane %v1172_v43, 1 }
 0x101   : > { %v6326_v56 = vpop.permute.xlu1 %1854  ;;  %v2499_v29 = vsel %vm2487_vm3, %v2464_v39, %v2203_v54 }
 0x102   : > { %v2565_v37 = vshrl.u32 %v2499_v29, 16  ;;  %2041 = vrot.lane.b32.xlu0 %v2008_v7, %s4796_s28  ;;  %v2568_v25 = vshll.u32 %v2499_v29, 16  ;;  %v1836_v7 = vrot.slane %v1551_v55, 1  ;;  %v6367_v29 = vor.u32 %v1176_v28, %v1174_v13 }
 0x103   : > { %2136 = vrot.lane.b32.xlu1 %v6323_v61, %s4797_s29 }
 0x104   : > { %v2567_v1 = vrot.slane %v2565_v37, 7  ;;  %v2205_v15 = vpop.permute.xlu0 %2204  ;;  %7915 = vst [vmem:[#allocation20_spill] sm:$0xff] %v6367_v29  ;;  %v1837_v40 = vsel %vm1804_vm8, %v1834_v2, %v1836_v7  ;;  %v7921_v7 = vrot.slane %v6160_v62, 1 }
 0x105   : > { %v6347_v22 = vpop.permute.xlu1 %1905  ;;  %v2501_v18 = vsel %vm2487_vm3, %v2466_v63, %v2205_v15 }
 0x106   : > { %v2570_v52 = vor.u32 %v2568_v25, %v2567_v1  ;;  %v2572_v31 = vshrl.u32 %v2501_v18, 16  ;;  %2092 = vrot.lane.b32.xlu0 %v1604_v30, %s4798_s30  ;;  %v2575_v43 = vshll.u32 %v2501_v18, 16  ;;  %v7917_v30 = vrot.slane %v6178_v5, 1 }
 0x107   : > { %1783 = vrot.lane.b32.xlu1 %v6257_v27, %s4792_s24  ;;  %v1928_v5 = vshrl.u32 %v6261_v24, 16 }
 0x108   : > { %v6361_v20 = vrot.slane %v2572_v31, 7  ;;  %v1853_v39 = vpop.permute.xlu0 %1852  ;;  %v2571_v3 = vsel %vm1390_vm15, %v6180_v14, %v2570_v52  ;;  %v2185_v6 = vsel %vm1804_vm8, %v7917_v30, %v2184_v21  ;;  %v2186_v14 = vrot.slane %v6359_v53, 1  ;;  %v4769_v31 = vld [vmem:[#allocation2 + $0x40] sm:$0xff] }
 0x109   : > { %v6363_v54 = vpop.permute.xlu1 %1947  ;;  %4649 = vmatprep.mubr.msk.bf16.mxu0 %vm7916_vm10, %v2571_v3  ;;  %vm7824_vm10 = vcmp.ne.s16.totalorder %v6367_v29, 0  ;;  %v6406_v52 = vor.u32 %v1928_v5, %v6298_v10  ;;  %v1608_v5 = vld [vmem:[#allocation2 + $0x98] sm:$0x1] }
 0x10a   : > { %v2577_v37 = vor.u32 %v2575_v43, %v6361_v20  ;;  %2134 = vrot.lane.b32.xlu0 %v6257_v27, %s4797_s29  ;;  %v1170_v27 = vor.u32 %v1168_v57, %v6164_v35  ;;  %v2187_v63 = vsel %vm1804_vm8, %v2184_v21, %v2186_v14  ;;  %v1587_v35 = vsel %vm7808_vm1, %v6261_v24, 0 }
 0x10b   : > { %1785 = vrot.lane.b32.xlu1 %v1752_v8, %s4792_s24  ;;  %v1571_v8 = vld [vmem:[#allocation2 + $0x90] sm:$0x1]  ;;  %v1835_v43 = vsel %vm1804_vm8, %v7921_v7, %v1834_v2  ;;  %v2011_v3 = vrot.slane %v1587_v35, 1 }
 0x10c   : > { %v1904_v55 = vpop.permute.xlu0 %1903  ;;  %v2578_v51 = vsel %vm1390_vm15, %v2567_v1, %v2577_v37  ;;  %v1570_v1 = vsel %vm7824_vm10, %v6261_v24, 0  ;;  %v1588_v11 = vsel %vm7807_vm14, %v1571_v8, 0  ;;  %v6401_v18 = vsel %vm1051_vm6, %v1170_v27, %v1174_v13  ;;  %v1590_v37 = vld [vmem:[#allocation2 + $0x90] sm:$0xff] }
 0x10d   : > { %v6380_v28 = vpop.permute.xlu1 %2031  ;;  %4650 = vmatmul.mubr.msk.bf16.gmra.mrb[8].mxu0 %vm7918_vm12, %v2578_v51  ;;  %7919 = vst [vmem:[#allocation21_spill] sm:$0xff] %v6401_v18  ;;  %vm7920_vm12 = vcmp.ne.s16.totalorder %v5497_v38, 0  ;;  %v2013_v57 = vrot.slane %v1588_v11, 1  ;;  %vm1194_vm4 = vcmp.ne.s16.totalorder %v6401_v18, 0  ;;  %v2101_v10 = vshll.u32 %v1590_v37, 16 }
 0x10e   : > { %2218 = vrot.lane.b32.xlu0 %v2185_v6, %s4799_s8  ;;  %v1204_v21 = vsel %vm7920_vm12, %v4769_v31, 0  ;;  %vm7922_vm12 = vcmp.ne.s16.totalorder %v5545_v4, 0  ;;  %v1569_v2 = vsel %vm1194_vm4, %v6188_v44, 0  ;;  %v2105_v35 = vshrl.u32 %v1590_v37, 16 }
 0x10f   : > { %1870 = vrot.lane.b32.xlu1 %v1837_v40, %s4795_s27  ;;  %v2252_v6 = vsel %vm709_vm0, %v1204_v21, %v6304_v42  ;;  %v4770_v40 = vld [vmem:[#allocation2 + $0x38] sm:$0xff]  ;;  %v2014_v51 = vsel %vm1804_vm8, %v2011_v3, %v2013_v57  ;;  %v1607_v31 = vsel %vm7824_vm10, %v1590_v37, 0  ;;  %v1625_v57 = vsel %vm7807_vm14, %v1608_v5, 0 }
 0x110   : > { %v1946_v25 = vpop.permute.xlu0 %1945  ;;  %v1203_v62 = vsel %vm7922_vm12, %v4770_v40, 0  ;;  %v2295_v42 = vsel %vm2277_vm7, %v2252_v6, %v6326_v56  ;;  %vm7924_vm12 = vcmask 195584  }
 0x111   : > { %v2083_v15 = vpop.permute.xlu1 %2082  ;;  %v2330_v21 = vsel %vm2312_vm5, %v2295_v42, %v6347_v22  ;;  %v7923_v22 = vrot.slane %v6239_v23, 1  ;;  %vm7925_vm14 = vmmov %vm7924_vm12 }
 0x112   : > { %2220 = vrot.lane.b32.xlu0 %v2187_v63, %s4799_s8  ;;  %v2249_v63 = vsel %vm709_vm0, %v1203_v62, %v6283_v60  ;;  %v1624_v60 = vsel %vm7808_vm1, %v1590_v37, 0  ;;  %v2365_v37 = vsel %vm2347_vm9, %v2330_v21, %v6363_v54  ;;  %vm7930_vm1 = vcmp.ne.s16.totalorder %v4903_v34, 0 }
 0x113   : > { %1921 = vrot.lane.b32.xlu1 %v1570_v1, %s4793_s25  ;;  %v2103_v1 = vrot.slane %v2101_v10, 1  ;;  %v2293_v11 = vsel %vm2277_vm7, %v2249_v63, %v1853_v39  ;;  %v2188_v62 = vrot.slane %v1624_v60, 1  ;;  %v2400_v42 = vsel %vm2382_vm11, %v2365_v37, %v6380_v28  ;;  %v7928_v37 = vld [vmem:[#allocation6_spill] sm:$0xff] }
 0x114   : > { %v2030_v13 = vpop.permute.xlu0 %2029  ;;  %v2328_v56 = vsel %vm2312_vm5, %v2293_v11, %v1904_v55  ;;  %v2012_v55 = vsel %vm1804_vm8, %v7923_v22, %v2011_v3  ;;  %v2435_v54 = vsel %vm7925_vm14, %v2400_v42, %v2083_v15  ;;  %v1606_v3 = vsel %vm1194_vm4, %v6261_v24, 0 }
 0x115   : > { %v2125_v30 = vpop.permute.xlu1 %2124  ;;  %v2363_v6 = vsel %vm2347_vm9, %v2328_v56, %v1946_v25  ;;  %v2107_v10 = vor.u32 %v2105_v35, %v2103_v1  ;;  %v2104_v15 = vsel %vm1051_vm6, %v6406_v52, %v2103_v1  ;;  %vm7926_vm14 = vcmask 293888  }
 0x116   : > { %1868 = vrot.lane.b32.xlu0 %v1835_v43, %s4795_s27  ;;  %v2398_v39 = vsel %vm2382_vm11, %v2363_v6, %v2030_v13  ;;  %v2470_v5 = vsel %vm2452_vm2, %v2435_v54, %v2125_v30  ;;  %v6477_v6 = vld [vmem:[#allocation3 + $0x8] sm:$0xff] }
 0x117   : > { %1963 = vrot.lane.b32.xlu1 %v6406_v52, %s4794_s26  ;;  %v2189_v52 = vsel %vm1804_vm8, %v2186_v14, %v2188_v62 }
 0x118   : > { %v2081_v27 = vpop.permute.xlu0 %2080 }
 0x119   : > { %v6425_v8 = vpop.permute.xlu1 %1771  ;;  %v2433_v40 = vsel %vm7924_vm12, %v2398_v39, %v2081_v27  ;;  %v3073_v39 = vshll.u32 %v6477_v6, 16  ;;  %vm7927_vm12 = vmmov %vm7926_vm14 }
 0x11a   : > { %1919 = vrot.lane.b32.xlu0 %v1569_v2, %s4793_s25  ;;  %v2190_v2 = vrot.slane %v1625_v57, 1 }
 0x11b   : > { %2047 = vrot.lane.b32.xlu1 %v2014_v51, %s4796_s28  ;;  %v6486_v1 = vrot.slane %v3073_v39, 1 }
 0x11c   : > { %v2123_v7 = vpop.permute.xlu0 %2122  ;;  %v2191_v27 = vsel %vm1804_vm8, %v2188_v62, %v2190_v2  ;;  %v2998_v2 = vld [vmem:[#allocation3 + $0x8] sm:$0x80] }
 0x11d   : > { %v6439_v43 = vpop.permute.xlu1 %1773  ;;  %v2468_v25 = vsel %vm2452_vm2, %v2433_v40, %v2123_v7  ;;  %v3000_v14 = vsel %vm7930_vm1, %v2998_v2, 0  ;;  %vm7932_vm1 = vcmp.ne.s16.totalorder %v5759_v49, 0 }
 0x11e   : > { %1961 = vrot.lane.b32.xlu0 %v6323_v61, %s4794_s26 }
 0x11f   : > { %2098 = vrot.lane.b32.xlu1 %v1607_v31, %s4798_s30 }
 0x120   : > { %v2207_v13 = vpop.permute.xlu0 %2206 }
 0x121   : > { %v1859_v51 = vpop.permute.xlu1 %1858  ;;  %v2503_v61 = vsel %vm2487_vm3, %v2468_v25, %v2207_v13  ;;  %v4771_v13 = vld [vmem:[#allocation2 + $0x50] sm:$0xff] }
 0x122   : > { %v2579_v23 = vshrl.u32 %v2503_v61, 16  ;;  %2045 = vrot.lane.b32.xlu0 %v2012_v55, %s4796_s28  ;;  %v2582_v35 = vshll.u32 %v2503_v61, 16 }
 0x123   : > { %2140 = vrot.lane.b32.xlu1 %v2107_v10, %s4797_s29 }
 0x124   : > { %v2581_v63 = vrot.slane %v2579_v23, 7  ;;  %v2209_v11 = vpop.permute.xlu0 %2208 }
 0x125   : > { %v1910_v31 = vpop.permute.xlu1 %1909  ;;  %v2505_v28 = vsel %vm2487_vm3, %v2470_v5, %v2209_v11 }
 0x126   : > { %v2584_v21 = vor.u32 %v2582_v35, %v2581_v63  ;;  %v2586_v56 = vshrl.u32 %v2505_v28, 16  ;;  %2096 = vrot.lane.b32.xlu0 %v1606_v3, %s4798_s30  ;;  %v2589_v7 = vshll.u32 %v2505_v28, 16  ;;  %v4772_v3 = vld [vmem:[#allocation2 + $0x48] sm:$0xff] }
 0x127   : > { %2224 = vrot.lane.b32.xlu1 %v2191_v27, %s4799_s8  ;;  %v1205_v27 = vsel %vm7932_vm1, %v4772_v3, 0  ;;  %vm7935_vm1 = vcmask 293888  }
 0x128   : > { %v6473_v24 = vrot.slane %v2586_v56, 7  ;;  %v1857_v60 = vpop.permute.xlu0 %1856  ;;  %v2585_v57 = vsel %vm1390_vm15, %v6361_v20, %v2584_v21  ;;  %v2255_v11 = vsel %vm709_vm0, %v1205_v27, %v6425_v8 }
 0x129   : > { %v1952_v30 = vpop.permute.xlu1 %1951  ;;  %4653 = vmatprep.mubr.msk.bf16.mxu0 %vm7926_vm14, %v2585_v57  ;;  %vm7929_vm14 = vcmp.ne.s16.totalorder %v7928_v37, 0  ;;  %v2297_v28 = vsel %vm2277_vm7, %v2255_v11, %v1857_v60 }
 0x12a   : > { %v2591_v22 = vor.u32 %v2589_v7, %v6473_v24  ;;  %2138 = vrot.lane.b32.xlu0 %v2104_v15, %s4797_s29  ;;  %v6495_v40 = vsel %vm7929_vm14, %v6477_v6, 0  ;;  %vm7933_vm14 = vcmask 195584  }
 0x12b   : > { %3199 = vrot.lane.b32.xlu1 %v6486_v1, %s4795_s27  ;;  %v3250_v53 = vrot.slane %v6495_v40, 1 }
 0x12c   : > { %v1908_v55 = vpop.permute.xlu0 %1907  ;;  %v2592_v20 = vsel %vm1390_vm15, %v2581_v63, %v2591_v22 }
 0x12d   : > { %v2036_v10 = vpop.permute.xlu1 %2035  ;;  %4654 = vmatmul.mubr.msk.bf16.gmra.mrb[12].mxu0 %vm7927_vm12, %v2592_v20  ;;  %vm7931_vm12 = vcmp.ne.s16.totalorder %v5698_v59, 0  ;;  %v2332_v56 = vsel %vm2312_vm5, %v2297_v28, %v1908_v55 }
 0x12e   : > { %2222 = vrot.lane.b32.xlu0 %v2189_v52, %s4799_s8  ;;  %v1206_v61 = vsel %vm7931_vm12, %v4771_v13, 0  ;;  %vm7934_vm12 = vmmov %vm7933_vm14 }
 0x12f   : > { %3334 = vrot.lane.b32.xlu1 %v3000_v14, %s4798_s30  ;;  %v2258_v54 = vsel %vm709_vm0, %v1206_v61, %v6439_v43 }
 0x130   : > { %v1950_v62 = vpop.permute.xlu0 %1949  ;;  %v2299_v35 = vsel %vm2277_vm7, %v2258_v54, %v1859_v51 }
 0x131   : > { %v2087_v25 = vpop.permute.xlu1 %2086  ;;  %v2334_v21 = vsel %vm2312_vm5, %v2299_v35, %v1910_v31  ;;  %v2367_v43 = vsel %vm2347_vm9, %v2332_v56, %v1950_v62 }
 0x132   : > { %3283 = vrot.lane.b32.xlu0 %v3250_v53, %s4794_s26  ;;  %v2369_v39 = vsel %vm2347_vm9, %v2334_v21, %v1952_v30 }
 0x133   : > { %v2404_v31 = vsel %vm2382_vm11, %v2369_v39, %v2036_v10 }
 0x134   : > { %v2034_v42 = vpop.permute.xlu0 %2033  ;;  %v2439_v55 = vsel %vm7934_vm12, %v2404_v31, %v2087_v25  ;;  %vm7937_vm12 = vcmp.ne.s16.totalorder %v5969_v32, 0 }
 0x135   : > { %v2129_v23 = vpop.permute.xlu1 %2128  ;;  %v2402_v57 = vsel %vm2382_vm11, %v2367_v43, %v2034_v42 }
 0x136   : > { %v2474_v2 = vsel %vm2452_vm2, %v2439_v55, %v2129_v23 }
 0x138   : > { %v2085_v5 = vpop.permute.xlu0 %2084 }
 0x139   : > { %v1776_v63 = vpop.permute.xlu1 %1775  ;;  %v2437_v22 = vsel %vm7933_vm14, %v2402_v57, %v2085_v5  ;;  %vm7936_vm14 = vmmov %vm7935_vm1 }
 0x13c   : > { %v2127_v15 = vpop.permute.xlu0 %2126 }
 0x13d   : > { %v1778_v7 = vpop.permute.xlu1 %1777  ;;  %v2472_v51 = vsel %vm2452_vm2, %v2437_v22, %v2127_v15  ;;  %v4773_v15 = vld [vmem:[#allocation2 + $0x60] sm:$0xff] }
 0x13e   : > { %v1208_v43 = vsel %vm7937_vm12, %v4773_v15, 0 }
 0x13f   : > { %v2264_v22 = vsel %vm709_vm0, %v1208_v43, %v1778_v7 }
 0x140   : > { %v2211_v52 = vpop.permute.xlu0 %2210 }
 0x141   : > { %v1863_v8 = vpop.permute.xlu1 %1862  ;;  %v2507_v60 = vsel %vm2487_vm3, %v2472_v51, %v2211_v52 }
 0x142   : > { %v2593_v20 = vshrl.u32 %v2507_v60, 16  ;;  %v2596_v62 = vshll.u32 %v2507_v60, 16  ;;  %v2303_v31 = vsel %vm2277_vm7, %v2264_v22, %v1863_v8 }
 0x144   : > { %v2595_v14 = vrot.slane %v2593_v20, 7  ;;  %v2213_v13 = vpop.permute.xlu0 %2212 }
 0x145   : > { %v1914_v61 = vpop.permute.xlu1 %1913  ;;  %v2509_v30 = vsel %vm2487_vm3, %v2474_v2, %v2213_v13 }
 0x146   : > { %v2598_v42 = vor.u32 %v2596_v62, %v2595_v14  ;;  %v2600_v54 = vshrl.u32 %v2509_v30, 16  ;;  %v2603_v27 = vshll.u32 %v2509_v30, 16  ;;  %v2338_v2 = vsel %vm2312_vm5, %v2303_v31, %v1914_v61 }
 0x148   : > { %v2602_v3 = vrot.slane %v2600_v54, 7  ;;  %v1861_v5 = vpop.permute.xlu0 %1860  ;;  %v2599_v10 = vsel %vm1390_vm15, %v6473_v24, %v2598_v42  ;;  %v4774_v24 = vld [vmem:[#allocation2 + $0x58] sm:$0xff] }
 0x149   : > { %v1956_v35 = vpop.permute.xlu1 %1955  ;;  %4657 = vmatprep.mubr.msk.bf16.mxu0 %vm7935_vm1, %v2599_v10  ;;  %vm7938_vm1 = vcmp.ne.s16.totalorder %v6029_v26, 0 }
 0x14a   : > { %v2605_v25 = vor.u32 %v2603_v27, %v2602_v3  ;;  %v1207_v51 = vsel %vm7938_vm1, %v4774_v24, 0  ;;  %v2373_v42 = vsel %vm2347_vm9, %v2338_v2, %v1956_v35  ;;  %vm7941_vm1 = vcmask 293888  }
 0x14b   : > { %v2261_v20 = vsel %vm709_vm0, %v1207_v51, %v1776_v63 }
 0x14c   : > { %v1912_v11 = vpop.permute.xlu0 %1911  ;;  %v2606_v28 = vsel %vm1390_vm15, %v2595_v14, %v2605_v25  ;;  %v2301_v55 = vsel %vm2277_vm7, %v2261_v20, %v1861_v5 }
 0x14d   : > { %v2040_v23 = vpop.permute.xlu1 %2039  ;;  %4658 = vmatmul.mubr.msk.bf16.gmra.mrb[16].mxu0 %vm7936_vm14, %v2606_v28  ;;  %v2336_v14 = vsel %vm2312_vm5, %v2301_v55, %v1912_v11  ;;  %vm7939_vm14 = vcmask 195584  }
 0x14e   : > { %v2408_v61 = vsel %vm2382_vm11, %v2373_v42, %v2040_v23  ;;  %vm7940_vm12 = vmmov %vm7939_vm14 }
 0x150   : > { %v1954_v21 = vpop.permute.xlu0 %1953 }
 0x151   : > { %v2091_v56 = vpop.permute.xlu1 %2090  ;;  %v2371_v7 = vsel %vm2347_vm9, %v2336_v14, %v1954_v21 }
 0x152   : > { %v2443_v25 = vsel %vm7940_vm12, %v2408_v61, %v2091_v56  ;;  %vm7943_vm12 = vcmp.ne.s16.totalorder %v6243_v50, 0 }
 0x154   : > { %v2038_v57 = vpop.permute.xlu0 %2037 }
 0x155   : > { %v2133_v39 = vpop.permute.xlu1 %2132  ;;  %v2406_v30 = vsel %vm2382_vm11, %v2371_v7, %v2038_v57 }
 0x156   : > { %v2478_v11 = vsel %vm2452_vm2, %v2443_v25, %v2133_v39 }
 0x158   : > { %v2089_v52 = vpop.permute.xlu0 %2088 }
 0x159   : > { %v1780_v60 = vpop.permute.xlu1 %1779  ;;  %v2441_v54 = vsel %vm7939_vm14, %v2406_v30, %v2089_v52  ;;  %vm7942_vm14 = vmmov %vm7941_vm1 }
 0x15c   : > { %v2131_v62 = vpop.permute.xlu0 %2130 }
 0x15d   : > { %v1782_v13 = vpop.permute.xlu1 %1781  ;;  %v2476_v8 = vsel %vm2452_vm2, %v2441_v54, %v2131_v62  ;;  %v1210_v62 = vsel %vm1193_vm13, %v5931_v0, 0 }
 0x15e   : > { %v2270_v42 = vsel %vm709_vm0, %v1210_v62, %v1782_v13 }
 0x160   : > { %v2215_v27 = vpop.permute.xlu0 %2214 }
 0x161   : > { %v1867_v63 = vpop.permute.xlu1 %1866  ;;  %v2511_v5 = vsel %vm2487_vm3, %v2476_v8, %v2215_v27 }
 0x162   : > { %v2607_v10 = vshrl.u32 %v2511_v5, 16  ;;  %v2610_v21 = vshll.u32 %v2511_v5, 16  ;;  %v2307_v5 = vsel %vm2277_vm7, %v2270_v42, %v1867_v63 }
 0x164   : > { %v2609_v28 = vrot.slane %v2607_v10, 7  ;;  %v2217_v15 = vpop.permute.xlu0 %2216 }
 0x165   : > { %v1918_v43 = vpop.permute.xlu1 %1917  ;;  %v2513_v35 = vsel %vm2487_vm3, %v2478_v11, %v2217_v15 }
 0x166   : > { %v2612_v57 = vor.u32 %v2610_v21, %v2609_v28  ;;  %v2614_v22 = vshrl.u32 %v2513_v35, 16  ;;  %v2617_v51 = vshll.u32 %v2513_v35, 16  ;;  %v2342_v25 = vsel %vm2312_vm5, %v2307_v5, %v1918_v43 }
 0x168   : > { %v2616_v24 = vrot.slane %v2614_v22, 7  ;;  %v1865_v52 = vpop.permute.xlu0 %1864  ;;  %v2613_v20 = vsel %vm1390_vm15, %v2602_v3, %v2612_v57  ;;  %v4775_v3 = vld [vmem:[#allocation2 + $0x68] sm:$0xff] }
 0x169   : > { %v1960_v31 = vpop.permute.xlu1 %1959  ;;  %4661 = vmatprep.mubr.msk.bf16.mxu0 %vm7941_vm1, %v2613_v20  ;;  %v1209_v54 = vsel %vm7943_vm12, %v4775_v3, 0  ;;  %vm7944_vm1 = vcmask 195584   ;;  %vm7946_vm12 = vcmask 293888  }
 0x16a   : > { %v2619_v23 = vor.u32 %v2617_v51, %v2616_v24  ;;  %v2267_v61 = vsel %vm709_vm0, %v1209_v54, %v1780_v60  ;;  %v2377_v15 = vsel %vm2347_vm9, %v2342_v25, %v1960_v31 }
 0x16b   : > { %v2305_v10 = vsel %vm2277_vm7, %v2267_v61, %v1865_v52 }
 0x16c   : > { %v1916_v56 = vpop.permute.xlu0 %1915  ;;  %v2620_v39 = vsel %vm1390_vm15, %v2609_v28, %v2619_v23 }
 0x16d   : > { %v2044_v55 = vpop.permute.xlu1 %2043  ;;  %4662 = vmatmul.mubr.msk.bf16.gmra.mrb[20].mxu0 %vm7942_vm14, %v2620_v39  ;;  %v2340_v0 = vsel %vm2312_vm5, %v2305_v10, %v1916_v56  ;;  %vm7945_vm14 = vmmov %vm7944_vm1 }
 0x16e   : > { %v2412_v43 = vsel %vm2382_vm11, %v2377_v15, %v2044_v55  ;;  %v1212_v55 = vsel %vm7824_vm10, %v6188_v44, 0  ;;  %v1211_v44 = vsel %vm1194_vm4, %v6044_v45, 0  ;;  %vm7825_vm10 = vcmask 588800  }
 0x170   : > { %v1958_v2 = vpop.permute.xlu0 %1957 }
 0x171   : > { %v2095_v14 = vpop.permute.xlu1 %2094  ;;  %v2375_v13 = vsel %vm2347_vm9, %v2340_v0, %v1958_v2 }
 0x172   : > { %v2447_v52 = vsel %vm7945_vm14, %v2412_v43, %v2095_v14 }
 0x174   : > { %v2042_v7 = vpop.permute.xlu0 %2041 }
 0x175   : > { %v2137_v30 = vpop.permute.xlu1 %2136  ;;  %v2410_v21 = vsel %vm2382_vm11, %v2375_v13, %v2042_v7 }
 0x176   : > { %v2482_v20 = vsel %vm2452_vm2, %v2447_v52, %v2137_v30 }
 0x178   : > { %v2093_v8 = vpop.permute.xlu0 %2092 }
 0x179   : > { %v1784_v27 = vpop.permute.xlu1 %1783  ;;  %v2445_v35 = vsel %vm7944_vm1, %v2410_v21, %v2093_v8  ;;  %vm7947_vm1 = vmmov %vm7946_vm12 }
 0x17c   : > { %v2135_v11 = vpop.permute.xlu0 %2134 }
 0x17d   : > { %v1786_v28 = vpop.permute.xlu1 %1785  ;;  %v2480_v63 = vsel %vm2452_vm2, %v2445_v35, %v2135_v11 }
 0x17e   : > { %v2276_v25 = vsel %vm709_vm0, %v1212_v55, %v1786_v28 }
 0x180   : > { %v2219_v57 = vpop.permute.xlu0 %2218 }
 0x181   : > { %v1871_v60 = vpop.permute.xlu1 %1870  ;;  %v2515_v22 = vsel %vm2487_vm3, %v2480_v63, %v2219_v57 }
 0x182   : > { %v2621_v51 = vshrl.u32 %v2515_v22, 16  ;;  %v2624_v56 = vshll.u32 %v2515_v22, 16  ;;  %v2311_v0 = vsel %vm2277_vm7, %v2276_v25, %v1871_v60  ;;  %v2273_v22 = vsel %vm709_vm0, %v1211_v44, %v1784_v27  ;;  %vm7949_vm0 = vmmov %vm7947_vm1 }
 0x184   : > { %v2623_v23 = vrot.slane %v2621_v51, 7  ;;  %v2221_v39 = vpop.permute.xlu0 %2220 }
 0x185   : > { %v1922_v2 = vpop.permute.xlu1 %1921  ;;  %v2517_v31 = vsel %vm2487_vm3, %v2482_v20, %v2221_v39 }
 0x186   : > { %v2626_v62 = vor.u32 %v2624_v56, %v2623_v23  ;;  %v2628_v7 = vshrl.u32 %v2517_v31, 16  ;;  %v2631_v3 = vshll.u32 %v2517_v31, 16 }
 0x188   : > { %v2630_v42 = vrot.slane %v2628_v7, 7  ;;  %v1869_v54 = vpop.permute.xlu0 %1868  ;;  %v2627_v5 = vsel %vm1390_vm15, %v2616_v24, %v2626_v62  ;;  %v2346_v24 = vsel %vm2312_vm5, %v2311_v0, %v1922_v2  ;;  %v6606_v7 = vld [vmem:[%s7736_s2] ss:$0 sm:$0xff] }
 0x189   : > { %v1964_v8 = vpop.permute.xlu1 %1963  ;;  %4665 = vmatprep.mubr.msk.bf16.mxu0 %vm7946_vm12, %v2627_v5  ;;  %v2309_v43 = vsel %vm2277_vm7, %v2273_v22, %v1869_v54  ;;  %vm7948_vm12 = vmmov %vm7945_vm14 }
 0x18a   : > { %v2633_v14 = vor.u32 %v2631_v3, %v2630_v42  ;;  %v2381_v35 = vsel %vm2347_vm9, %v2346_v24, %v1964_v8 }
 0x18c   : > { %v1920_v30 = vpop.permute.xlu0 %1919  ;;  %v2634_v10 = vsel %vm1390_vm15, %v2623_v23, %v2633_v14 }
 0x18d   : > { %v2048_v61 = vpop.permute.xlu1 %2047  ;;  %4666 = vmatmul.mubr.msk.bf16.gmra.mrb[24].mxu0 %vm7947_vm1, %v2634_v10  ;;  %v2344_v52 = vsel %vm2312_vm5, %v2309_v43, %v1920_v30  ;;  %vm7955_vm1 = vcmp.ne.s16.totalorder %v7928_v37, 0 }
 0x18e   : > { %v2416_v57 = vsel %vm2382_vm11, %v2381_v35, %v2048_v61 }
 0x190   : > { %v1962_v11 = vpop.permute.xlu0 %1961 }
 0x191   : > { %v2099_v13 = vpop.permute.xlu1 %2098  ;;  %v2379_v56 = vsel %vm2347_vm9, %v2344_v52, %v1962_v11  ;;  %v7953_v52 = vld [vmem:[#allocation5_spill] sm:$0xff] }
 0x192   : > { %v2451_v60 = vsel %vm7945_vm14, %v2416_v57, %v2099_v13  ;;  %vm7956_vm14 = vcmp.ne.s16.totalorder %v4903_v34, 0 }
 0x194   : > { %v2046_v21 = vpop.permute.xlu0 %2045 }
 0x195   : > { %v2141_v15 = vpop.permute.xlu1 %2140  ;;  %v2414_v45 = vsel %vm2382_vm11, %v2379_v56, %v2046_v21  ;;  %vm7954_vm11 = vcmp.ne.s16.totalorder %v7953_v52, 0 }
 0x196   : > { %v2486_v51 = vsel %vm2452_vm2, %v2451_v60, %v2141_v15 }
 0x198   : > { %v2097_v63 = vpop.permute.xlu0 %2096 }
 0x199   : > { %v2225_v28 = vpop.permute.xlu1 %2224  ;;  %v2449_v39 = vsel %vm7948_vm12, %v2414_v45, %v2097_v63 }
 0x19a   : > { %v2521_v20 = vsel %vm2487_vm3, %v2486_v51, %v2225_v28  ;;  %v7951_v51 = vld [vmem:[#allocation4_spill] sm:$0xff] }
 0x19b   : > { %v2642_v2 = vshrl.u32 %v2521_v20, 16  ;;  %v2645_v61 = vshll.u32 %v2521_v20, 16  ;;  %vm7952_vm5 = vcmp.ne.s16.totalorder %v7951_v51, 0 }
 0x19c   : > { %v2139_v23 = vpop.permute.xlu0 %2138  ;;  %vm7957_vm12 = vmmov %vm7952_vm5 }
 0x19d   : > { %v2484_v27 = vsel %vm2452_vm2, %v2449_v39, %v2139_v23  ;;  %v2644_v54 = vrot.slane %v2642_v2, 7  ;;  %vm7950_vm2 = vmmov %vm7949_vm0 }
 0x19f   : > { %v2647_v24 = vor.u32 %v2645_v61, %v2644_v54 }
 0x1a0   : > { %v2223_v31 = vpop.permute.xlu0 %2222 }
 0x1a1   : > { %v2519_v62 = vsel %vm2487_vm3, %v2484_v27, %v2223_v31 }
 0x1a2   : > { %v2635_v3 = vshrl.u32 %v2519_v62, 16  ;;  %v2638_v55 = vshll.u32 %v2519_v62, 16  ;;  %v7959_v62 = vld [vmem:[#allocation7_spill] sm:$0xff] }
 0x1a3   : > { %v4643_v8 = vpop.f32.mrb[0].mxu0 }
 0x1a4   : > { %v2637_v5 = vrot.slane %v2635_v3, 7  ;;  %v2760_v14 = vadd.f32 %v4643_v8, %v6606_v7  ;;  %v2751_v30 = vpop.f32.mrb[1].mxu0 }
 0x1a5   : > { %v2752_v10 = vadd.f32 %v6606_v7, %v2751_v30  ;;  %v4644_v25 = vpop.f32.mrb[2].mxu0 }
 0x1a6   : > { %v2640_v0 = vor.u32 %v2638_v55, %v2637_v5  ;;  %v2763_v11 = vadd.f32 %v4644_v25, %v6606_v7  ;;  %v2754_v13 = vpop.f32.mrb[3].mxu0  ;;  %v2880_v15 = vmax.f32 %v2760_v14, 0.0  ;;  %v2648_v28 = vsel %vm1390_vm15, %v2637_v5, %v2647_v24 }
 0x1a7   : > { %v2755_v21 = vadd.f32 %v6606_v7, %v2754_v13  ;;  %v2878_v63 = vmax.f32 %v2752_v10, 0.0 }
 0x1a8   : > { %v2881_v35 = vmax.f32 %v2763_v11, 0.0  ;;  %v2641_v44 = vsel %vm1390_vm15, %v2630_v42, %v2640_v0 }
 0x1a9   : > { %v2879_v57 = vmax.f32 %v2755_v21, 0.0  ;;  %4669 = vmatprep.mubr.msk.bf16.mxu0 %vm7949_vm0, %v2641_v44  ;;  %vm7958_vm0 = vmmov %vm7955_vm1  ;;  %v7962_v21 = vld [vmem:[#allocation8_spill] sm:$0xff] }
 0x1aa   : > { %v2915_v22 = vpack.c.bf16 %v2881_v35, %v2880_v15  ;;  %4670 = vmatmul.mubr.msk.bf16.gmra.mrb[28].mxu0 %vm7950_vm2, %v2648_v28  ;;  %vm7960_vm2 = vcmp.ne.s16.totalorder %v7959_v62, 0 }
 0x1ab   : > { %v2914_v60 = vpack.c.bf16 %v2879_v57, %v2878_v63 }
 0x1ac   : > { %2931 = vst.msk [vmem:[#allocation3 + $0x18] sm:$0xff] %vm2277_vm7, %v2915_v22 }
 0x1ad   : > { %2930 = vst.msk [vmem:[#allocation3 + $0x10] sm:$0xff] %vm2277_vm7, %v2914_v60 }
 0x1b3   : > { %v6618_v43 = vld [vmem:[#allocation3 + $0x18] sm:$0xff] }
 0x1b4   : > { %v3038_v42 = vsel %vm7952_vm5, %v6618_v43, 0  ;;  %v3002_v20 = vsel %vm7954_vm11, %v6618_v43, 0  ;;  %v3035_v23 = vld [vmem:[#allocation3 + $0x10] sm:$0x80]  ;;  %v6633_v45 = vsel %vm7955_vm1, %v6618_v43, 0  ;;  %v3019_v3 = vsel %vm7960_vm2, %v6618_v43, 0  ;;  %vm7961_vm5 = vmmov %vm7960_vm2 }
 0x1b5   : > { %3513 = vrot.lane.b32.xlu0 %v3038_v42, %s4800_s15  ;;  %3338 = vrot.lane.b32.xlu1 %v3002_v20, %s4798_s30  ;;  %v6628_v56 = vld [vmem:[#allocation3 + $0x10] sm:$0xff]  ;;  %v3037_v39 = vsel %vm7956_vm14, %v3035_v23, 0  ;;  %v3604_v54 = vrot.slane %v6633_v45, 1  ;;  %v3088_v5 = vshll.u32 %v6618_v43, 16  ;;  %v3428_v55 = vrot.slane %v3019_v3, 1 }
 0x1b6   : > { %v3001_v2 = vsel %vm7957_vm12, %v6628_v56, 0  ;;  %v3018_v27 = vsel %vm7958_vm0, %v6628_v56, 0  ;;  %v3080_v31 = vshll.u32 %v6628_v56, 16  ;;  %v2982_v37 = vsel %vm7961_vm5, %v6628_v56, 0  ;;  %vm7966_vm12 = vmmov %vm7960_vm2 }
 0x1b7   : > { %v3427_v8 = vrot.slane %v3018_v27, 1  ;;  %v3084_v30 = vshrl.u32 %v6628_v56, 16  ;;  %v6659_v61 = vrot.slane %v3088_v5, 1  ;;  %v3251_v11 = vrot.slane %v2982_v37, 1 }
 0x1b8   : > { %v3082_v14 = vrot.slane %v3080_v31, 1  ;;  %vm7963_vm11 = vcmp.ne.s16.totalorder %v7962_v21, 0  ;;  %vm7964_vm1 = vcmp.ne.s16.totalorder %v5164_v17, 0  ;;  %vm7970_vm5 = vcmp.ne.s16.totalorder %v5202_v46, 0 }
 0x1b9   : > { %3511 = vrot.lane.b32.xlu0 %v3037_v39, %s4800_s15  ;;  %3336 = vrot.lane.b32.xlu1 %v3001_v2, %s4798_s30  ;;  %v3429_v25 = vsel %vm1804_vm8, %v3427_v8, %v3428_v55  ;;  %v2983_v15 = vsel %vm7963_vm11, %v6618_v43, 0  ;;  %v3252_v60 = vsel %vm1804_vm8, %v3250_v53, %v3251_v11  ;;  %vm7965_vm14 = vmmov %vm7963_vm11 }
 0x1ba   : > { %v3086_v0 = vor.u32 %v3084_v30, %v3082_v14  ;;  %v3253_v42 = vrot.slane %v2983_v15, 1  ;;  %vm7967_vm0 = vmmov %vm7963_vm11 }
 0x1bc   : > { %v3091_v22 = vsel %vm1051_vm6, %v3086_v0, %v6659_v61  ;;  %v3254_v3 = vsel %vm1804_vm8, %v3251_v11, %v3253_v42 }
 0x1bd   : > { %3637 = vrot.lane.b32.xlu0 %v3604_v54, %s4801_s16  ;;  %3460 = vrot.lane.b32.xlu1 %v3427_v8, %s4802_s17  ;;  %v3076_v8 = vshrl.u32 %v6477_v6, 16 }
 0x1bf   : > { %v3078_v40 = vor.u32 %v3076_v8, %v6486_v1 }
 0x1c0   : > { %v4647_v10 = vpop.f32.mrb[4].mxu0 }
 0x1c1   : > { %v2776_v13 = vadd.f32 %v4647_v10, %v6606_v7  ;;  %v2767_v24 = vpop.f32.mrb[5].mxu0  ;;  %3553 = vrot.lane.b32.xlu0 %v6659_v61, %s4803_s20  ;;  %3462 = vrot.lane.b32.xlu1 %v3429_v25, %s4802_s17  ;;  %v3083_v53 = vsel %vm1051_vm6, %v3078_v40, %v3082_v14 }
 0x1c2   : > { %v2768_v35 = vadd.f32 %v6606_v7, %v2767_v24  ;;  %v4648_v44 = vpop.f32.mrb[6].mxu0  ;;  %v4758_v24 = vld [vmem:[%s7737_s3] sm:$0xff]  }
 0x1c3   : > { %v2779_v63 = vadd.f32 %v4648_v44, %v6606_v7  ;;  %v2770_v57 = vpop.f32.mrb[7].mxu0  ;;  %v2884_v20 = vmax.f32 %v2776_v13, 0.0  ;;  %v7968_v13 = vld [vmem:[#allocation9_spill] sm:$0xff]  ;;  %4673 = vmatprep.subr.bf16.mxu1 %v4758_v24 }
 0x1c4   : > { %v2771_v28 = vadd.f32 %v6606_v7, %v2770_v57  ;;  %v2882_v39 = vmax.f32 %v2768_v35, 0.0  ;;  %vm7969_vm2 = vcmp.ne.s16.totalorder %v7968_v13, 0  ;;  %v7971_v35 = vld [vmem:[#allocation10_spill] sm:$0xff]  ;;  %4674 = vmatpush3.bf16.msra.mxu1 %v4758_v24 }
 0x1c5   : > { %v2885_v23 = vmax.f32 %v2779_v63, 0.0  ;;  %3203 = vrot.lane.b32.xlu1 %v3091_v22, %s4795_s27  ;;  %3285 = vrot.lane.b32.xlu0 %v3252_v60, %s4794_s26  ;;  %vm7972_vm11 = vcmp.ne.s16.totalorder %v7971_v35, 0  ;;  %v4759_v60 = vld [vmem:[%s7737_s3 + $0x8] sm:$0xff]  }
 0x1c6   : > { %v2883_v2 = vmax.f32 %v2771_v28, 0.0  ;;  %4675 = vmatprep.subr.bf16.mxu1 %v4759_v60 }
 0x1c7   : > { %v2917_v27 = vpack.c.bf16 %v2885_v23, %v2884_v20 }
 0x1c8   : > { %v2916_v31 = vpack.c.bf16 %v2883_v2, %v2882_v39  ;;  %v3092_v39 = vshrl.u32 %v6618_v43, 16  ;;  %4676 = vmatpush3.bf16.msra.mxu1 %v4759_v60 }
 0x1c9   : > { %2933 = vst.msk [vmem:[#allocation3 + $0x28] sm:$0xff] %vm2277_vm7, %v2917_v27  ;;  %3287 = vrot.lane.b32.xlu0 %v3254_v3, %s4794_s26 }
 0x1ca   : > { %2932 = vst.msk [vmem:[#allocation3 + $0x20] sm:$0xff] %vm2277_vm7, %v2916_v31 }
 0x1cd   : > { %3376 = vrot.lane.b32.xlu0 %v3082_v14, %s4799_s8 }
 0x1d0   : > { %v6687_v5 = vld [vmem:[#allocation3 + $0x28] sm:$0xff] }
 0x1d1   : > { %3201 = vrot.lane.b32.xlu0 %v3083_v53, %s4795_s27  ;;  %v3004_v6 = vsel %vm7964_vm1, %v6687_v5, 0  ;;  %v6693_v37 = vld [vmem:[#allocation3 + $0x20] sm:$0xff]  ;;  %v6705_v30 = vsel %vm7967_vm0, %v6687_v5, 0  ;;  %v3040_v21 = vsel %vm7970_vm5, %v6687_v5, 0  ;;  %v6728_v44 = vsel %vm7972_vm11, %v6687_v5, 0 }
 0x1d2   : > { %3342 = vrot.lane.b32.xlu1 %v3004_v6, %s4798_s30  ;;  %v3020_v1 = vsel %vm7965_vm14, %v6693_v37, 0  ;;  %v3056_v14 = vsel %vm7966_vm12, %v6693_v37, 0  ;;  %v3607_v11 = vrot.slane %v6705_v30, 1  ;;  %v2984_v62 = vsel %vm7969_vm2, %v6693_v37, 0  ;;  %vm7974_vm14 = vmmov %vm7970_vm5 }
 0x1d3   : > { %v3430_v10 = vrot.slane %v3020_v1, 1  ;;  %v3605_v0 = vrot.slane %v3056_v14, 1  ;;  %v3255_v15 = vrot.slane %v2984_v62, 1  ;;  %vm7973_vm1 = vcmp.ne.s16.totalorder %v7953_v52, 0  ;;  %vm7975_vm12 = vmmov %vm7969_vm2  ;;  %v4760_v14 = vld [vmem:[%s7737_s3 + $0x10] sm:$0xff]  }
 0x1d4   : > { %v3039_v63 = vsel %vm7973_vm1, %v6693_v37, 0  ;;  %v3257_v28 = vrot.slane %v6728_v44, 1  ;;  %v3003_v23 = vsel %vm7974_vm14, %v6693_v37, 0  ;;  %v3021_v3 = vsel %vm7975_vm12, %v6687_v5, 0  ;;  %4677 = vmatprep.subr.bf16.mxu1 %v4760_v14  ;;  %vm7977_vm5 = vmmov %vm7972_vm11 }
 0x1d5   : > { %3378 = vrot.lane.b32.xlu0 %v3091_v22, %s4799_s8  ;;  %v3431_v25 = vsel %vm1804_vm8, %v3428_v55, %v3430_v10  ;;  %v3608_v55 = vsel %vm1804_vm8, %v3605_v0, %v3607_v11  ;;  %v3256_v57 = vsel %vm1804_vm8, %v3253_v42, %v3255_v15  ;;  %v3096_v22 = vshll.u32 %v6693_v37, 16  ;;  %4678 = vmatpush3.bf16.msra.mxu1 %v4760_v14 }
 0x1d6   : > { %3464 = vrot.lane.b32.xlu1 %v3431_v25, %s4802_s17  ;;  %v3258_v27 = vsel %vm1804_vm8, %v3255_v15, %v3257_v28  ;;  %v3094_v1 = vor.u32 %v3092_v39, %v6659_v61  ;;  %v3606_v62 = vsel %vm1804_vm8, %v3604_v54, %v3605_v0  ;;  %v3432_v24 = vrot.slane %v3021_v3, 1  ;;  %v4761_v0 = vld [vmem:[%s7737_s3 + $0x18] sm:$0xff]  }
 0x1d7   : > { %v3098_v31 = vrot.slane %v3096_v22, 1  ;;  %v3100_v22 = vshrl.u32 %v6693_v37, 16  ;;  %v3104_v45 = vshll.u32 %v6687_v5, 16  ;;  %4679 = vmatprep.subr.bf16.mxu1 %v4761_v0  ;;  %vm4171_vm0 = vcmask 1043456  }
 0x1d8   : > { %v3433_v54 = vsel %vm1804_vm8, %v3430_v10, %v3432_v24  ;;  %vm7976_vm2 = vcmp.ne.s16.totalorder %v5333_v47, 0  ;;  %vm7978_vm11 = vcmp.ne.s16.totalorder %v5164_v17, 0  ;;  %vm7983_vm12 = vcmp.ne.s16.totalorder %v5375_v41, 0 }
 0x1d9   : > { %3517 = vrot.lane.b32.xlu0 %v3040_v21, %s4800_s15  ;;  %v3099_v15 = vsel %vm1051_vm6, %v3094_v1, %v3098_v31  ;;  %v3106_v10 = vrot.slane %v3104_v45, 1  ;;  %4680 = vmatpush3.bf16.msra.mxu1 %v4761_v0  ;;  %v7981_v1 = vld [vmem:[#allocation12_spill] sm:$0xff] }
 0x1da   : > { %3641 = vrot.lane.b32.xlu1 %v3608_v55, %s4801_s16  ;;  %vm7982_vm14 = vcmp.ne.s16.totalorder %v7981_v1, 0  ;;  %v6927_v1 = vpop.permute.xlu0 %3283 }
 0x1dd   : > { %3515 = vrot.lane.b32.xlu0 %v3039_v63, %s4800_s15 }
 0x1de   : > { %3289 = vrot.lane.b32.xlu1 %v3256_v57, %s4794_s26 }
 0x1e0   : > { %v4651_v20 = vpop.f32.mrb[8].mxu0 }
 0x1e1   : > { %v2792_v42 = vadd.f32 %v4651_v20, %v6606_v7  ;;  %v2783_v2 = vpop.f32.mrb[9].mxu0  ;;  %3340 = vrot.lane.b32.xlu0 %v3003_v23, %s4798_s30  ;;  %v3102_v20 = vor.u32 %v3100_v22, %v3098_v31  ;;  %v4762_v23 = vld [vmem:[%s7737_s3 + $0x20] ss:$0 sps:$4 sm:$0xff]   ;;  %v3108_v22 = vshrl.u32 %v6687_v5, 16 }
 0x1e2   : > { %v2784_v8 = vadd.f32 %v6606_v7, %v2783_v2  ;;  %v4652_v40 = vpop.f32.mrb[10].mxu0  ;;  %3291 = vrot.lane.b32.xlu1 %v3258_v27, %s4794_s26  ;;  %4716 = vmatprep.subr.msk.bf16.mxu1 %vm4171_vm0, %v4762_v23  ;;  %v4173_v39 = vsel %vm4171_vm0, %v4762_v23, 0  ;;  %vm7984_vm0 = vcmp.ne.s16.totalorder %v7968_v13, 0 }
 0x1e3   : > { %v2795_v53 = vadd.f32 %v4652_v40, %v6606_v7  ;;  %v2786_v6 = vpop.f32.mrb[11].mxu0  ;;  %v2888_v21 = vmax.f32 %v2792_v42, 0.0  ;;  %v3107_v42 = vsel %vm1051_vm6, %v3102_v20, %v3106_v10  ;;  %4682 = vmatpush3.bf16.msra.mxu1 %v4173_v39 }
 0x1e4   : > { %v2787_v25 = vadd.f32 %v6606_v7, %v2786_v6  ;;  %v2886_v63 = vmax.f32 %v2784_v8, 0.0 }
 0x1e5   : > { %v2889_v55 = vmax.f32 %v2795_v53, 0.0  ;;  %3639 = vrot.lane.b32.xlu0 %v3606_v62, %s4801_s16  ;;  %v7979_v53 = vld [vmem:[#allocation11_spill] sm:$0xff] }
 0x1e6   : > { %v2887_v61 = vmax.f32 %v2787_v25, 0.0  ;;  %3555 = vrot.lane.b32.xlu1 %v3099_v15, %s4803_s20  ;;  %vm7980_vm1 = vcmp.ne.s16.totalorder %v7979_v53, 0 }
 0x1e7   : > { %v2919_v57 = vpack.c.bf16 %v2889_v55, %v2888_v21 }
 0x1e8   : > { %v2918_v60 = vpack.c.bf16 %v2887_v61, %v2886_v63 }
 0x1e9   : > { %2935 = vst.msk [vmem:[#allocation3 + $0x38] sm:$0xff] %vm2277_vm7, %v2919_v57  ;;  %3466 = vrot.lane.b32.xlu0 %v3433_v54, %s4802_s17 }
 0x1ea   : > { %2934 = vst.msk [vmem:[#allocation3 + $0x30] sm:$0xff] %vm2277_vm7, %v2918_v60  ;;  %3205 = vrot.lane.b32.xlu1 %v3099_v15, %s4795_s27  ;;  %v3110_v60 = vor.u32 %v3108_v22, %v3106_v10 }
 0x1ed   : > { %3380 = vrot.lane.b32.xlu0 %v3099_v15, %s4799_s8 }
 0x1ee   : > { %3557 = vrot.lane.b32.xlu1 %v3107_v42, %s4803_s20 }
 0x1f0   : > { %v6783_v2 = vld [vmem:[#allocation3 + $0x38] sm:$0xff] }
 0x1f1   : > { %3207 = vrot.lane.b32.xlu0 %v3107_v42, %s4795_s27  ;;  %v3006_v27 = vsel %vm7976_vm2, %v6783_v2, 0  ;;  %v6789_v31 = vld [vmem:[#allocation3 + $0x30] sm:$0xff]  ;;  %v6806_v14 = vsel %vm7982_vm14, %v6783_v2, 0  ;;  %v3042_v25 = vsel %vm7983_vm12, %v6783_v2, 0  ;;  %vm7985_vm2 = vmmov %vm7983_vm12  ;;  %v6830_v13 = vsel %vm7977_vm5, %v6783_v2, 0 }
 0x1f2   : > { %3346 = vrot.lane.b32.xlu1 %v3006_v27, %s4798_s30  ;;  %v3022_v3 = vsel %vm7977_vm5, %v6789_v31, 0  ;;  %v3041_v8 = vsel %vm7978_vm11, %v6789_v31, 0  ;;  %v2986_v6 = vsel %vm7980_vm1, %v6789_v31, 0  ;;  %v3261_v55 = vrot.slane %v6806_v14, 1  ;;  %vm7986_vm11 = vmmov %vm7980_vm1 }
 0x1f3   : > { %v3434_v40 = vrot.slane %v3022_v3, 1  ;;  %v3259_v62 = vrot.slane %v2986_v6, 1  ;;  %v3058_v15 = vsel %vm7984_vm0, %v6789_v31, 0  ;;  %v3112_v63 = vshll.u32 %v6789_v31, 16 }
 0x1f4   : > { %v3005_v61 = vsel %vm7985_vm2, %v6789_v31, 0  ;;  %v3609_v57 = vrot.slane %v3058_v15, 1  ;;  %v3611_v20 = vrot.slane %v6830_v13, 1  ;;  %v3116_v30 = vshrl.u32 %v6789_v31, 16 }
 0x1f5   : > { %3382 = vrot.lane.b32.xlu0 %v3107_v42, %s4799_s8  ;;  %v3435_v21 = vsel %vm1804_vm8, %v3432_v24, %v3434_v40  ;;  %v3262_v24 = vsel %vm1804_vm8, %v3259_v62, %v3261_v55  ;;  %v3114_v45 = vrot.slane %v3112_v63, 1  ;;  %v3023_v15 = vsel %vm7986_vm11, %v6783_v2, 0 }
 0x1f6   : > { %3519 = vrot.lane.b32.xlu1 %v3041_v8, %s4800_s15  ;;  %v3610_v0 = vsel %vm1804_vm8, %v3607_v11, %v3609_v57  ;;  %v3120_v11 = vshll.u32 %v6783_v2, 16  ;;  %v3612_v8 = vsel %vm1804_vm8, %v3609_v57, %v3611_v20  ;;  %v3260_v57 = vsel %vm1804_vm8, %v3257_v28, %v3259_v62 }
 0x1f7   : > { %v3115_v5 = vsel %vm1051_vm6, %v3110_v60, %v3114_v45  ;;  %vm7987_vm1 = vcmp.ne.s16.totalorder %v5497_v38, 0  ;;  %vm7989_vm12 = vcmp.ne.s16.totalorder %v5333_v47, 0  ;;  %vm7994_vm5 = vcmp.ne.s16.totalorder %v5545_v4, 0 }
 0x1f8   : > { %v3122_v22 = vrot.slane %v3120_v11, 1  ;;  %v3124_v53 = vshrl.u32 %v6783_v2, 16 }
 0x1f9   : > { %3521 = vrot.lane.b32.xlu0 %v3042_v25, %s4800_s15 }
 0x1fa   : > { %3468 = vrot.lane.b32.xlu1 %v3435_v21, %s4802_s17  ;;  %v3118_v21 = vor.u32 %v3116_v30, %v3114_v45 }
 0x1fc   : > { %v3123_v45 = vsel %vm1051_vm6, %v3118_v21, %v3122_v22  ;;  %v6907_v21 = vpop.permute.xlu1 %3199 }
 0x1fd   : > { %3344 = vrot.lane.b32.xlu0 %v3005_v61, %s4798_s30 }
 0x1fe   : > { %3295 = vrot.lane.b32.xlu1 %v3262_v24, %s4794_s26 }
 0x200   : > { %v4655_v54 = vpop.f32.mrb[12].mxu0 }
 0x201   : > { %v2808_v23 = vadd.f32 %v4655_v54, %v6606_v7  ;;  %v2799_v39 = vpop.f32.mrb[13].mxu0  ;;  %3643 = vrot.lane.b32.xlu0 %v3610_v0, %s4801_s16  ;;  %v3436_v54 = vrot.slane %v3023_v15, 1 }
 0x202   : > { %v2800_v35 = vadd.f32 %v6606_v7, %v2799_v39  ;;  %v4656_v42 = vpop.f32.mrb[14].mxu0  ;;  %3384 = vrot.lane.b32.xlu1 %v3115_v5, %s4799_s8 }
 0x203   : > { %v2811_v10 = vadd.f32 %v4656_v42, %v6606_v7  ;;  %v2802_v27 = vpop.f32.mrb[15].mxu0  ;;  %v2892_v6 = vmax.f32 %v2808_v23, 0.0  ;;  %v3437_v0 = vsel %vm1804_vm8, %v3434_v40, %v3436_v54  ;;  %v7992_v42 = vld [vmem:[#allocation14_spill] sm:$0xff] }
 0x204   : > { %v2803_v3 = vadd.f32 %v6606_v7, %v2802_v27  ;;  %v2890_v63 = vmax.f32 %v2800_v35, 0.0  ;;  %vm7993_vm2 = vcmp.ne.s16.totalorder %v7992_v42, 0 }
 0x205   : > { %v2893_v25 = vmax.f32 %v2811_v10, 0.0  ;;  %3645 = vrot.lane.b32.xlu0 %v3612_v8, %s4801_s16 }
 0x206   : > { %v2891_v61 = vmax.f32 %v2803_v3, 0.0  ;;  %3209 = vrot.lane.b32.xlu1 %v3115_v5, %s4795_s27 }
 0x207   : > { %v2921_v24 = vpack.c.bf16 %v2893_v25, %v2892_v6 }
 0x208   : > { %v2920_v60 = vpack.c.bf16 %v2891_v61, %v2890_v63 }
 0x209   : > { %2937 = vst.msk [vmem:[#allocation3 + $0x48] sm:$0xff] %vm2277_vm7, %v2921_v24  ;;  %3293 = vrot.lane.b32.xlu0 %v3260_v57, %s4794_s26 }
 0x20a   : > { %2936 = vst.msk [vmem:[#allocation3 + $0x40] sm:$0xff] %vm2277_vm7, %v2920_v60  ;;  %3561 = vrot.lane.b32.xlu1 %v3123_v45, %s4803_s20  ;;  %v3126_v60 = vor.u32 %v3124_v53, %v3122_v22  ;;  %v6931_v22 = vpop.permute.xlu1 %3334 }
 0x20d   : > { %3470 = vrot.lane.b32.xlu0 %v3437_v0, %s4802_s17 }
 0x20e   : > { %3211 = vrot.lane.b32.xlu1 %v3123_v45, %s4795_s27 }
 0x210   : > { %v6865_v44 = vld [vmem:[#allocation3 + $0x48] sm:$0xff] }
 0x211   : > { %3559 = vrot.lane.b32.xlu0 %v3115_v5, %s4803_s20  ;;  %v3008_v28 = vsel %vm7987_vm1, %v6865_v44, 0  ;;  %v6871_v62 = vld [vmem:[#allocation3 + $0x40] sm:$0xff]  ;;  %v7990_v5 = vld [vmem:[#allocation13_spill] sm:$0xff]  ;;  %v6891_v10 = vsel %vm7993_vm2, %v6865_v44, 0  ;;  %v3044_v27 = vsel %vm7994_vm5, %v6865_v44, 0  ;;  %vm7995_vm1 = vmmov %vm7994_vm5  ;;  %v6917_v24 = vsel %vm7982_vm14, %v6865_v44, 0 }
 0x212   : > { %7988 = vst [vmem:[#allocation6_spill] sm:$0xff] %v6871_v62  ;;  %3350 = vrot.lane.b32.xlu1 %v3008_v28, %s4798_s30  ;;  %v6877_v40 = vsel %vm7982_vm14, %v6871_v62, 0  ;;  %v3043_v23 = vsel %vm7989_vm12, %v6871_v62, 0  ;;  %vm7991_vm0 = vcmp.ne.s16.totalorder %v7990_v5, 0  ;;  %v7809_v3 = vrot.slane %v6891_v10, 1  ;;  %vm8002_vm14 = vmmov %vm7993_vm2 }
 0x213   : > { %v3438_v39 = vrot.slane %v6877_v40, 1  ;;  %v2988_v35 = vsel %vm7991_vm0, %v6871_v62, 0  ;;  %v3060_v8 = vsel %vm7986_vm11, %v6871_v62, 0  ;;  %v3128_v6 = vshll.u32 %v6871_v62, 16  ;;  %vm7996_vm12 = vmmov %vm7991_vm0 }
 0x214   : > { %v3263_v30 = vrot.slane %v2988_v35, 1  ;;  %v3007_v25 = vsel %vm7995_vm1, %v6871_v62, 0  ;;  %v3613_v15 = vrot.slane %v3060_v8, 1  ;;  %v3132_v35 = vshrl.u32 %v6871_v62, 16  ;;  %vm7998_vm5 = vmmov %vm7996_vm12 }
 0x215   : > { %3386 = vrot.lane.b32.xlu0 %v3123_v45, %s4799_s8  ;;  %v3439_v11 = vsel %vm1804_vm8, %v3436_v54, %v3438_v39  ;;  %v3130_v61 = vrot.slane %v3128_v6, 1  ;;  %v3615_v45 = vrot.slane %v6917_v24, 1  ;;  %v3025_v53 = vsel %vm7996_vm12, %v6865_v44, 0 }
 0x216   : > { %3523 = vrot.lane.b32.xlu1 %v3043_v23, %s4800_s15  ;;  %v3266_v63 = vsel %vm1804_vm8, %v3263_v30, %v7809_v3  ;;  %v3614_v54 = vsel %vm1804_vm8, %v3611_v20, %v3613_v15  ;;  %vm7997_vm0 = vcmp.ne.s16.totalorder %v5497_v38, 0  ;;  %vm7999_vm11 = vcmp.ne.s16.totalorder %v5615_v19, 0 }
 0x217   : > { %v3131_v2 = vsel %vm1051_vm6, %v3126_v60, %v3130_v61  ;;  %v3616_v8 = vsel %vm1804_vm8, %v3613_v15, %v3615_v45  ;;  %v3264_v15 = vsel %vm1804_vm8, %v3261_v55, %v3263_v30  ;;  %vm8004_vm12 = vcmp.ne.s16.totalorder %v4903_v34, 0 }
 0x219   : > { %3525 = vrot.lane.b32.xlu0 %v3044_v27, %s4800_s15  ;;  %v3136_v27 = vshll.u32 %v6865_v44, 16 }
 0x21a   : > { %3472 = vrot.lane.b32.xlu1 %v3439_v11, %s4802_s17 }
 0x21d   : > { %3348 = vrot.lane.b32.xlu0 %v3007_v25, %s4798_s30 }
 0x21e   : > { %3299 = vrot.lane.b32.xlu1 %v3266_v63, %s4794_s26  ;;  %v3134_v63 = vor.u32 %v3132_v35, %v3130_v61  ;;  %v3440_v61 = vrot.slane %v3025_v53, 1 }
 0x220   : > { %v4659_v57 = vpop.f32.mrb[16].mxu0 }
 0x221   : > { %v2824_v0 = vadd.f32 %v4659_v57, %v6606_v7  ;;  %v2815_v28 = vpop.f32.mrb[17].mxu0  ;;  %3647 = vrot.lane.b32.xlu0 %v3614_v54, %s4801_s16 }
 0x222   : > { %v2816_v40 = vadd.f32 %v6606_v7, %v2815_v28  ;;  %v4660_v23 = vpop.f32.mrb[18].mxu0  ;;  %3388 = vrot.lane.b32.xlu1 %v3131_v2, %s4799_s8 }
 0x223   : > { %v2827_v13 = vadd.f32 %v4660_v23, %v6606_v7  ;;  %v2818_v20 = vpop.f32.mrb[19].mxu0  ;;  %v2896_v6 = vmax.f32 %v2824_v0, 0.0  ;;  %v3138_v23 = vrot.slane %v3136_v27, 1 }
 0x224   : > { %v2819_v11 = vadd.f32 %v6606_v7, %v2818_v20  ;;  %v2894_v60 = vmax.f32 %v2816_v40, 0.0 }
 0x225   : > { %v2897_v25 = vmax.f32 %v2827_v13, 0.0  ;;  %3649 = vrot.lane.b32.xlu0 %v3616_v8, %s4801_s16  ;;  %v3139_v0 = vsel %vm1051_vm6, %v3134_v63, %v3138_v23  ;;  %v3441_v13 = vsel %vm1804_vm8, %v3438_v39, %v3440_v61 }
 0x226   : > { %v2895_v57 = vmax.f32 %v2819_v11, 0.0  ;;  %3213 = vrot.lane.b32.xlu1 %v3131_v2, %s4795_s27 }
 0x227   : > { %v2923_v54 = vpack.c.bf16 %v2897_v25, %v2896_v6  ;;  %v6945_v28 = vpop.permute.xlu0 %3513  ;;  %v6947_v3 = vpop.permute.xlu1 %3338  ;;  %v8000_v25 = vld [vmem:[#allocation17_spill] sm:$0xff] }
 0x228   : > { %v2922_v20 = vpack.c.bf16 %v2895_v57, %v2894_v60  ;;  %vm8001_vm1 = vcmp.ne.s16.totalorder %v8000_v25, 0 }
 0x229   : > { %2939 = vst.msk [vmem:[#allocation3 + $0x58] sm:$0xff] %vm2277_vm7, %v2923_v54  ;;  %3297 = vrot.lane.b32.xlu0 %v3264_v15, %s4794_s26 }
 0x22a   : > { %2938 = vst.msk [vmem:[#allocation3 + $0x50] sm:$0xff] %vm2277_vm7, %v2922_v20  ;;  %3565 = vrot.lane.b32.xlu1 %v3139_v0, %s4803_s20 }
 0x22b   : > { %v6957_v40 = vpop.permute.xlu0 %3511  ;;  %v6961_v14 = vpop.permute.xlu1 %3336 }
 0x22d   : > { %3474 = vrot.lane.b32.xlu0 %v3441_v13, %s4802_s17 }
 0x22e   : > { %3215 = vrot.lane.b32.xlu1 %v3139_v0, %s4795_s27 }
 0x22f   : > { %v6964_v55 = vpop.permute.xlu0 %3637  ;;  %v6994_v53 = vpop.permute.xlu1 %3460 }
 0x230   : > { %v6966_v30 = vld [vmem:[#allocation3 + $0x58] sm:$0xff] }
 0x231   : > { %3563 = vrot.lane.b32.xlu0 %v3131_v2, %s4803_s20  ;;  %v6969_v35 = vld [vmem:[#allocation3 + $0x50] sm:$0xff]  ;;  %v6992_v63 = vsel %vm8001_vm1, %v6966_v30, 0  ;;  %v7003_v57 = vsel %vm8002_vm14, %v6966_v30, 0  ;;  %vm3824_vm1 = vcmask 326656   ;;  %vm8009_vm14 = vcmp.ne.s16.totalorder %v5698_v59, 0 }
 0x232   : > { %v3045_v27 = vsel %vm7997_vm0, %v6969_v35, 0  ;;  %v6977_v39 = vsel %vm7993_vm2, %v6969_v35, 0  ;;  %v3062_v11 = vsel %vm7998_vm5, %v6969_v35, 0  ;;  %v2990_v6 = vsel %vm7999_vm11, %v6969_v35, 0  ;;  %vm8007_vm5 = vmmov %vm7999_vm11 }
 0x233   : > { %v6982_v8 = vpop.permute.xlu0 %3553  ;;  %3527 = vrot.lane.b32.xlu1 %v3045_v27, %s4800_s15  ;;  %v7810_v2 = vrot.slane %v6977_v39, 1  ;;  %v3617_v60 = vrot.slane %v3062_v11, 1  ;;  %v3267_v54 = vrot.slane %v2990_v6, 1  ;;  %v7811_v20 = vrot.slane %v6992_v63, 1  ;;  %v7015_v42 = vpop.permute.xlu1 %3462 }
 0x234   : > { %v3144_v15 = vshll.u32 %v6969_v35, 16  ;;  %v3140_v11 = vshrl.u32 %v6865_v44, 16  ;;  %v3148_v38 = vshrl.u32 %v6969_v35, 16  ;;  %vm8005_vm0 = vcmp.ne.s16.totalorder %v7951_v51, 0 }
 0x235   : > { %3390 = vrot.lane.b32.xlu0 %v3139_v0, %s4799_s8  ;;  %v3443_v5 = vsel %vm1804_vm8, %v3440_v61, %v7810_v2  ;;  %v3618_v0 = vsel %vm1804_vm8, %v3615_v45, %v3617_v60  ;;  %v7815_v61 = vrot.slane %v7003_v57, 1  ;;  %v3270_v27 = vsel %vm1804_vm8, %v3267_v54, %v7811_v20  ;;  %v2946_v2 = vld [vmem:[#allocation3] sm:$0x80] }
 0x236   : > { %v3146_v6 = vrot.slane %v3144_v15, 1  ;;  %v3142_v45 = vor.u32 %v3140_v11, %v3138_v23  ;;  %v8003_v15 = vrot.slane %v6891_v10, 1  ;;  %vm8006_vm2 = vcmp.ne.s16.totalorder %v5759_v49, 0 }
 0x237   : > { %3476 = vrot.lane.b32.xlu1 %v3443_v5, %s4802_s17  ;;  %v7008_v13 = vpop.permute.xlu0 %3285  ;;  %v3620_v24 = vsel %vm1804_vm8, %v3617_v60, %v7815_v61  ;;  %v7030_v29 = vpop.permute.xlu1 %3203  ;;  %v3152_v60 = vshll.u32 %v6966_v30, 16  ;;  %vm8008_vm11 = vcmask 195584  }
 0x238   : > { %v3150_v62 = vor.u32 %v3148_v38, %v3146_v6 }
 0x239   : > { %3651 = vrot.lane.b32.xlu0 %v3618_v0, %s4801_s16  ;;  %v3147_v0 = vsel %vm1051_vm6, %v3142_v45, %v3146_v6  ;;  %v4776_v6 = vld [vmem:[#allocation3 + $0x8] sm:$0xff] }
 0x23b   : > { %3303 = vrot.lane.b32.xlu1 %v3270_v27, %s4794_s26  ;;  %v7022_v5 = vpop.permute.xlu0 %3287  ;;  %v3268_v27 = vsel %vm1804_vm8, %v8003_v15, %v3267_v54 }
 0x23d   : > { %3653 = vrot.lane.b32.xlu0 %v3620_v24, %s4801_s16  ;;  %v2963_v24 = vsel %vm8004_vm12, %v2946_v2, 0  ;;  %vm3859_vm12 = vcmask 392192  }
 0x23f   : > { %3392 = vrot.lane.b32.xlu1 %v3147_v0, %s4799_s8  ;;  %v3377_v20 = vpop.permute.xlu0 %3376 }
 0x240   : > { %v4663_v44 = vpop.f32.mrb[20].mxu0 }
 0x241   : > { %v2840_v23 = vadd.f32 %v4663_v44, %v6606_v7  ;;  %v2831_v11 = vpop.f32.mrb[21].mxu0  ;;  %3301 = vrot.lane.b32.xlu0 %v3268_v27, %s4794_s26  ;;  %v3154_v44 = vrot.slane %v3152_v60, 1  ;;  %v3673_v27 = vsel %vm2277_vm7, %v2963_v24, %v6907_v21 }
 0x242   : > { %v2832_v45 = vadd.f32 %v6606_v7, %v2831_v11  ;;  %v4664_v61 = vpop.f32.mrb[22].mxu0  ;;  %v3723_v60 = vsel %vm2347_vm9, %v3673_v27, %v6927_v1 }
 0x243   : > { %v2843_v10 = vadd.f32 %v4664_v61, %v6606_v7  ;;  %v2834_v4 = vpop.f32.mrb[23].mxu0  ;;  %3217 = vrot.lane.b32.xlu1 %v3147_v0, %s4795_s27  ;;  %v3202_v54 = vpop.permute.xlu0 %3201  ;;  %v2900_v34 = vmax.f32 %v2840_v23, 0.0  ;;  %v2964_v61 = vsel %vm8005_vm0, %v4776_v6, 0  ;;  %v3155_v16 = vsel %vm1051_vm6, %v3150_v62, %v3154_v44  ;;  %vm8010_vm0 = vmmov %vm8008_vm11 }
 0x244   : > { %v2835_v15 = vadd.f32 %v6606_v7, %v2834_v4  ;;  %v7045_v18 = vpop.permute.xlu1 %3342  ;;  %v2898_v11 = vmax.f32 %v2832_v45, 0.0  ;;  %v3676_v51 = vsel %vm2277_vm7, %v2964_v61, %v3202_v54  ;;  %v3027_v62 = vsel %vm8007_vm5, %v6966_v30, 0 }
 0x245   : > { %v2901_v2 = vmax.f32 %v2843_v10, 0.0  ;;  %3567 = vrot.lane.b32.xlu0 %v3147_v0, %s4803_s20  ;;  %v3009_v0 = vsel %vm8006_vm2, %v6969_v35, 0  ;;  %v3757_v1 = vsel %vm8008_vm11, %v3723_v60, %v6931_v22  ;;  %v3725_v45 = vsel %vm2347_vm9, %v3676_v51, %v7008_v13 }
 0x246   : > { %v2899_v38 = vmax.f32 %v2835_v15, 0.0  ;;  %v3444_v54 = vrot.slane %v3027_v62, 1  ;;  %v3010_v15 = vsel %vm8009_vm14, %v6966_v30, 0  ;;  %v3759_v27 = vsel %vm8010_vm0, %v3725_v45, %v6961_v14 }
 0x247   : > { %v2925_v12 = vpack.c.bf16 %v2901_v2, %v2900_v34  ;;  %3569 = vrot.lane.b32.xlu1 %v3155_v16, %s4803_s20  ;;  %v3379_v4 = vpop.permute.xlu0 %3378  ;;  %v8011_v34 = vrot.slane %v6977_v39, 1  ;;  %vm3894_vm2 = vcmask 457728   ;;  %vm8012_vm5 = vcmp.ne.s16.totalorder %v8000_v25, 0 }
 0x248   : > { %v2924_v21 = vpack.c.bf16 %v2899_v38, %v2898_v11  ;;  %v7056_v23 = vpop.permute.xlu1 %3464  ;;  %v3793_v14 = vsel %vm2487_vm3, %v3759_v27, %v3379_v4  ;;  %v3156_v11 = vshrl.u32 %v6966_v30, 16  ;;  %vm8013_vm11 = vcmp.ne.s16.totalorder %v5759_v49, 0 }
 0x249   : > { %2941 = vst.msk [vmem:[#allocation3 + $0x68] sm:$0xff] %vm2277_vm7, %v2925_v12  ;;  %3352 = vrot.lane.b32.xlu0 %v3009_v0, %s4798_s30  ;;  %v3791_v12 = vsel %vm2487_vm3, %v3757_v1, %v3377_v20  ;;  %v3046_v60 = vsel %vm8013_vm11, %v6966_v30, 0  ;;  %v3828_v4 = vsel %vm3824_vm1, %v3793_v14, %v7015_v42  ;;  %vm3929_vm14 = vcmask 523264  }
 0x24a   : > { %2940 = vst.msk [vmem:[#allocation3 + $0x60] sm:$0xff] %vm2277_vm7, %v2924_v21  ;;  %v3826_v22 = vsel %vm3824_vm1, %v3791_v12, %v6994_v53  ;;  %vm8014_vm0 = vcmp.ne.s16.totalorder %v5615_v19, 0  ;;  %v3863_v12 = vsel %vm3859_vm12, %v3828_v4, %v6945_v28  ;;  %vm8016_vm11 = vcmp.ne.s16.totalorder %v8000_v25, 0 }
 0x24b   : > { %3219 = vrot.lane.b32.xlu1 %v3155_v16, %s4795_s27  ;;  %v7071_v24 = vpop.permute.xlu0 %3517  ;;  %v3861_v53 = vsel %vm3859_vm12, %v3826_v22, %v6957_v40  ;;  %v3158_v40 = vor.u32 %v3156_v11, %v3154_v44 }
 0x24c   : > { %v7076_v10 = vpop.permute.xlu1 %3641  ;;  %v3896_v51 = vsel %vm3894_vm2, %v3861_v53, %v6982_v8  ;;  %v8017_v53 = vrot.slane %v7003_v57, 1 }
 0x24d   : > { %3394 = vrot.lane.b32.xlu0 %v3155_v16, %s4799_s8  ;;  %v3445_v16 = vsel %vm1804_vm8, %v8011_v34, %v3444_v54  ;;  %v3931_v45 = vsel %vm3929_vm14, %v3896_v51, %v6964_v55 }
 0x24e   : > { %v3980_v25 = vshrl.u32 %v3931_v45, 16 }
 0x24f   : > { %3354 = vrot.lane.b32.xlu1 %v3010_v15, %s4798_s30  ;;  %v7087_v20 = vpop.permute.xlu0 %3515 }
 0x250   : > { %v7089_v13 = vpop.permute.xlu1 %3289  ;;  %v7126_v44 = vld [vmem:[#allocation3 + $0x68] sm:$0xff]  ;;  %v3982_v51 = vrot.slane %v3980_v25, 7 }
 0x251   : > { %3478 = vrot.lane.b32.xlu0 %v3445_v16, %s4802_s17  ;;  %v7095_v2 = vld [vmem:[#allocation3 + $0x60] sm:$0xff]  ;;  %v7143_v22 = vsel %vm8016_vm11, %v7126_v44, 0  ;;  %vm8020_vm11 = vcmask 195584  }
 0x252   : > { %v3160_v38 = vshll.u32 %v7095_v2, 16  ;;  %v7107_v39 = vsel %vm8012_vm5, %v7095_v2, 0  ;;  %v3064_v0 = vsel %vm8014_vm0, %v7095_v2, 0  ;;  %vm8015_vm5 = vcmp.ne.s16.totalorder %v7953_v52, 0 }
 0x253   : > { %v7102_v6 = vpop.permute.xlu0 %3340  ;;  %v3446_v30 = vrot.slane %v7107_v39, 1  ;;  %v3621_v19 = vrot.slane %v3064_v0, 1  ;;  %v2965_v8 = vsel %vm8015_vm5, %v6628_v56, 0  ;;  %v3623_v14 = vrot.slane %v7143_v22, 1  ;;  %v4777_v22 = vld [vmem:[%s7736_s2] ss:$0 sm:$0xff] }
 0x254   : > { %v7109_v61 = vpop.permute.xlu1 %3291  ;;  %v3162_v21 = vrot.slane %v3160_v38, 1  ;;  %v3679_v28 = vsel %vm2277_vm7, %v2965_v8, %v7030_v29  ;;  %v3164_v11 = vshrl.u32 %v7095_v2, 16  ;;  %vm8018_vm0 = vcmp.ne.s16.totalorder %v5874_v48, 0 }
 0x255   : > { %3529 = vrot.lane.b32.xlu0 %v3046_v60, %s4800_s15  ;;  %v3447_v52 = vsel %vm1804_vm8, %v3444_v54, %v3446_v30  ;;  %v3727_v56 = vsel %vm2347_vm9, %v3679_v28, %v7022_v5  ;;  %v3622_v29 = vsel %vm1804_vm8, %v8017_v53, %v3621_v19  ;;  %v3168_v54 = vshll.u32 %v7126_v44, 16 }
 0x256   : > { %v7123_v62 = vsel %vm1051_vm6, %v3158_v40, %v3162_v21  ;;  %v7168_v60 = vsel %vm8018_vm0, %v7095_v2, 0  ;;  %vm8019_vm5 = vcmp.ne.s16.totalorder %v5698_v59, 0  ;;  %v3166_v40 = vor.u32 %v3164_v11, %v3162_v21 }
 0x257   : > { %3396 = vrot.lane.b32.xlu1 %v7123_v62, %s4799_s8  ;;  %v3640_v42 = vpop.permute.xlu0 %3639  ;;  %v3047_v57 = vsel %vm8019_vm5, %v7095_v2, 0  ;;  %v3761_v0 = vsel %vm8020_vm11, %v3727_v56, %v6947_v3  ;;  %v3624_v8 = vsel %vm1804_vm8, %v3621_v19, %v3623_v14  ;;  %v3271_v21 = vrot.slane %v7168_v60, 1 }
 0x258   : > { %v3556_v1 = vpop.permute.xlu1 %3555  ;;  %v8021_v60 = vrot.slane %v6992_v63, 1  ;;  %vm8022_vm0 = vcmp.ne.s16.totalorder %v5877_v36, 0  ;;  %vm8023_vm5 = vcmp.ne.s16.totalorder %v6029_v26, 0  ;;  %vm8024_vm11 = vcmp.ne.s16.totalorder %v5874_v48, 0 }
 0x259   : > { %v3898_v15 = vsel %vm3894_vm2, %v3863_v12, %v3556_v1  ;;  %3571 = vrot.lane.b32.xlu0 %v7123_v62, %s4803_s20  ;;  %v7213_v63 = vsel %vm8022_vm0, %v7126_v44, 0  ;;  %vm8025_vm0 = vcmp.ne.s16.totalorder %v5164_v17, 0 }
 0x25a   : > { %v3933_v27 = vsel %vm3929_vm14, %v3898_v15, %v3640_v42  ;;  %v7180_v15 = vrot.slane %v3168_v54, 1 }
 0x25b   : > { %v3983_v55 = vshrl.u32 %v3933_v27, 16  ;;  %3480 = vrot.lane.b32.xlu1 %v3447_v52, %s4802_s17  ;;  %v7154_v34 = vpop.permute.xlu0 %3466  ;;  %v3986_v5 = vshll.u32 %v3933_v27, 16 }
 0x25c   : > { %v7156_v16 = vpop.permute.xlu1 %3205  ;;  %v3171_v25 = vsel %vm1051_vm6, %v3166_v40, %v7180_v15 }
 0x25d   : > { %v3985_v38 = vrot.slane %v3983_v55, 7  ;;  %3655 = vrot.lane.b32.xlu0 %v3622_v29, %s4801_s16 }
 0x25f   : > { %3531 = vrot.lane.b32.xlu1 %v3047_v57, %s4800_s15  ;;  %v3381_v4 = vpop.permute.xlu0 %3380  ;;  %v3988_v42 = vor.u32 %v3986_v5, %v3985_v38  ;;  %v3272_v57 = vsel %vm1804_vm8, %v8021_v60, %v3271_v21 }
 0x260   : > { %v3795_v1 = vsel %vm2487_vm3, %v3761_v0, %v3381_v4  ;;  %v4667_v12 = vpop.f32.mrb[24].mxu0  ;;  %v3558_v45 = vpop.permute.xlu1 %3557 }
 0x261   : > { %v3830_v28 = vsel %vm3824_vm1, %v3795_v1, %v7056_v23  ;;  %v2856_v3 = vadd.f32 %v4667_v12, %v6606_v7  ;;  %v2847_v27 = vpop.f32.mrb[25].mxu0  ;;  %3657 = vrot.lane.b32.xlu0 %v3624_v8, %s4801_s16  ;;  %v3989_v52 = vsel %vm1390_vm15, %v3982_v51, %v3988_v42 }
 0x262   : > { %v3865_v56 = vsel %vm3859_vm12, %v3830_v28, %v7087_v20  ;;  %v2848_v55 = vadd.f32 %v6606_v7, %v2847_v27  ;;  %v4668_v19 = vpop.f32.mrb[26].mxu0  ;;  %4683 = vmatprep.mubr.msk.bf16.mxu1 %vm7825_vm10, %v3989_v52  ;;  %v3011_v28 = vsel %vm8023_vm5, %v7095_v2, 0  ;;  %v3273_v27 = vrot.slane %v7213_v63, 1 }
 0x263   : > { %v3900_v23 = vsel %vm3894_vm2, %v3865_v56, %v3558_v45  ;;  %v2859_v53 = vadd.f32 %v4668_v19, %v6606_v7  ;;  %v2850_v29 = vpop.f32.mrb[27].mxu0  ;;  %3573 = vrot.lane.b32.xlu1 %v3171_v25, %s4803_s20  ;;  %v3208_v11 = vpop.permute.xlu0 %3207  ;;  %v2904_v40 = vmax.f32 %v2856_v3, 0.0  ;;  %vm8026_vm5 = vcmp.ne.s16.totalorder %v5969_v32, 0 }
 0x264   : > { %v3935_v54 = vsel %vm3929_vm14, %v3900_v23, %v7076_v10  ;;  %v2851_v20 = vadd.f32 %v6606_v7, %v2850_v29  ;;  %v7200_v5 = vpop.permute.xlu1 %3346  ;;  %v2902_v51 = vmax.f32 %v2848_v55, 0.0  ;;  %v2967_v23 = vsel %vm8025_vm0, %v6693_v37, 0 }
 0x265   : > { %v3990_v4 = vshrl.u32 %v3935_v54, 16  ;;  %v2905_v0 = vmax.f32 %v2859_v53, 0.0  ;;  %3305 = vrot.lane.b32.xlu0 %v3272_v57, %s4794_s26  ;;  %v3993_v12 = vshll.u32 %v3935_v54, 16  ;;  %v3274_v53 = vsel %vm1804_vm8, %v3271_v21, %v3273_v27 }
 0x266   : > { %v2903_v42 = vmax.f32 %v2851_v20, 0.0  ;;  %v3685_v29 = vsel %vm2277_vm7, %v2967_v23, %v3208_v11  ;;  %v3012_v21 = vsel %vm8026_vm5, %v7126_v44, 0  ;;  %v3172_v11 = vshrl.u32 %v7126_v44, 16 }
 0x267   : > { %v7206_v1 = vrot.slane %v3990_v4, 7  ;;  %v2927_v45 = vpack.c.bf16 %v2905_v0, %v2904_v40  ;;  %3221 = vrot.lane.b32.xlu1 %v7123_v62, %s4795_s27  ;;  %v3383_v7 = vpop.permute.xlu0 %3382  ;;  %v3029_v62 = vsel %vm8024_vm11, %v7126_v44, 0  ;;  %v3731_v37 = vsel %vm2347_vm9, %v3685_v29, %v7109_v61 }
 0x268   : > { %v2926_v10 = vpack.c.bf16 %v2903_v42, %v2902_v51  ;;  %v3520_v8 = vpop.permute.xlu1 %3519  ;;  %v3448_v19 = vrot.slane %v3029_v62, 1  ;;  %vm8027_vm11 = vcmp.ne.s16.totalorder %v5202_v46, 0  ;;  %vm8028_vm0 = vcmp.ne.s16.totalorder %v5877_v36, 0 }
 0x269   : > { %v3995_v3 = vor.u32 %v3993_v12, %v7206_v1  ;;  %2943 = vst.msk [vmem:[#allocation3 + $0x78] sm:$0xff] %vm2277_vm7, %v2927_v45  ;;  %3356 = vrot.lane.b32.xlu0 %v3011_v28, %s4798_s30  ;;  %v2966_v39 = vsel %vm8027_vm11, %v6618_v43, 0  ;;  %vm8029_vm5 = vcmp.ne.s16.totalorder %v6029_v26, 0  ;;  %v3174_v46 = vor.u32 %v3172_v11, %v7180_v15 }
 0x26a   : > { %2942 = vst.msk [vmem:[#allocation3 + $0x70] sm:$0xff] %vm2277_vm7, %v2926_v10  ;;  %v3682_v60 = vsel %vm2277_vm7, %v2966_v39, %v7156_v16  ;;  %v3048_v40 = vsel %vm8029_vm5, %v7126_v44, 0  ;;  %vm8030_vm11 = vcmask 195584   ;;  %vm8032_vm5 = vcmp.ne.s16.totalorder %v5877_v36, 0 }
 0x26b   : > { %3223 = vrot.lane.b32.xlu1 %v3171_v25, %s4795_s27  ;;  %v7227_v52 = vpop.permute.xlu0 %3521  ;;  %v3996_v56 = vsel %vm1390_vm15, %v3985_v38, %v3995_v3  ;;  %v3765_v4 = vsel %vm8030_vm11, %v3731_v37, %v7045_v18  ;;  %v3729_v15 = vsel %vm2347_vm9, %v3682_v60, %v7089_v13 }
 0x26c   : > { %v3469_v55 = vpop.permute.xlu1 %3468  ;;  %4684 = vmatmul.mubr.msk.bf16.vlgmr.msra.gmra.mrb[0].mxu1 %vm7825_vm10, %v3996_v56  ;;  %v3763_v13 = vsel %vm8030_vm11, %v3729_v15, %v7102_v6  ;;  %vm8035_vm11 = vcmp.ne.s16.totalorder %v6116_v9, 0 }
 0x26d   : > { %3398 = vrot.lane.b32.xlu0 %v3171_v25, %s4799_s8  ;;  %v3449_v25 = vsel %vm1804_vm8, %v3446_v30, %v3448_v19  ;;  %v3797_v62 = vsel %vm2487_vm3, %v3763_v13, %v3383_v7 }
 0x26f   : > { %3307 = vrot.lane.b32.xlu1 %v3274_v53, %s4794_s26  ;;  %v7240_v54 = vpop.permute.xlu0 %3344 }
 0x270   : > { %v7242_v38 = vpop.permute.xlu1 %3295  ;;  %v7285_v12 = vld [vmem:[#allocation3 + $0x78] sm:$0xff] }
 0x271   : > { %3482 = vrot.lane.b32.xlu0 %v3449_v25, %s4802_s17  ;;  %v7248_v17 = vld [vmem:[#allocation3 + $0x70] sm:$0xff]  ;;  %v7299_v28 = vsel %vm8032_vm5, %v7285_v12, 0  ;;  %vm8034_vm5 = vcmp.ne.s16.totalorder %v5969_v32, 0  ;;  %v7366_v63 = vsel %vm8035_vm11, %v7285_v12, 0  ;;  %vm8038_vm11 = vcmp.ne.s16.totalorder %v5333_v47, 0 }
 0x272   : > { %v3176_v20 = vshll.u32 %v7248_v17, 16  ;;  %v7266_v61 = vsel %vm8028_vm0, %v7248_v17, 0  ;;  %vm8031_vm0 = vcmp.ne.s16.totalorder %v5874_v48, 0  ;;  %v3627_v6 = vrot.slane %v7299_v28, 1 }
 0x273   : > { %3358 = vrot.lane.b32.xlu1 %v3012_v21, %s4798_s30  ;;  %v7261_v30 = vpop.permute.xlu0 %3643  ;;  %v3066_v0 = vsel %vm8031_vm0, %v7248_v17, 0  ;;  %v3450_v42 = vrot.slane %v7266_v61, 1  ;;  %v3180_v29 = vshrl.u32 %v7248_v17, 16  ;;  %vm8033_vm0 = vcmp.ne.s16.totalorder %v6104_v58, 0 }
 0x274   : > { %v3385_v57 = vpop.permute.xlu1 %3384  ;;  %v3178_v43 = vrot.slane %v3176_v20, 1  ;;  %v3625_v48 = vrot.slane %v3066_v0, 1  ;;  %v7322_v25 = vsel %vm8033_vm0, %v7248_v17, 0  ;;  %v3049_v21 = vsel %vm8034_vm5, %v7248_v17, 0 }
 0x275   : > { %3533 = vrot.lane.b32.xlu0 %v3048_v40, %s4800_s15  ;;  %v3799_v51 = vsel %vm2487_vm3, %v3765_v4, %v3385_v57  ;;  %v3451_v3 = vsel %vm1804_vm8, %v3448_v19, %v3450_v42  ;;  %v3832_v20 = vsel %vm3824_vm1, %v3797_v62, %v7154_v34  ;;  %vm8036_vm0 = vcmp.ne.s16.totalorder %v6243_v50, 0 }
 0x276   : > { %v7282_v16 = vsel %vm1051_vm6, %v3174_v46, %v3178_v43  ;;  %v3834_v10 = vsel %vm3824_vm1, %v3799_v51, %v3469_v55  ;;  %v3184_v55 = vshll.u32 %v7285_v12, 16  ;;  %v3626_v53 = vsel %vm1804_vm8, %v3623_v14, %v3625_v48 }
 0x277   : > { %3400 = vrot.lane.b32.xlu1 %v7282_v16, %s4799_s8  ;;  %v3646_v18 = vpop.permute.xlu0 %3645  ;;  %v3869_v36 = vsel %vm3859_vm12, %v3834_v10, %v3520_v8  ;;  %v3182_v11 = vor.u32 %v3180_v29, %v3178_v43  ;;  %v3628_v15 = vsel %vm1804_vm8, %v3625_v48, %v3627_v6  ;;  %v3275_v43 = vrot.slane %v7322_v25, 1 }
 0x278   : > { %v7291_v45 = vpop.permute.xlu1 %3209  ;;  %v7336_v40 = vrot.slane %v3184_v55, 1  ;;  %v3867_v55 = vsel %vm3859_vm12, %v3832_v20, %v7071_v24  ;;  %vm8037_vm5 = vcmp.ne.s16.totalorder %v6104_v58, 0 }
 0x279   : > { %3575 = vrot.lane.b32.xlu0 %v7282_v16, %s4803_s20 }
 0x27a   : > { %v3187_v13 = vsel %vm1051_vm6, %v3182_v11, %v7336_v40 }
 0x27b   : > { %3484 = vrot.lane.b32.xlu1 %v3451_v3, %s4802_s17  ;;  %v7308_v56 = vpop.permute.xlu0 %3293 }
 0x27c   : > { %v3562_v23 = vpop.permute.xlu1 %3561 }
 0x27d   : > { %v3904_v19 = vsel %vm3894_vm2, %v3869_v36, %v3562_v23  ;;  %v4671_v7 = vpop.f32.mrb[28].mxu0  ;;  %3659 = vrot.lane.b32.xlu0 %v3626_v53, %s4801_s16 }
 0x27e   : > { %v3939_v8 = vsel %vm3929_vm14, %v3904_v19, %v3646_v18  ;;  %v2872_v14 = vadd.f32 %v4777_v22, %v4671_v7  ;;  %v2863_v37 = vpop.f32.mrb[29].mxu0  ;;  %v3276_v19 = vsel %vm1804_vm8, %v3273_v27, %v3275_v43 }
 0x27f   : > { %v2864_v39 = vadd.f32 %v4777_v22, %v2863_v37  ;;  %v4672_v60 = vpop.f32.mrb[30].mxu0  ;;  %3535 = vrot.lane.b32.xlu1 %v3049_v21, %s4800_s15  ;;  %v7334_v57 = vpop.permute.xlu0 %3470  ;;  %v4004_v46 = vshrl.u32 %v3939_v8, 16 }
 0x280   : > { %v2875_v4 = vadd.f32 %v4777_v22, %v4672_v60  ;;  %v2866_v0 = vpop.f32.mrb[31].mxu0  ;;  %v3212_v51 = vpop.permute.xlu1 %3211  ;;  %v2908_v34 = vmax.f32 %v2872_v14, 0.0 }
 0x281   : > { %v2867_v18 = vadd.f32 %v4777_v22, %v2866_v0  ;;  %3661 = vrot.lane.b32.xlu0 %v3628_v15, %s4801_s16  ;;  %v2906_v3 = vmax.f32 %v2864_v39, 0.0  ;;  %v7348_v36 = vrot.slane %v4004_v46, 7  ;;  %v4007_v22 = vshll.u32 %v3939_v8, 16 }
 0x282   : > { %v2909_v10 = vmax.f32 %v2875_v4, 0.0  ;;  %v3013_v8 = vsel %vm8036_vm0, %v7248_v17, 0  ;;  %v3277_v39 = vrot.slane %v7366_v63, 1  ;;  %v2969_v15 = vsel %vm8038_vm11, %v6789_v31, 0 }
 0x283   : > { %v2907_v62 = vmax.f32 %v2867_v18, 0.0  ;;  %3577 = vrot.lane.b32.xlu1 %v3187_v13, %s4803_s20  ;;  %v3560_v23 = vpop.permute.xlu0 %3559  ;;  %v4009_v27 = vor.u32 %v4007_v22, %v7348_v36  ;;  %vm8039_vm0 = vcmp.ne.s16.totalorder %v6116_v9, 0  ;;  %vm8041_vm11 = vcmp.ne.s16.totalorder %v5375_v41, 0 }
 0x284   : > { %v2929_v48 = vpack.c.bf16 %v2909_v10, %v2908_v34  ;;  %v3902_v53 = vsel %vm3894_vm2, %v3867_v55, %v3560_v23  ;;  %v7351_v29 = vpop.permute.xlu1 %3350  ;;  %v3278_v18 = vsel %vm1804_vm8, %v3275_v43, %v3277_v39  ;;  %v3691_v10 = vsel %vm2277_vm7, %v2969_v15, %v3212_v51 }
 0x285   : > { %v2928_v7 = vpack.c.bf16 %v2907_v62, %v2906_v3  ;;  %v3937_v25 = vsel %vm3929_vm14, %v3902_v53, %v7261_v30  ;;  %3309 = vrot.lane.b32.xlu0 %v3276_v19, %s4794_s26  ;;  %v3735_v31 = vsel %vm2347_vm9, %v3691_v10, %v7242_v38  ;;  %v3014_v51 = vsel %vm1193_vm13, %v7285_v12, 0 }
 0x286   : > { %2945 = vst.msk [vmem:[#allocation3 + $0x88] sm:$0xff] %vm2277_vm7, %v2929_v48  ;;  %v3997_v24 = vshrl.u32 %v3937_v25, 16  ;;  %v4000_v37 = vshll.u32 %v3937_v25, 16  ;;  %v3188_v43 = vshrl.u32 %v7285_v12, 16  ;;  %v4778_v48 = vld [vmem:[#allocation3 + $0x28] sm:$0xff] }
 0x287   : > { %2944 = vst.msk [vmem:[#allocation3 + $0x80] sm:$0xff] %vm2277_vm7, %v2928_v7  ;;  %3225 = vrot.lane.b32.xlu1 %v7282_v16, %s4795_s27  ;;  %v3387_v14 = vpop.permute.xlu0 %3386  ;;  %v3031_v16 = vsel %vm8037_vm5, %v7285_v12, 0  ;;  %vm8040_vm5 = vcmp.ne.s16.totalorder %v6243_v50, 0  ;;  %v2968_v53 = vsel %vm8041_vm11, %v4778_v48, 0 }
 0x288   : > { %v3999_v30 = vrot.slane %v3997_v24, 7  ;;  %v3524_v21 = vpop.permute.xlu1 %3523  ;;  %v3452_v0 = vrot.slane %v3031_v16, 1  ;;  %v3050_v38 = vsel %vm8040_vm5, %v7285_v12, 0  ;;  %v3190_v23 = vor.u32 %v3188_v43, %v7336_v40 }
 0x289   : > { %3360 = vrot.lane.b32.xlu0 %v3013_v8, %s4798_s30  ;;  %v3688_v25 = vsel %vm2277_vm7, %v2968_v53, %v7291_v45  ;;  %vm8045_vm5 = vcmask 195584  }
 0x28a   : > { %v4002_v11 = vor.u32 %v4000_v37, %v3999_v30  ;;  %v4010_v20 = vsel %vm1390_vm15, %v3999_v30, %v4009_v27  ;;  %v3453_v47 = vsel %vm1804_vm8, %v3450_v42, %v3452_v0 }
 0x28b   : > { %3227 = vrot.lane.b32.xlu1 %v3187_v13, %s4795_s27  ;;  %v7379_v60 = vpop.permute.xlu0 %3525 }
 0x28c   : > { %v3473_v46 = vpop.permute.xlu1 %3472  ;;  %v4003_v4 = vsel %vm1390_vm15, %v7206_v1, %v4002_v11 }
 0x28d   : > { %3402 = vrot.lane.b32.xlu0 %v3187_v13, %s4799_s8  ;;  %4687 = vmatprep.mubr.msk.bf16.mxu1 %vm7825_vm10, %v4003_v4  ;;  %v7434_v41 = vld [vmem:[#allocation3 + $0x88] sm:$0xff] }
 0x28e   : > { %4688 = vmatmul.mubr.msk.bf16.gmra.mrb[4].mxu1 %vm7825_vm10, %v4010_v20  ;;  %v7392_v34 = vld [vmem:[#allocation3 + $0x80] sm:$0xff]  ;;  %vm8042_vm10 = vcmask 195584   ;;  %v3369_v20 = vshll.u32 %v7434_v41, 16 }
 0x28f   : > { %3311 = vrot.lane.b32.xlu1 %v3278_v18, %s4794_s26  ;;  %v7396_v1 = vpop.permute.xlu0 %3348  ;;  %v3192_v13 = vshll.u32 %v7392_v34, 16  ;;  %v7415_v61 = vsel %vm8039_vm0, %v7392_v34, 0  ;;  %v3769_v19 = vsel %vm8042_vm10, %v3735_v31, %v7200_v5  ;;  %vm8043_vm0 = vcmp.ne.s16.totalorder %v6104_v58, 0 }
 0x290   : > { %v7399_v3 = vpop.permute.xlu1 %3299  ;;  %v3068_v7 = vsel %vm8043_vm0, %v7392_v34, 0  ;;  %v3454_v24 = vrot.slane %v7415_v61, 1  ;;  %v3733_v5 = vsel %vm2347_vm9, %v3688_v25, %v7308_v56  ;;  %vm8044_vm10 = vcmp.ne.s16.totalorder %v6116_v9, 0 }
 0x291   : > { %3486 = vrot.lane.b32.xlu0 %v3453_v47, %s4802_s17  ;;  %v3194_v62 = vrot.slane %v3192_v13, 1  ;;  %v3629_v58 = vrot.slane %v3068_v7, 1  ;;  %v7446_v45 = vsel %vm8044_vm10, %v7434_v41, 0  ;;  %v3767_v8 = vsel %vm8045_vm5, %v3733_v5, %v7240_v54 }
 0x292   : > { %v3455_v56 = vsel %vm1804_vm8, %v3452_v0, %v3454_v24  ;;  %v3801_v16 = vsel %vm2487_vm3, %v3767_v8, %v3387_v14  ;;  %v3631_v54 = vrot.slane %v7446_v45, 1  ;;  %v3196_v15 = vshrl.u32 %v7392_v34, 16  ;;  %v8046_v14 = vld [vmem:[#allocation19_spill] sm:$0xff] }
 0x293   : > { %3362 = vrot.lane.b32.xlu1 %v3014_v51, %s4798_s30  ;;  %v3648_v55 = vpop.permute.xlu0 %3647  ;;  %v3195_v40 = vsel %vm1051_vm6, %v3190_v23, %v3194_v62  ;;  %v3630_v9 = vsel %vm1804_vm8, %v3627_v6, %v3629_v58  ;;  %vm8047_vm11 = vcmp.ne.s16.totalorder %v8046_v14, 0  ;;  %v3051_v28 = vsel %vm1193_vm13, %v7392_v34, 0 }
 0x294   : > { %v3389_v42 = vpop.permute.xlu1 %3388  ;;  %v2996_v18 = vsel %vm8047_vm11, %v7392_v34, 0  ;;  %v3836_v6 = vsel %vm3824_vm1, %v3801_v16, %v7334_v57  ;;  %v3632_v51 = vsel %vm1804_vm8, %v3629_v58, %v3631_v54  ;;  %v7479_v43 = vrot.slane %v3369_v20, 1  ;;  %vm8051_vm10 = vmmov %vm8047_vm11 }
 0x295   : > { %3537 = vrot.lane.b32.xlu0 %v3050_v38, %s4800_s15  ;;  %v3803_v22 = vsel %vm2487_vm3, %v3769_v19, %v3389_v42  ;;  %v3279_v42 = vrot.slane %v2996_v18, 1  ;;  %v3871_v57 = vsel %vm3859_vm12, %v3836_v6, %v7227_v52  ;;  %v2980_v19 = vld [vmem:[#allocation3 + $0x88] sm:$0x1]  ;;  %v3033_v16 = vsel %vm8051_vm10, %v7434_v41, 0  ;;  %v8055_v18 = vld [vmem:[#allocation15_spill] sm:$0xff] }
 0x296   : > { %v3838_v37 = vsel %vm3824_vm1, %v3803_v22, %v3473_v46  ;;  %vm8056_vm11 = vcmp.ne.s16.totalorder %v8055_v18, 0 }
 0x297   : > { %3404 = vrot.lane.b32.xlu1 %v3195_v40, %s4799_s8  ;;  %v3650_v27 = vpop.permute.xlu0 %3649  ;;  %v3873_v46 = vsel %vm3859_vm12, %v3838_v37, %v3524_v21  ;;  %v3198_v21 = vor.u32 %v3196_v15, %v3194_v62  ;;  %v3280_v53 = vsel %vm1804_vm8, %v3277_v39, %v3279_v42 }
 0x298   : > { %v7439_v30 = vpop.permute.xlu1 %3213 }
 0x299   : > { %3579 = vrot.lane.b32.xlu0 %v3195_v40, %s4803_s20  ;;  %v3372_v62 = vsel %vm1051_vm6, %v3198_v21, %v7479_v43 }
 0x29b   : > { %3488 = vrot.lane.b32.xlu1 %v3455_v56, %s4802_s17  ;;  %v3298_v11 = vpop.permute.xlu0 %3297 }
 0x29c   : > { %v3566_v4 = vpop.permute.xlu1 %3565 }
 0x29d   : > { %v3908_v0 = vsel %vm3894_vm2, %v3873_v46, %v3566_v4  ;;  %3663 = vrot.lane.b32.xlu0 %v3630_v9, %s4801_s16  ;;  %v4779_v4 = vld [vmem:[#allocation3 + $0x38] sm:$0xff]  ;;  %v8052_v9 = vld [vmem:[#allocation16_spill] sm:$0xff] }
 0x29e   : > { %v3943_v10 = vsel %vm3929_vm14, %v3908_v0, %v3650_v27  ;;  %v8048_v27 = vld [vmem:[#allocation18_spill] sm:$0xff]  ;;  %vm8053_vm5 = vcmp.ne.s16.totalorder %v8052_v9, 0 }
 0x29f   : > { %3539 = vrot.lane.b32.xlu1 %v3051_v28, %s4800_s15  ;;  %v7474_v13 = vpop.permute.xlu0 %3474  ;;  %v4018_v47 = vshrl.u32 %v3943_v10, 16  ;;  %v4021_v22 = vshll.u32 %v3943_v10, 16  ;;  %vm8049_vm0 = vcmp.ne.s16.totalorder %v8048_v27, 0  ;;  %v2970_v15 = vsel %vm8053_vm5, %v4779_v4, 0  ;;  %v8054_v0 = vld [vmem:[#allocation6_spill] sm:$0xff] }
 0x2a0   : > { %v3216_v31 = vpop.permute.xlu1 %3215  ;;  %v2997_v58 = vsel %vm8049_vm0, %v2980_v19, 0  ;;  %v2971_v10 = vsel %vm8056_vm11, %v8054_v0, 0  ;;  %v3694_v6 = vsel %vm2277_vm7, %v2970_v15, %v7439_v30  ;;  %vm8057_vm0 = vcmask 588800   ;;  %v3017_v19 = vld [vmem:[#allocation3 + $0x90] sm:$0x1] }
 0x2a1   : > { %3665 = vrot.lane.b32.xlu0 %v3632_v51, %s4801_s16  ;;  %v7487_v23 = vrot.slane %v4018_v47, 7  ;;  %v3281_v46 = vrot.slane %v2997_v58, 1  ;;  %v3697_v47 = vsel %vm2277_vm7, %v2971_v10, %v3216_v31  ;;  %vm8058_vm10 = vmmov %vm8057_vm0  ;;  %vm8059_vm5 = vcmask 195584  }
 0x2a2   : > { %v3739_v30 = vsel %vm2347_vm9, %v3697_v47, %v7399_v3  ;;  %vm8060_vm11 = vmmov %vm8059_vm5 }
 0x2a3   : > { %3581 = vrot.lane.b32.xlu1 %v3372_v62, %s4803_s20  ;;  %v3564_v38 = vpop.permute.xlu0 %3563  ;;  %v4023_v37 = vor.u32 %v4021_v22, %v7487_v23  ;;  %v3773_v3 = vsel %vm8060_vm11, %v3739_v30, %v7351_v29  ;;  %v3052_v29 = vsel %vm1194_vm4, %v7434_v41, 0 }
 0x2a4   : > { %v3906_v48 = vsel %vm3894_vm2, %v3871_v57, %v3564_v38  ;;  %v3456_v57 = vrot.slane %v3033_v16, 1  ;;  %v3737_v38 = vsel %vm2347_vm9, %v3694_v6, %v3298_v11 }
 0x2a5   : > { %v3941_v7 = vsel %vm3929_vm14, %v3906_v48, %v3648_v55  ;;  %v7494_v25 = vpop.permute.xlu1 %3527  ;;  %3313 = vrot.lane.b32.xlu0 %v3280_v53, %s4794_s26  ;;  %v3015_v55 = vsel %vm1194_vm4, %v7392_v34, 0  ;;  %v3771_v11 = vsel %vm8059_vm5, %v3737_v38, %v7396_v1  ;;  %v3373_v1 = vshrl.u32 %v7434_v41, 16 }
 0x2a6   : > { %v4011_v5 = vshrl.u32 %v3941_v7, 16  ;;  %v4014_v8 = vshll.u32 %v3941_v7, 16  ;;  %vm8064_vm5 = vcmp.ne.s16.totalorder %v8046_v14, 0 }
 0x2a7   : > { %3229 = vrot.lane.b32.xlu1 %v3195_v40, %s4795_s27  ;;  %v3391_v52 = vpop.permute.xlu0 %3390 }
 0x2a8   : > { %v4013_v63 = vrot.slane %v4011_v5, 7  ;;  %v3805_v7 = vsel %vm2487_vm3, %v3771_v11, %v3391_v52 }
 0x2a9   : > { %v3477_v56 = vpop.permute.xlu1 %3476  ;;  %3364 = vrot.lane.b32.xlu0 %v3015_v55, %s4798_s30  ;;  %v3840_v58 = vsel %vm3824_vm1, %v3805_v7, %v7474_v13 }
 0x2aa   : > { %v4016_v40 = vor.u32 %v4014_v8, %v4013_v63  ;;  %v4024_v20 = vsel %vm1390_vm15, %v4013_v63, %v4023_v37  ;;  %v3375_v37 = vor.u32 %v3373_v1, %v7479_v43  ;;  %v3875_v13 = vsel %vm3859_vm12, %v3840_v58, %v7379_v60  ;;  %v3054_v60 = vld [vmem:[#allocation3 + $0x98] sm:$0x1] }
 0x2ab   : > { %3231 = vrot.lane.b32.xlu1 %v3198_v21, %s4795_s27  ;;  %v3652_v28 = vpop.permute.xlu0 %3651  ;;  %v3282_v21 = vsel %vm1804_vm8, %v3279_v42, %v3281_v46  ;;  %v8061_v42 = vld [vmem:[#allocation20_spill] sm:$0xff] }
 0x2ac   : > { %v4017_v51 = vsel %vm1390_vm15, %v7348_v36, %v4016_v40  ;;  %v3036_v36 = vld [vmem:[#allocation3 + $0x90] sm:$0xff] }
 0x2ad   : > { %v7521_v48 = vpop.permute.xlu1 %3303  ;;  %3406 = vrot.lane.b32.xlu0 %v3372_v62, %s4799_s8  ;;  %4691 = vmatprep.mubr.msk.bf16.mxu1 %vm8057_vm0, %v4017_v51  ;;  %v3457_v62 = vsel %vm1804_vm8, %v3454_v24, %v3456_v57  ;;  %v3546_v53 = vshll.u32 %v3036_v36, 16  ;;  %vm8062_vm0 = vcmp.ne.s16.totalorder %v8061_v42, 0  ;;  %v3070_v55 = vsel %vm8064_vm5, %v3036_v36, 0 }
 0x2ae   : > { %4692 = vmatmul.mubr.msk.bf16.gmra.mrb[8].mxu1 %vm8058_vm10, %v4024_v20  ;;  %v3016_v5 = vsel %vm8062_vm0, %v7434_v41, 0  ;;  %vm8063_vm10 = vcmp.ne.s16.totalorder %v8048_v27, 0  ;;  %v3633_v46 = vrot.slane %v3070_v55, 1  ;;  %v3550_v6 = vshrl.u32 %v3036_v36, 16 }
 0x2af   : > { %3315 = vrot.lane.b32.xlu1 %v3282_v21, %s4794_s26  ;;  %v3654_v31 = vpop.permute.xlu0 %3653  ;;  %v3034_v52 = vsel %vm8063_vm10, %v3017_v19, 0  ;;  %v3548_v63 = vrot.slane %v3546_v53, 1  ;;  %vm8066_vm11 = vmmov %vm8063_vm10  ;;  %vm8069_vm5 = vcmp.ne.s16.totalorder %v5759_v49, 0 }
 0x2b0   : > { %v3458_v40 = vrot.slane %v3034_v52, 1  ;;  %v3634_v38 = vsel %vm1804_vm8, %v3631_v54, %v3633_v46 }
 0x2b1   : > { %v3393_v22 = vpop.permute.xlu1 %3392  ;;  %3490 = vrot.lane.b32.xlu0 %v3457_v62, %s4802_s17  ;;  %v3549_v43 = vsel %vm1051_vm6, %v3375_v37, %v3548_v63  ;;  %vm8065_vm6 = vmmov %vm8062_vm0  ;;  %vm8067_vm0 = vcmask 588800  }
 0x2b2   : > { %v3807_v61 = vsel %vm2487_vm3, %v3773_v3, %v3393_v22  ;;  %v3459_v0 = vsel %vm1804_vm8, %v3456_v57, %v3458_v40  ;;  %v3071_v57 = vsel %vm8066_vm11, %v3054_v60, 0  ;;  %vm8068_vm10 = vmmov %vm8067_vm0  ;;  %v4780_v3 = vld [vmem:[#allocation3 + $0x48] sm:$0xff] }
 0x2b3   : > { %3366 = vrot.lane.b32.xlu1 %v3016_v5, %s4798_s30  ;;  %v3302_v24 = vpop.permute.xlu0 %3301  ;;  %v3842_v16 = vsel %vm3824_vm1, %v3807_v61, %v3477_v56  ;;  %v3635_v45 = vrot.slane %v3071_v57, 1  ;;  %v2972_v5 = vsel %vm8069_vm5, %v4780_v3, 0  ;;  %vm8074_vm5 = vcmp.ne.s16.totalorder %v6029_v26, 0  ;;  %s4594_s30 = sshll.u32 %s8088_s19, 3 }
 0x2b4   : > { %v3877_v14 = vsel %vm3859_vm12, %v3842_v16, %v7494_v25  ;;  %s224_s13 = scalar_lea.vmem %s7739_s5, %s4594_s30 }
 0x2b5   : > { %v3218_v8 = vpop.permute.xlu1 %3217  ;;  %3541 = vrot.lane.b32.xlu0 %v3052_v29, %s4800_s15  ;;  %v3636_v7 = vsel %vm1804_vm8, %v3633_v46, %v3635_v45  ;;  %vm8071_vm8 = vcmp.ne.s16.totalorder %v5698_v59, 0 }
 0x2b6   : > { %v3700_v1 = vsel %vm2277_vm7, %v2972_v5, %v3218_v8 }
 0x2b7   : > { %3408 = vrot.lane.b32.xlu1 %v3375_v37, %s4799_s8  ;;  %v3568_v20 = vpop.permute.xlu0 %3567  ;;  %v3741_v52 = vsel %vm2347_vm9, %v3700_v1, %v3302_v24 }
 0x2b8   : > { %v3910_v41 = vsel %vm3894_vm2, %v3875_v13, %v3568_v20 }
 0x2b9   : > { %v3945_v4 = vsel %vm3929_vm14, %v3910_v41, %v3652_v28  ;;  %v3570_v9 = vpop.permute.xlu1 %3569  ;;  %3583 = vrot.lane.b32.xlu0 %v3549_v43, %s4803_s20  ;;  %v3053_v28 = vsel %vm8065_vm6, %v3036_v36, 0  ;;  %v3552_v36 = vor.u32 %v3550_v6, %v3548_v63  ;;  %vm8070_vm6 = vcmask 195584  }
 0x2ba   : > { %v4025_v56 = vshrl.u32 %v3945_v4, 16  ;;  %v3912_v15 = vsel %vm3894_vm2, %v3877_v14, %v3570_v9  ;;  %v4028_v25 = vshll.u32 %v3945_v4, 16  ;;  %v2973_v63 = vsel %vm8071_vm8, %v6969_v35, 0  ;;  %vm8072_vm11 = vmmov %vm8070_vm6 }
 0x2bb   : > { %v3947_v18 = vsel %vm3929_vm14, %v3912_v15, %v3654_v31  ;;  %3492 = vrot.lane.b32.xlu1 %v3459_v0, %s4802_s17  ;;  %v3353_v10 = vpop.permute.xlu0 %3352  ;;  %vm8075_vm8 = vcmp.ne.s16.totalorder %v5969_v32, 0 }
 0x2bc   : > { %v4027_v47 = vrot.slane %v4025_v56, 7  ;;  %v4032_v51 = vshrl.u32 %v3947_v18, 16  ;;  %v4035_v31 = vshll.u32 %v3947_v18, 16  ;;  %v3775_v58 = vsel %vm8070_vm6, %v3741_v52, %v3353_v10 }
 0x2bd   : > { %3667 = vrot.lane.b32.xlu0 %v3634_v38, %s4801_s16  ;;  %v3220_v11 = vpop.permute.xlu1 %3219  ;;  %v2975_v26 = vsel %vm8075_vm8, %v7095_v2, 0  ;;  %vm8079_vm8 = vmmov %vm8070_vm6 }
 0x2be   : > { %v4030_v21 = vor.u32 %v4028_v25, %v4027_v47  ;;  %v4034_v30 = vrot.slane %v4032_v51, 7  ;;  %v3703_v8 = vsel %vm2277_vm7, %v2973_v63, %v3220_v11 }
 0x2bf   : > { %3543 = vrot.lane.b32.xlu1 %v3053_v28, %s4800_s15  ;;  %v3395_v62 = vpop.permute.xlu0 %3394  ;;  %v3743_v20 = vsel %vm2347_vm9, %v3703_v8, %v7521_v48 }
 0x2c0   : > { %v4037_v53 = vor.u32 %v4035_v31, %v4034_v30  ;;  %v4031_v19 = vsel %vm1390_vm15, %v7487_v23, %v4030_v21  ;;  %v3809_v37 = vsel %vm2487_vm3, %v3775_v58, %v3395_v62 }
 0x2c1   : > { %4695 = vmatprep.mubr.msk.bf16.mxu1 %vm8067_vm0, %v4031_v19  ;;  %v3355_v22 = vpop.permute.xlu1 %3354 }
 0x2c2   : > { %v4038_v54 = vsel %vm1390_vm15, %v4027_v47, %v4037_v53  ;;  %v3777_v59 = vsel %vm8072_vm11, %v3743_v20, %v3355_v22  ;;  %vm8076_vm11 = vmmov %vm8070_vm6 }
 0x2c3   : > { %3585 = vrot.lane.b32.xlu1 %v3552_v36, %s4803_s20  ;;  %v3479_v27 = vpop.permute.xlu0 %3478  ;;  %4696 = vmatmul.mubr.msk.bf16.gmra.mrb[12].mxu1 %vm8068_vm10, %v4038_v54  ;;  %vm8073_vm10 = vmmov %vm8067_vm0  ;;  %v4781_v36 = vld [vmem:[#allocation3 + $0x58] sm:$0xff] }
 0x2c4   : > { %v3844_v49 = vsel %vm3824_vm1, %v3809_v37, %v3479_v27 }
 0x2c7   : > { %3669 = vrot.lane.b32.xlu1 %v3636_v7, %s4801_s16  ;;  %v3530_v23 = vpop.permute.xlu0 %3529 }
 0x2c8   : > { %v3879_v16 = vsel %vm3859_vm12, %v3844_v49, %v3530_v23 }
 0x2c9   : > { %v3397_v61 = vpop.permute.xlu1 %3396 }
 0x2ca   : > { %v3811_v35 = vsel %vm2487_vm3, %v3777_v59, %v3397_v61 }
 0x2cb   : > { %v3572_v29 = vpop.permute.xlu0 %3571 }
 0x2cc   : > { %v3914_v40 = vsel %vm3894_vm2, %v3879_v16, %v3572_v29 }
 0x2cd   : > { %v3481_v55 = vpop.permute.xlu1 %3480 }
 0x2ce   : > { %v3846_v9 = vsel %vm3824_vm1, %v3811_v35, %v3481_v55 }
 0x2cf   : > { %v3656_v13 = vpop.permute.xlu0 %3655 }
 0x2d0   : > { %v3949_v24 = vsel %vm3929_vm14, %v3914_v40, %v3656_v13 }
 0x2d1   : > { %v4039_v41 = vshrl.u32 %v3949_v24, 16  ;;  %v3532_v43 = vpop.permute.xlu1 %3531  ;;  %v4042_v4 = vshll.u32 %v3949_v24, 16 }
 0x2d2   : > { %v3881_v15 = vsel %vm3859_vm12, %v3846_v9, %v3532_v43 }
 0x2d3   : > { %v4041_v46 = vrot.slane %v4039_v41, 7  ;;  %v3658_v14 = vpop.permute.xlu0 %3657 }
 0x2d5   : > { %v4044_v56 = vor.u32 %v4042_v4, %v4041_v46  ;;  %v3574_v0 = vpop.permute.xlu1 %3573 }
 0x2d6   : > { %v3916_v60 = vsel %vm3894_vm2, %v3881_v15, %v3574_v0 }
 0x2d7   : > { %v3951_v18 = vsel %vm3929_vm14, %v3916_v60, %v3658_v14  ;;  %v3306_v48 = vpop.permute.xlu0 %3305  ;;  %v4045_v10 = vsel %vm1390_vm15, %v4034_v30, %v4044_v56  ;;  %v2974_v30 = vsel %vm8074_vm5, %v4781_v36, 0  ;;  %vm8078_vm5 = vcmp.ne.s16.totalorder %v6243_v50, 0 }
 0x2d8   : > { %v4046_v28 = vshrl.u32 %v3951_v18, 16  ;;  %4699 = vmatprep.mubr.msk.bf16.mxu1 %vm8067_vm0, %v4045_v10  ;;  %v4049_v25 = vshll.u32 %v3951_v18, 16  ;;  %v2977_v50 = vsel %vm1193_vm13, %v7248_v17, 0  ;;  %vm8080_vm13 = vmmov %vm8067_vm0 }
 0x2d9   : > { %v3222_v6 = vpop.permute.xlu1 %3221 }
 0x2da   : > { %v4048_v47 = vrot.slane %v4046_v28, 7  ;;  %v3706_v53 = vsel %vm2277_vm7, %v2974_v30, %v3222_v6  ;;  %v2976_v28 = vsel %vm8078_vm5, %v7126_v44, 0 }
 0x2db   : > { %v3357_v51 = vpop.permute.xlu0 %3356  ;;  %v3745_v54 = vsel %vm2347_vm9, %v3706_v53, %v3306_v48 }
 0x2dc   : > { %v4051_v38 = vor.u32 %v4049_v25, %v4048_v47  ;;  %v3779_v7 = vsel %vm8070_vm6, %v3745_v54, %v3357_v51 }
 0x2dd   : > { %v3224_v57 = vpop.permute.xlu1 %3223 }
 0x2de   : > { %v4052_v21 = vsel %vm1390_vm15, %v4041_v46, %v4051_v38  ;;  %v3709_v58 = vsel %vm2277_vm7, %v2975_v26, %v3224_v57 }
 0x2df   : > { %v3399_v31 = vpop.permute.xlu0 %3398  ;;  %4700 = vmatmul.mubr.msk.bf16.gmra.mrb[16].mxu1 %vm8073_vm10, %v4052_v21  ;;  %vm8077_vm10 = vmmov %vm8067_vm0 }
 0x2e0   : > { %v3813_v3 = vsel %vm2487_vm3, %v3779_v7, %v3399_v31 }
 0x2e1   : > { %v3308_v11 = vpop.permute.xlu1 %3307 }
 0x2e2   : > { %v3747_v37 = vsel %vm2347_vm9, %v3709_v58, %v3308_v11 }
 0x2e3   : > { %v3483_v62 = vpop.permute.xlu0 %3482 }
 0x2e4   : > { %v3848_v5 = vsel %vm3824_vm1, %v3813_v3, %v3483_v62 }
 0x2e5   : > { %v3359_v19 = vpop.permute.xlu1 %3358 }
 0x2e6   : > { %v3781_v55 = vsel %vm8076_vm11, %v3747_v37, %v3359_v19  ;;  %vm8081_vm11 = vmmov %vm8067_vm0 }
 0x2e7   : > { %v3534_v45 = vpop.permute.xlu0 %3533  ;;  %vm8085_vm5 = vmmov %vm8081_vm11 }
 0x2e8   : > { %v3883_v23 = vsel %vm3859_vm12, %v3848_v5, %v3534_v45 }
 0x2e9   : > { %v3401_v27 = vpop.permute.xlu1 %3400 }
 0x2ea   : > { %v3815_v8 = vsel %vm2487_vm3, %v3781_v55, %v3401_v27 }
 0x2eb   : > { %v3576_v22 = vpop.permute.xlu0 %3575 }
 0x2ec   : > { %v3918_v61 = vsel %vm3894_vm2, %v3883_v23, %v3576_v22 }
 0x2ed   : > { %v3485_v1 = vpop.permute.xlu1 %3484 }
 0x2ee   : > { %v3850_v32 = vsel %vm3824_vm1, %v3815_v8, %v3485_v1 }
 0x2ef   : > { %v3660_v52 = vpop.permute.xlu0 %3659 }
 0x2f0   : > { %v3953_v29 = vsel %vm3929_vm14, %v3918_v61, %v3660_v52 }
 0x2f1   : > { %v4053_v63 = vshrl.u32 %v3953_v29, 16  ;;  %v3536_v49 = vpop.permute.xlu1 %3535  ;;  %v4056_v40 = vshll.u32 %v3953_v29, 16 }
 0x2f2   : > { %v3885_v24 = vsel %vm3859_vm12, %v3850_v32, %v3536_v49 }
 0x2f3   : > { %v4055_v16 = vrot.slane %v4053_v63, 7  ;;  %v3662_v13 = vpop.permute.xlu0 %3661 }
 0x2f5   : > { %v4058_v2 = vor.u32 %v4056_v40, %v4055_v16  ;;  %v3578_v20 = vpop.permute.xlu1 %3577 }
 0x2f6   : > { %v3920_v41 = vsel %vm3894_vm2, %v3885_v24, %v3578_v20  ;;  %v2978_v20 = vsel %vm1194_vm4, %v7285_v12, 0  ;;  %vm8083_vm4 = vcmp.ne.s16.totalorder %v8061_v42, 0 }
 0x2f7   : > { %v3955_v43 = vsel %vm3929_vm14, %v3920_v41, %v3662_v13  ;;  %v3310_v59 = vpop.permute.xlu0 %3309  ;;  %v4059_v35 = vsel %vm1390_vm15, %v4048_v47, %v4058_v2 }
 0x2f8   : > { %v4060_v46 = vshrl.u32 %v3955_v43, 16  ;;  %4703 = vmatprep.mubr.msk.bf16.mxu1 %vm8067_vm0, %v4059_v35  ;;  %v4063_v9 = vshll.u32 %v3955_v43, 16  ;;  %vm8082_vm0 = vmmov %vm8070_vm6 }
 0x2f9   : > { %v3226_v4 = vpop.permute.xlu1 %3225 }
 0x2fa   : > { %v4062_v14 = vrot.slane %v4060_v46, 7  ;;  %v3712_v6 = vsel %vm2277_vm7, %v2976_v28, %v3226_v4 }
 0x2fb   : > { %v3361_v56 = vpop.permute.xlu0 %3360  ;;  %v3749_v51 = vsel %vm2347_vm9, %v3712_v6, %v3310_v59 }
 0x2fc   : > { %v4065_v15 = vor.u32 %v4063_v9, %v4062_v14  ;;  %v3783_v57 = vsel %vm8070_vm6, %v3749_v51, %v3361_v56 }
 0x2fd   : > { %v3228_v0 = vpop.permute.xlu1 %3227 }
 0x2fe   : > { %v4066_v60 = vsel %vm1390_vm15, %v4055_v16, %v4065_v15  ;;  %v3715_v53 = vsel %vm2277_vm7, %v2977_v50, %v3228_v0 }
 0x2ff   : > { %v3403_v18 = vpop.permute.xlu0 %3402  ;;  %4704 = vmatmul.mubr.msk.bf16.gmra.mrb[20].mxu1 %vm8077_vm10, %v4066_v60  ;;  %vm8084_vm10 = vmmov %vm8082_vm0 }
 0x300   : > { %v3817_v31 = vsel %vm2487_vm3, %v3783_v57, %v3403_v18 }
 0x301   : > { %v3312_v48 = vpop.permute.xlu1 %3311 }
 0x302   : > { %v3751_v45 = vsel %vm2347_vm9, %v3715_v53, %v3312_v48  ;;  %v7691_v53 = vld [vmem:[%s7738_s4] ss:$0 sm:$0xff] }
 0x303   : > { %v3487_v10 = vpop.permute.xlu0 %3486 }
 0x304   : > { %v3852_v11 = vsel %vm3824_vm1, %v3817_v31, %v3487_v10  ;;  %v2979_v10 = vsel %vm8083_vm4, %v7392_v34, 0 }
 0x305   : > { %v3363_v47 = vpop.permute.xlu1 %3362 }
 0x306   : > { %v3785_v7 = vsel %vm8079_vm8, %v3751_v45, %v3363_v47 }
 0x307   : > { %v3538_v25 = vpop.permute.xlu0 %3537 }
 0x308   : > { %v3887_v36 = vsel %vm3859_vm12, %v3852_v11, %v3538_v25 }
 0x309   : > { %v3405_v38 = vpop.permute.xlu1 %3404 }
 0x30a   : > { %v3819_v22 = vsel %vm2487_vm3, %v3785_v7, %v3405_v38 }
 0x30b   : > { %v3580_v21 = vpop.permute.xlu0 %3579 }
 0x30c   : > { %v3922_v44 = vsel %vm3894_vm2, %v3887_v36, %v3580_v21 }
 0x30d   : > { %v3489_v62 = vpop.permute.xlu1 %3488 }
 0x30e   : > { %v3854_v33 = vsel %vm3824_vm1, %v3819_v22, %v3489_v62 }
 0x30f   : > { %v3664_v30 = vpop.permute.xlu0 %3663 }
 0x310   : > { %v3957_v19 = vsel %vm3929_vm14, %v3922_v44, %v3664_v30 }
 0x311   : > { %v4067_v54 = vshrl.u32 %v3957_v19, 16  ;;  %v3540_v27 = vpop.permute.xlu1 %3539  ;;  %v4070_v5 = vshll.u32 %v3957_v19, 16 }
 0x312   : > { %v3889_v23 = vsel %vm3859_vm12, %v3854_v33, %v3540_v27 }
 0x313   : > { %v4069_v3 = vrot.slane %v4067_v54, 7  ;;  %v3666_v1 = vpop.permute.xlu0 %3665 }
 0x315   : > { %v4072_v17 = vor.u32 %v4070_v5, %v4069_v3  ;;  %v3582_v26 = vpop.permute.xlu1 %3581 }
 0x316   : > { %v3924_v61 = vsel %vm3894_vm2, %v3889_v23, %v3582_v26 }
 0x317   : > { %v3959_v52 = vsel %vm3929_vm14, %v3924_v61, %v3666_v1  ;;  %v3314_v58 = vpop.permute.xlu0 %3313  ;;  %v4073_v29 = vsel %vm1390_vm15, %v4062_v14, %v4072_v17 }
 0x318   : > { %v4074_v37 = vshrl.u32 %v3959_v52, 16  ;;  %4707 = vmatprep.mubr.msk.bf16.mxu1 %vm8080_vm13, %v4073_v29  ;;  %v4077_v55 = vshll.u32 %v3959_v52, 16 }
 0x319   : > { %v3230_v63 = vpop.permute.xlu1 %3229 }
 0x31a   : > { %v4076_v49 = vrot.slane %v4074_v37, 7  ;;  %v3718_v41 = vsel %vm2277_vm7, %v2978_v20, %v3230_v63 }
 0x31b   : > { %v3365_v8 = vpop.permute.xlu0 %3364  ;;  %v3753_v35 = vsel %vm2347_vm9, %v3718_v41, %v3314_v58 }
 0x31c   : > { %v4079_v16 = vor.u32 %v4077_v55, %v4076_v49  ;;  %v3787_v4 = vsel %vm8082_vm0, %v3753_v35, %v3365_v8 }
 0x31d   : > { %v3232_v40 = vpop.permute.xlu1 %3231 }
 0x31e   : > { %v4080_v13 = vsel %vm1390_vm15, %v4069_v3, %v4079_v16  ;;  %v3721_v28 = vsel %vm2277_vm7, %v2979_v10, %v3232_v40  ;;  %vm8086_vm7 = vmmov %vm8085_vm5 }
 0x31f   : > { %v3407_v32 = vpop.permute.xlu0 %3406  ;;  %4708 = vmatmul.mubr.msk.bf16.gmra.mrb[24].mxu1 %vm8081_vm11, %v4080_v13 }
 0x320   : > { %v3821_v9 = vsel %vm2487_vm3, %v3787_v4, %v3407_v32 }
 0x321   : > { %v3316_v2 = vpop.permute.xlu1 %3315 }
 0x322   : > { %v3755_v25 = vsel %vm2347_vm9, %v3721_v28, %v3316_v2 }
 0x323   : > { %v3491_v24 = vpop.permute.xlu0 %3490 }
 0x324   : > { %v3856_v56 = vsel %vm3824_vm1, %v3821_v9, %v3491_v24 }
 0x325   : > { %v3367_v43 = vpop.permute.xlu1 %3366 }
 0x326   : > { %v3789_v51 = vsel %vm8084_vm10, %v3755_v25, %v3367_v43 }
 0x327   : > { %v3542_v59 = vpop.permute.xlu0 %3541 }
 0x328   : > { %v3891_v0 = vsel %vm3859_vm12, %v3856_v56, %v3542_v59 }
 0x329   : > { %v3409_v46 = vpop.permute.xlu1 %3408 }
 0x32a   : > { %v3823_v21 = vsel %vm2487_vm3, %v3789_v51, %v3409_v46 }
 0x32b   : > { %v3584_v14 = vpop.permute.xlu0 %3583 }
 0x32c   : > { %v3926_v39 = vsel %vm3894_vm2, %v3891_v0, %v3584_v14 }
 0x32d   : > { %v3493_v15 = vpop.permute.xlu1 %3492 }
 0x32e   : > { %v3858_v31 = vsel %vm3824_vm1, %v3823_v21, %v3493_v15 }
 0x32f   : > { %v3668_v12 = vpop.permute.xlu0 %3667 }
 0x330   : > { %v3961_v60 = vsel %vm3929_vm14, %v3926_v39, %v3668_v12 }
 0x331   : > { %v4081_v18 = vshrl.u32 %v3961_v60, 16  ;;  %v3544_v48 = vpop.permute.xlu1 %3543  ;;  %v4084_v47 = vshll.u32 %v3961_v60, 16 }
 0x332   : > { %v3893_v62 = vsel %vm3859_vm12, %v3858_v31, %v3544_v48 }
 0x333   : > { %v4083_v6 = vrot.slane %v4081_v18, 7 }
 0x335   : > { %v4086_v38 = vor.u32 %v4084_v47, %v4083_v6  ;;  %v3586_v57 = vpop.permute.xlu1 %3585 }
 0x336   : > { %v3928_v34 = vsel %vm3894_vm2, %v3893_v62, %v3586_v57 }
 0x337   : > { %v4087_v11 = vsel %vm1390_vm15, %v4076_v49, %v4086_v38 }
 0x338   : > { %4711 = vmatprep.mubr.msk.bf16.mxu1 %vm8085_vm5, %v4087_v11 }
 0x339   : > { %v3670_v42 = vpop.permute.xlu1 %3669 }
 0x33a   : > { %v3963_v36 = vsel %vm3929_vm14, %v3928_v34, %v3670_v42 }
 0x33b   : > { %v4088_v50 = vshrl.u32 %v3963_v36, 16  ;;  %v4091_v30 = vshll.u32 %v3963_v36, 16 }
 0x33d   : > { %v4090_v44 = vrot.slane %v4088_v50, 7 }
 0x33f   : > { %v4093_v19 = vor.u32 %v4091_v30, %v4090_v44  ;;  %v4685_v45 = vpop.f32.mrb[0].mxu1 }
 0x340   : > { %v4209_v54 = vpop.f32.mrb[1].mxu1  ;;  %v4218_v33 = vadd.f32 %v4685_v45, %v7691_v53 }
 0x341   : > { %v4210_v27 = vadd.f32 %v7691_v53, %v4209_v54  ;;  %v4686_v7 = vpop.f32.mrb[2].mxu1  ;;  %v4094_v22 = vsel %vm1390_vm15, %v4083_v6, %v4093_v19 }
 0x342   : > { %v4212_v3 = vpop.f32.mrb[3].mxu1  ;;  %4712 = vmatmul.mubr.msk.bf16.gmra.mrb[28].mxu1 %vm8086_vm7, %v4094_v22  ;;  %v4338_v23 = vmax.f32 %v4218_v33, 0.0  ;;  %v4221_v26 = vadd.f32 %v4686_v7, %v7691_v53 }
 0x343   : > { %v4336_v5 = vmax.f32 %v4210_v27, 0.0  ;;  %v4213_v1 = vadd.f32 %v7691_v53, %v4212_v3 }
 0x344   : > { %v4339_v61 = vmax.f32 %v4221_v26, 0.0 }
 0x345   : > { %4368 = vxpose.xlu0.b32.start [1/16] (narrow) %v4336_v5, 8  ;;  %v4337_v17 = vmax.f32 %v4213_v1, 0.0 }
 0x349   : > { %4369 = vxpose.xlu0.b32.cont [2/16] (narrow) %v4337_v17, 8 }
 0x34d   : > { %4370 = vxpose.xlu0.b32.cont [3/16] (narrow) %v4338_v23, 8 }
 0x351   : > { %4371 = vxpose.xlu0.b32.cont [4/16] (narrow) %v4339_v61, 8 }
 0x361   : > { %v4689_v52 = vpop.f32.mrb[4].mxu1 }
 0x362   : > { %v4225_v58 = vpop.f32.mrb[5].mxu1  ;;  %v4234_v8 = vadd.f32 %v4689_v52, %v7691_v53 }
 0x363   : > { %v4226_v29 = vadd.f32 %v7691_v53, %v4225_v58  ;;  %v4690_v37 = vpop.f32.mrb[6].mxu1 }
 0x364   : > { %v4228_v63 = vpop.f32.mrb[7].mxu1  ;;  %v4342_v40 = vmax.f32 %v4234_v8, 0.0  ;;  %v4237_v13 = vadd.f32 %v4690_v37, %v7691_v53 }
 0x365   : > { %v4340_v49 = vmax.f32 %v4226_v29, 0.0  ;;  %v4229_v55 = vadd.f32 %v7691_v53, %v4228_v63 }
 0x366   : > { %v4343_v32 = vmax.f32 %v4237_v13, 0.0 }
 0x367   : > { %4372 = vxpose.xlu0.b32.cont [5/16] (narrow) %v4340_v49, 8  ;;  %v4341_v16 = vmax.f32 %v4229_v55, 0.0 }
 0x36b   : > { %4373 = vxpose.xlu0.b32.cont [6/16] (narrow) %v4341_v16, 8 }
 0x36f   : > { %4374 = vxpose.xlu0.b32.cont [7/16] (narrow) %v4342_v40, 8 }
 0x373   : > { %4375 = vxpose.xlu0.b32.cont [8/16] (narrow) %v4343_v32, 8 }
 0x381   : > { %v4693_v2 = vpop.f32.mrb[8].mxu1 }
 0x382   : > { %v4241_v24 = vpop.f32.mrb[9].mxu1  ;;  %v4250_v46 = vadd.f32 %v4693_v2, %v7691_v53 }
 0x383   : > { %v4242_v20 = vadd.f32 %v7691_v53, %v4241_v24  ;;  %v4694_v41 = vpop.f32.mrb[10].mxu1 }
 0x384   : > { %v4244_v43 = vpop.f32.mrb[11].mxu1  ;;  %v4346_v14 = vmax.f32 %v4250_v46, 0.0  ;;  %v4253_v9 = vadd.f32 %v4694_v41, %v7691_v53 }
 0x385   : > { %v4344_v59 = vmax.f32 %v4242_v20, 0.0  ;;  %v4245_v35 = vadd.f32 %v7691_v53, %v4244_v43 }
 0x386   : > { %v4347_v56 = vmax.f32 %v4253_v9, 0.0 }
 0x387   : > { %4376 = vxpose.xlu0.b32.cont [9/16] (narrow) %v4344_v59, 8  ;;  %v4345_v4 = vmax.f32 %v4245_v35, 0.0 }
 0x38b   : > { %4377 = vxpose.xlu0.b32.cont [10/16] (narrow) %v4345_v4, 8 }
 0x38f   : > { %4378 = vxpose.xlu0.b32.cont [11/16] (narrow) %v4346_v14, 8 }
 0x393   : > { %4379 = vxpose.xlu0.b32.cont [12/16] (narrow) %v4347_v56, 8 }
 0x396   : > { %v4697_v15 = vpop.f32.mrb[12].mxu1 }
 0x397   : > { %v4257_v0 = vpop.f32.mrb[13].mxu1  ;;  %v4266_v10 = vadd.f32 %v4697_v15, %v7691_v53 }
 0x398   : > { %v4258_v39 = vadd.f32 %v7691_v53, %v4257_v0  ;;  %v4698_v12 = vpop.f32.mrb[14].mxu1 }
 0x399   : > { %v4260_v60 = vpop.f32.mrb[15].mxu1  ;;  %v4350_v6 = vmax.f32 %v4266_v10, 0.0  ;;  %v4269_v47 = vadd.f32 %v4698_v12, %v7691_v53 }
 0x39a   : > { %v4348_v18 = vmax.f32 %v4258_v39, 0.0  ;;  %v4261_v48 = vadd.f32 %v7691_v53, %v4260_v60 }
 0x39b   : > { %v4351_v25 = vmax.f32 %v4269_v47, 0.0 }
 0x39c   : > { %4380 = vxpose.xlu0.b32.cont [13/16] (narrow) %v4348_v18, 8  ;;  %v4349_v28 = vmax.f32 %v4261_v48, 0.0 }
 0x3a0   : > { %4381 = vxpose.xlu0.b32.cont [14/16] (narrow) %v4349_v28, 8 }
 0x3a4   : > { %4382 = vxpose.xlu0.b32.cont [15/16] (narrow) %v4350_v6, 8 }
 0x3a8   : > { %4383 = vxpose.xlu0.b32.end [16/16] (narrow) %v4351_v25, 8 }
 0x3b2   : > { %v4701_v51 = vpop.f32.mrb[16].mxu1 }
 0x3b3   : > { %v4273_v38 = vpop.f32.mrb[17].mxu1  ;;  %v4282_v34 = vadd.f32 %v4701_v51, %v7691_v53 }
 0x3b4   : > { %v4274_v57 = vadd.f32 %v7691_v53, %v4273_v38  ;;  %v4702_v21 = vpop.f32.mrb[18].mxu1 }
 0x3b5   : > { %v4276_v31 = vpop.f32.mrb[19].mxu1  ;;  %v4354_v36 = vmax.f32 %v4282_v34, 0.0  ;;  %v4285_v50 = vadd.f32 %v4702_v21, %v7691_v53 }
 0x3b6   : > { %v4352_v11 = vmax.f32 %v4274_v57, 0.0  ;;  %v4277_v62 = vadd.f32 %v7691_v53, %v4276_v31 }
 0x3b7   : > { %v4355_v44 = vmax.f32 %v4285_v50, 0.0 }
 0x3b8   : > { %4400 = vxpose.xlu1.b32.start [1/16] (narrow) %v4352_v11, 8  ;;  %v4353_v42 = vmax.f32 %v4277_v62, 0.0 }
 0x3bc   : > { %4401 = vxpose.xlu1.b32.cont [2/16] (narrow) %v4353_v42, 8 }
 0x3c0   : > { %4402 = vxpose.xlu1.b32.cont [3/16] (narrow) %v4354_v36, 8 }
 0x3c4   : > { %4403 = vxpose.xlu1.b32.cont [4/16] (narrow) %v4355_v44, 8 }
 0x3d2   : > { %v4705_v30 = vpop.f32.mrb[20].mxu1 }
 0x3d3   : > { %v4289_v19 = vpop.f32.mrb[21].mxu1  ;;  %v4298_v3 = vadd.f32 %v4705_v30, %v7691_v53 }
 0x3d4   : > { %v4290_v45 = vadd.f32 %v7691_v53, %v4289_v19  ;;  %v4706_v54 = vpop.f32.mrb[22].mxu1 }
 0x3d5   : > { %v4292_v27 = vpop.f32.mrb[23].mxu1  ;;  %v4358_v1 = vmax.f32 %v4298_v3, 0.0  ;;  %v4301_v33 = vadd.f32 %v4706_v54, %v7691_v53 }
 0x3d6   : > { %v4356_v7 = vmax.f32 %v4290_v45, 0.0  ;;  %v4293_v22 = vadd.f32 %v7691_v53, %v4292_v27 }
 0x3d7   : > { %v4359_v17 = vmax.f32 %v4301_v33, 0.0 }
 0x3d8   : > { %4404 = vxpose.xlu1.b32.cont [5/16] (narrow) %v4356_v7, 8  ;;  %v4357_v5 = vmax.f32 %v4293_v22, 0.0 }
 0x3dc   : > { %4405 = vxpose.xlu1.b32.cont [6/16] (narrow) %v4357_v5, 8 }
 0x3e0   : > { %4406 = vxpose.xlu1.b32.cont [7/16] (narrow) %v4358_v1, 8 }
 0x3e4   : > { %4407 = vxpose.xlu1.b32.cont [8/16] (narrow) %v4359_v17, 8 }
 0x3ec   : > { %v4384_v14 = vpop.trf.xlu0 }
 0x3f2   : > { %v4709_v23 = vpop.f32.mrb[24].mxu1 }
 0x3f3   : > { %v4305_v26 = vpop.f32.mrb[25].mxu1  ;;  %v4314_v63 = vadd.f32 %v4709_v23, %v7691_v53 }
 0x3f4   : > { %v4306_v61 = vadd.f32 %v7691_v53, %v4305_v26  ;;  %v4710_v52 = vpop.f32.mrb[26].mxu1 }
 0x3f5   : > { %v4308_v58 = vpop.f32.mrb[27].mxu1  ;;  %v4362_v55 = vmax.f32 %v4314_v63, 0.0  ;;  %v4317_v8 = vadd.f32 %v4710_v52, %v7691_v53 }
 0x3f6   : > { %v4360_v29 = vmax.f32 %v4306_v61, 0.0  ;;  %v4309_v37 = vadd.f32 %v7691_v53, %v4308_v58 }
 0x3f7   : > { %v4363_v16 = vmax.f32 %v4317_v8, 0.0 }
 0x3f8   : > { %4408 = vxpose.xlu1.b32.cont [9/16] (narrow) %v4360_v29, 8  ;;  %v4361_v49 = vmax.f32 %v4309_v37, 0.0 }
 0x3fc   : > { %4409 = vxpose.xlu1.b32.cont [10/16] (narrow) %v4361_v49, 8 }
 0x400   : > { %4410 = vxpose.xlu1.b32.cont [11/16] (narrow) %v4362_v55, 8 }
 0x404   : > { %4411 = vxpose.xlu1.b32.cont [12/16] (narrow) %v4363_v16, 8 }
 0x415   : > { %v4713_v40 = vpop.f32.mrb[28].mxu1 }
 0x416   : > { %v4321_v13 = vpop.f32.mrb[29].mxu1  ;;  %v4330_v43 = vadd.f32 %v4713_v40, %v7691_v53 }
 0x417   : > { %v4322_v32 = vadd.f32 %v7691_v53, %v4321_v13  ;;  %v4714_v2 = vpop.f32.mrb[30].mxu1 }
 0x418   : > { %v4324_v24 = vpop.f32.mrb[31].mxu1  ;;  %v4366_v35 = vmax.f32 %v4330_v43, 0.0  ;;  %v4333_v46 = vadd.f32 %v4714_v2, %v7691_v53 }
 0x419   : > { %v4364_v20 = vmax.f32 %v4322_v32, 0.0  ;;  %v4325_v41 = vadd.f32 %v7691_v53, %v4324_v24 }
 0x41a   : > { %v4367_v4 = vmax.f32 %v4333_v46, 0.0 }
 0x41b   : > { %4412 = vxpose.xlu1.b32.cont [13/16] (narrow) %v4364_v20, 8  ;;  %v4365_v59 = vmax.f32 %v4325_v41, 0.0 }
 0x41f   : > { %4413 = vxpose.xlu1.b32.cont [14/16] (narrow) %v4365_v59, 8 }
 0x423   : > { %4414 = vxpose.xlu1.b32.cont [15/16] (narrow) %v4366_v35, 8 }
 0x427   : > { %4415 = vxpose.xlu1.b32.end [16/16] (narrow) %v4367_v4, 8 }
 0x46b   : > { %v4416_v9 = vpop.trf.xlu1 }
 0x46c   : > { %v4434_v56 = vcombine.low %v4384_v14, %v4416_v9 }
 0x46e   : > { %4436 = vst [vmem:[%s224_s13] sm:$0xff] %v4434_v56 }
 0x46f PF: > { %s15_s18 = sadd.s32 1, %s4788_s18  }
 0x470   : > { %p12_p4 = scmp.ge.s32.totalorder %s15_s18, 4  }
 0x472   :  { %14 = sbr.rel (!%p12_p4) target bundleno = 1 (0x1), region = 70 }

</bundles_post_ra>
